<compile_context>
chip_gen: v7x
topology: tpu7x:2x2x1
jax: 0.10.0
libtpu: 0.0.40
codegen_flags: <defaults>
</compile_context>

<pallas_src>
import functools

import jax
import jax.numpy as jnp
from jax import lax
from jax.experimental import pallas as pl
from jax.experimental.pallas import tpu as pltpu

NEG_SLOPE = 0.01   # PyTorch F.leaky_relu default
EPS = 1e-12        # PyTorch F.normalize default eps


def _leaky_relu(x):
    return jnp.where(x > 0, x, NEG_SLOPE * x)


def _anelr_kernel(a_ref, at_ref, c_ref, s_ref,
                  wenc0_ref, wenc1_ref, wd0_ref, wd1_ref, bias_ref,
                  lemb_ref, m_ref, hht_ref, *, bi, n):
    """One grid step processes `bi` instances flattened along rows (bi*n rows)."""
    nhid0 = wenc0_ref.shape[2]
    nhid1 = wenc1_ref.shape[2]
    d = a_ref.shape[1]

    A = a_ref[...]                               # (bi*n, d)

    # Stacked weights: slot 0 = online encoder, slot 1 = target encoder.
    we0, wt0 = wenc0_ref[0], wenc0_ref[1]
    we1, wt1 = wenc1_ref[0], wenc1_ref[1]

    # Packed bias rows: [be0, be1, bt0, bt1, bd0, bd1, 0, 0]
    be0 = bias_ref[0:1, :nhid0]
    be1 = bias_ref[1:2, :nhid1]
    bt0 = bias_ref[2:3, :nhid0]
    bt1 = bias_ref[3:4, :nhid1]
    bd0 = bias_ref[4:5, :nhid0]
    bd1 = bias_ref[5:6, :d]

    # --- online encoder:  H = lrelu(lrelu(A @ We0 + be0) @ We1 + be1)
    h0 = _leaky_relu(jnp.dot(A, we0, preferred_element_type=jnp.float32) + be0)
    H = _leaky_relu(jnp.dot(h0, we1, preferred_element_type=jnp.float32) + be1)
    hht_ref[:, :nhid1] = H

    # --- online decoder + residual (decode - A) * C for the nuclear norm
    d0 = _leaky_relu(jnp.dot(H, wd0_ref[...], preferred_element_type=jnp.float32) + bd0)
    decode = _leaky_relu(jnp.dot(d0, wd1_ref[...], preferred_element_type=jnp.float32) + bd1)
    m_ref[...] = (decode - A) * c_ref[...]

    # --- target encoder (torch.no_grad forward; same math, separate weights)
    t0 = _leaky_relu(jnp.dot(at_ref[...], wt0, preferred_element_type=jnp.float32) + bt0)
    Ht = _leaky_relu(jnp.dot(t0, wt1, preferred_element_type=jnp.float32) + bt1)
    hht_ref[:, nhid1:2 * nhid1] = Ht

    # --- row L2 normalization (F.normalize p=2 dim=1).  rsqrt on clamped sumsq
    # is equivalent to x / max(||x||, eps); the original isnan-select is dead
    # code once the denominator is clamped, so it is removed.
    sumsq = jnp.sum(H * H, axis=1, keepdims=True)
    Hn = H * lax.rsqrt(jnp.maximum(sumsq, EPS * EPS))

    S = s_ref[...]                               # (bi*n, n)
    one = jnp.float32(1.0)
    # Per-instance cosine similarity + weighted reduction (static unroll).
    for i in range(bi):
        Hni = Hn[i * n:(i + 1) * n, :]           # (n, nhid1)
        Si = S[i * n:(i + 1) * n, :]             # (n, n)
        # Hn @ Hn^T without materializing a transpose: contract last dims.
        cos = lax.dot_general(Hni, Hni, (((1,), (1,)), ((), ())),
                              preferred_element_type=jnp.float32)
        lemb_ref[i:i + 1, :] = jnp.sum(Si * (one - cos), keepdims=True)


def anelr_forward_batched(A, A_tilde, C, S, params):
    """Batched forward.  A/A_tilde/C/S: (B, N, N).  Returns per-instance
    (L_emb (B,), L_rec (B,), H_tilde (B,N,nhid1), H (B,N,nhid1))."""
    B, N, D = A.shape
    nhid0 = params["we0"].shape[1]
    nhid1 = params["we1"].shape[1]

    # Instances per grid step: aim for ~128 rows per block (MXU/vreg friendly).
    if N % 8 == 0:
        bi = max(1, min(B, 128 // N))
        while B % bi:
            bi -= 1
    else:
        bi = B   # single full-array block keeps tiling constraints trivial
    rows = bi * N
    steps = B // bi

    f32 = jnp.float32
    a2 = A.reshape(B * N, D).astype(f32)
    at2 = A_tilde.reshape(B * N, D).astype(f32)
    c2 = C.reshape(B * N, D).astype(f32)
    s2 = S.reshape(B * N, N).astype(f32)

    # Stack online + target encoder weights; pack all biases into one buffer.
    wenc0 = jnp.stack([params["we0"], params["wt0"]]).astype(f32)    # (2, D, nhid0)
    wenc1 = jnp.stack([params["we1"], params["wt1"]]).astype(f32)    # (2, nhid0, nhid1)
    wd0 = params["wd0"].astype(f32)
    wd1 = params["wd1"].astype(f32)

    maxf = max(nhid0, nhid1, D)

    def _pad_bias(b):
        b = b.reshape(-1).astype(f32)
        return jnp.pad(b, (0, maxf - b.shape[0]))

    biases = jnp.stack([_pad_bias(params["be0"]), _pad_bias(params["be1"]),
                        _pad_bias(params["bt0"]), _pad_bias(params["bt1"]),
                        _pad_bias(params["bd0"]), _pad_bias(params["bd1"]),
                        jnp.zeros((maxf,), f32), jnp.zeros((maxf,), f32)])  # (8, maxf)

    kernel = functools.partial(_anelr_kernel, bi=bi, n=N)

    # Advisory cost estimate (matmuls dominate; rsqrt per row on the EUP).
    matmul_flops = (2 * N * (D * nhid0 + nhid0 * nhid1) * 2          # both encoders
                    + 2 * N * (nhid1 * nhid0 + nhid0 * D)            # decoder
                    + 2 * N * N * nhid1)                             # cosine matmul
    cost = pl.CostEstimate(
        flops=int(B * matmul_flops),
        transcendentals=int(B * N),
        bytes_accessed=int(4 * (4 * B * N * D + 2 * B * N * N + B * N * 2 * nhid1 + B
                                + 2 * D * nhid0 + 2 * nhid0 * nhid1
                                + nhid1 * nhid0 + nhid0 * D + 8 * maxf)),
    )

    def row_block(w):
        return pl.BlockSpec((rows, w), lambda i: (i, 0))

    def const_block(shape):
        return pl.BlockSpec(shape, lambda i, _n=len(shape): (0,) * _n)

    lemb, m_flat, hht = pl.pallas_call(
        kernel,
        out_shape=(jax.ShapeDtypeStruct((B, 1), f32),                 # L_emb per instance
                   jax.ShapeDtypeStruct((B * N, D), f32),             # (decode - A) * C
                   jax.ShapeDtypeStruct((B * N, 2 * nhid1), f32)),    # [H | H_tilde]
        grid=(steps,),
        in_specs=[row_block(D), row_block(D), row_block(D), row_block(N),
                  const_block((2, D, nhid0)), const_block((2, nhid0, nhid1)),
                  const_block((nhid1, nhid0)), const_block((nhid0, D)),
                  const_block((8, maxf))],
        out_specs=(pl.BlockSpec((bi, 1), lambda i: (i, 0)),
                   row_block(D), row_block(2 * nhid1)),
        compiler_params=pltpu.CompilerParams(dimension_semantics=("parallel",)),
        cost_estimate=cost,
    )(a2, at2, c2, s2, wenc0, wenc1, wd0, wd1, biases)

    M = m_flat.reshape(B, N, D)
    HHt = hht.reshape(B, N, 2 * nhid1)
    H = HHt[..., :nhid1]
    H_tilde = lax.stop_gradient(HHt[..., nhid1:])   # mirrors H_tilde.detach()

    # TODO(synk): nuclear norm (SVD) has no Pallas equivalent; computed in plain JAX.
    L_rec = jnp.sum(jnp.linalg.svd(M, compute_uv=False), axis=-1)

    # TODO(synk): training through this forward needs a custom_vjp for pallas_call
    # (and the target-encoder weights excluded from gradients, as in torch.no_grad).
    return lemb[:, 0], L_rec, H_tilde, H


def anelr_forward(A, A_tilde, C, S, params):
    """Single-instance forward matching the original module signature."""
    lemb, lrec, H_tilde, H = anelr_forward_batched(
        A[None], A_tilde[None], C[None], S[None], params)
    return lemb[0], lrec[0], H_tilde[0], H[0]


def init_params(key, node_size, nhid0, nhid1):
    """Deterministic nn.Linear-style init (uniform +/- 1/sqrt(fan_in))."""
    ks = jax.random.split(key, 4)

    def linear(k, fan_in, fan_out):
        kw, kb = jax.random.split(k)
        bound = 1.0 / float(fan_in) ** 0.5
        W = jax.random.uniform(kw, (fan_in, fan_out), jnp.float32, -bound, bound)
        b = jax.random.uniform(kb, (1, fan_out), jnp.float32, -bound, bound)
        return W, b

    we0, be0 = linear(ks[0], node_size, nhid0)
    we1, be1 = linear(ks[1], nhid0, nhid1)
    wd0, bd0 = linear(ks[2], nhid1, nhid0)
    wd1, bd1 = linear(ks[3], nhid0, node_size)

    # target encoder is a deepcopy of the online encoder at init time
    return dict(we0=we0, be0=be0, we1=we1, be1=be1,
                wt0=jnp.array(we0), bt0=jnp.array(be0),
                wt1=jnp.array(we1), bt1=jnp.array(be1),
                wd0=wd0, bd0=bd0, wd1=wd1, bd1=bd1)


if __name__ == "__main__":
    node_size = 16   # A is a square [node_size, node_size] adjacency-style input
    nhid0 = 32
    nhid1 = 8
    batch = 16       # 16 instances -> 8 instances (128 rows) per grid step, 2 steps

    key = jax.random.PRNGKey(0)
    kA, kAt, kC, kS, kP = jax.random.split(key, 5)

    A = jax.random.uniform(kA, (batch, node_size, node_size), jnp.float32)
    A_tilde = jax.random.uniform(kAt, (batch, node_size, node_size), jnp.float32)
    C = jax.random.uniform(kC, (batch, node_size, node_size), jnp.float32) + 1.0
    S = jax.random.uniform(kS, (batch, node_size, node_size), jnp.float32)

    params = init_params(kP, node_size, nhid0, nhid1)

    L_emb, L_rec, H_tilde, H = jax.jit(anelr_forward_batched)(A, A_tilde, C, S, params)
    jax.block_until_ready((L_emb, L_rec, H_tilde, H))

    assert L_emb.shape == (batch,) and L_rec.shape == (batch,)
    assert H.shape == (batch, node_size, nhid1)
    assert H_tilde.shape == (batch, node_size, nhid1)
    assert bool(jnp.all(jnp.isfinite(L_emb))) and bool(jnp.all(jnp.isfinite(L_rec)))
    assert bool(jnp.all(jnp.isfinite(H))) and bool(jnp.all(jnp.isfinite(H_tilde)))

    # single-instance path (matches the original module's forward signature)
    l1, r1, ht1, h1 = anelr_forward(A[0], A_tilde[0], C[0], S[0], params)
    jax.block_until_ready((l1, r1, ht1, h1))
    assert l1.shape == () and r1.shape == ()
    assert h1.shape == (node_size, nhid1) and ht1.shape == (node_size, nhid1)

    print("KERNEL_OK")
</pallas_src>

<mosaic_0001>
module attributes {stable_mosaic.version = 11 : i64} {
  func.func @_anelr_kernel(%arg0: i32, %arg1: memref<128x16xf32, #tpu.memory_space<vmem>>, %arg2: memref<128x16xf32, #tpu.memory_space<vmem>>, %arg3: memref<128x16xf32, #tpu.memory_space<vmem>>, %arg4: memref<128x16xf32, #tpu.memory_space<vmem>>, %arg5: memref<2x16x32xf32, #tpu.memory_space<vmem>>, %arg6: memref<2x32x8xf32, #tpu.memory_space<vmem>>, %arg7: memref<8x32xf32, #tpu.memory_space<vmem>>, %arg8: memref<32x16xf32, #tpu.memory_space<vmem>>, %arg9: memref<8x32xf32, #tpu.memory_space<vmem>>, %arg10: memref<8x1xf32, #tpu.memory_space<vmem>>, %arg11: memref<128x16xf32, #tpu.memory_space<vmem>>, %arg12: memref<128x16xf32, #tpu.memory_space<vmem>>) attributes {dimension_semantics = [#tpu.dimension_semantics<parallel>], iteration_bounds = array<i64: 2>, scalar_prefetch = 0 : i64, scratch_operands = 0 : i64, tpu.core_type = #tpu.core_type<tc>, window_params = [{transform_indices = @transform_0, window_bounds = array<i64: 128, 16>}, {transform_indices = @transform_1, window_bounds = array<i64: 128, 16>}, {transform_indices = @transform_2, window_bounds = array<i64: 128, 16>}, {transform_indices = @transform_3, window_bounds = array<i64: 128, 16>}, {pipeline_mode = #tpu.pipeline_mode<synchronous>, transform_indices = @transform_4, window_bounds = array<i64: 2, 16, 32>}, {pipeline_mode = #tpu.pipeline_mode<synchronous>, transform_indices = @transform_5, window_bounds = array<i64: 2, 32, 8>}, {pipeline_mode = #tpu.pipeline_mode<synchronous>, transform_indices = @transform_6, window_bounds = array<i64: 8, 32>}, {pipeline_mode = #tpu.pipeline_mode<synchronous>, transform_indices = @transform_7, window_bounds = array<i64: 32, 16>}, {pipeline_mode = #tpu.pipeline_mode<synchronous>, transform_indices = @transform_8, window_bounds = array<i64: 8, 32>}, {transform_indices = @transform_9, window_bounds = array<i64: 8, 1>}, {transform_indices = @transform_10, window_bounds = array<i64: 128, 16>}, {transform_indices = @transform_11, window_bounds = array<i64: 128, 16>}]} {
    %c0 = arith.constant 0 : index
    %c0_0 = arith.constant 0 : index
    %0 = vector.load %arg1[%c0, %c0_0] : memref<128x16xf32, #tpu.memory_space<vmem>>, vector<128x16xf32>
    %c0_1 = arith.constant 0 : index
    %c0_2 = arith.constant 0 : index
    %c0_3 = arith.constant 0 : index
    %1 = vector.load %arg5[%c0_1, %c0_2, %c0_3] : memref<2x16x32xf32, #tpu.memory_space<vmem>>, vector<1x16x32xf32>
    %2 = vector.shape_cast %1 : vector<1x16x32xf32> to vector<16x32xf32>
    %c1 = arith.constant 1 : index
    %c0_4 = arith.constant 0 : index
    %c0_5 = arith.constant 0 : index
    %3 = vector.load %arg5[%c1, %c0_4, %c0_5] : memref<2x16x32xf32, #tpu.memory_space<vmem>>, vector<1x16x32xf32>
    %4 = vector.shape_cast %3 : vector<1x16x32xf32> to vector<16x32xf32>
    %c0_6 = arith.constant 0 : index
    %c0_7 = arith.constant 0 : index
    %c0_8 = arith.constant 0 : index
    %5 = vector.load %arg6[%c0_6, %c0_7, %c0_8] : memref<2x32x8xf32, #tpu.memory_space<vmem>>, vector<1x32x8xf32>
    %6 = vector.shape_cast %5 : vector<1x32x8xf32> to vector<32x8xf32>
    %c1_9 = arith.constant 1 : index
    %c0_10 = arith.constant 0 : index
    %c0_11 = arith.constant 0 : index
    %7 = vector.load %arg6[%c1_9, %c0_10, %c0_11] : memref<2x32x8xf32, #tpu.memory_space<vmem>>, vector<1x32x8xf32>
    %8 = vector.shape_cast %7 : vector<1x32x8xf32> to vector<32x8xf32>
    %c0_12 = arith.constant 0 : index
    %c0_13 = arith.constant 0 : index
    %9 = vector.load %arg9[%c0_12, %c0_13] : memref<8x32xf32, #tpu.memory_space<vmem>>, vector<1x32xf32>
    %c1_14 = arith.constant 1 : index
    %c0_15 = arith.constant 0 : index
    %10 = vector.load %arg9[%c1_14, %c0_15] : memref<8x32xf32, #tpu.memory_space<vmem>>, vector<1x8xf32>
    %c2 = arith.constant 2 : index
    %c0_16 = arith.constant 0 : index
    %11 = vector.load %arg9[%c2, %c0_16] : memref<8x32xf32, #tpu.memory_space<vmem>>, vector<1x32xf32>
    %c3 = arith.constant 3 : index
    %c0_17 = arith.constant 0 : index
    %12 = vector.load %arg9[%c3, %c0_17] : memref<8x32xf32, #tpu.memory_space<vmem>>, vector<1x8xf32>
    %c4 = arith.constant 4 : index
    %c0_18 = arith.constant 0 : index
    %13 = vector.load %arg9[%c4, %c0_18] : memref<8x32xf32, #tpu.memory_space<vmem>>, vector<1x32xf32>
    %c5 = arith.constant 5 : index
    %c0_19 = arith.constant 0 : index
    %14 = vector.load %arg9[%c5, %c0_19] : memref<8x32xf32, #tpu.memory_space<vmem>>, vector<1x16xf32>
    %cst = arith.constant dense<0.000000e+00> : vector<128x32xf32>
    %15 = tpu.matmul %0, %2, %cst {dimension_numbers = #tpu.dot_dimension_numbers<[1], [0], [0], [1], [0, 0, 1, 1], [], []>} : vector<128x16xf32>, vector<16x32xf32>, vector<128x32xf32> -> vector<128x32xf32>
    %16 = vector.broadcast %9 : vector<1x32xf32> to vector<128x32xf32>
    %17 = arith.addf %15, %16 : vector<128x32xf32>
    %cst_20 = arith.constant 0.000000e+00 : f32
    %18 = vector.broadcast %cst_20 : f32 to vector<128x32xf32>
    %19 = arith.cmpf ogt, %17, %18 : vector<128x32xf32>
    %cst_21 = arith.constant 0.00999999977 : f32
    %20 = vector.broadcast %cst_21 : f32 to vector<128x32xf32>
    %21 = arith.mulf %20, %17 : vector<128x32xf32>
    %22 = arith.select %19, %17, %21 : vector<128x32xi1>, vector<128x32xf32>
    %cst_22 = arith.constant dense<0.000000e+00> : vector<128x8xf32>
    %23 = tpu.matmul %22, %6, %cst_22 {dimension_numbers = #tpu.dot_dimension_numbers<[1], [0], [0], [1], [0, 0, 1, 1], [], []>} : vector<128x32xf32>, vector<32x8xf32>, vector<128x8xf32> -> vector<128x8xf32>
    %24 = vector.broadcast %10 : vector<1x8xf32> to vector<128x8xf32>
    %25 = arith.addf %23, %24 : vector<128x8xf32>
    %cst_23 = arith.constant 0.000000e+00 : f32
    %26 = vector.broadcast %cst_23 : f32 to vector<128x8xf32>
    %27 = arith.cmpf ogt, %25, %26 : vector<128x8xf32>
    %cst_24 = arith.constant 0.00999999977 : f32
    %28 = vector.broadcast %cst_24 : f32 to vector<128x8xf32>
    %29 = arith.mulf %28, %25 : vector<128x8xf32>
    %30 = arith.select %27, %25, %29 : vector<128x8xi1>, vector<128x8xf32>
    %c0_25 = arith.constant 0 : index
    %c0_26 = arith.constant 0 : index
    %31 = vector.load %arg12[%c0_25, %c0_26] : memref<128x16xf32, #tpu.memory_space<vmem>>, vector<128x8xf32>
    tpu.vector_store %arg12[%c0_25, %c0_26], %30 {strides = array<i32>} : memref<128x16xf32, #tpu.memory_space<vmem>>, vector<128x8xf32>,
    %c0_27 = arith.constant 0 : index
    %c0_28 = arith.constant 0 : index
    %32 = vector.load %arg7[%c0_27, %c0_28] : memref<8x32xf32, #tpu.memory_space<vmem>>, vector<8x32xf32>
    %cst_29 = arith.constant dense<0.000000e+00> : vector<128x32xf32>
    %33 = tpu.matmul %30, %32, %cst_29 {dimension_numbers = #tpu.dot_dimension_numbers<[1], [0], [0], [1], [0, 0, 1, 1], [], []>} : vector<128x8xf32>, vector<8x32xf32>, vector<128x32xf32> -> vector<128x32xf32>
    %34 = vector.broadcast %13 : vector<1x32xf32> to vector<128x32xf32>
    %35 = arith.addf %33, %34 : vector<128x32xf32>
    %cst_30 = arith.constant 0.000000e+00 : f32
    %36 = vector.broadcast %cst_30 : f32 to vector<128x32xf32>
    %37 = arith.cmpf ogt, %35, %36 : vector<128x32xf32>
    %cst_31 = arith.constant 0.00999999977 : f32
    %38 = vector.broadcast %cst_31 : f32 to vector<128x32xf32>
    %39 = arith.mulf %38, %35 : vector<128x32xf32>
    %40 = arith.select %37, %35, %39 : vector<128x32xi1>, vector<128x32xf32>
    %c0_32 = arith.constant 0 : index
    %c0_33 = arith.constant 0 : index
    %41 = vector.load %arg8[%c0_32, %c0_33] : memref<32x16xf32, #tpu.memory_space<vmem>>, vector<32x16xf32>
    %cst_34 = arith.constant dense<0.000000e+00> : vector<128x16xf32>
    %42 = tpu.matmul %40, %41, %cst_34 {dimension_numbers = #tpu.dot_dimension_numbers<[1], [0], [0], [1], [0, 0, 1, 1], [], []>} : vector<128x32xf32>, vector<32x16xf32>, vector<128x16xf32> -> vector<128x16xf32>
    %43 = vector.broadcast %14 : vector<1x16xf32> to vector<128x16xf32>
    %44 = arith.addf %42, %43 : vector<128x16xf32>
    %cst_35 = arith.constant 0.000000e+00 : f32
    %45 = vector.broadcast %cst_35 : f32 to vector<128x16xf32>
    %46 = arith.cmpf ogt, %44, %45 : vector<128x16xf32>
    %cst_36 = arith.constant 0.00999999977 : f32
    %47 = vector.broadcast %cst_36 : f32 to vector<128x16xf32>
    %48 = arith.mulf %47, %44 : vector<128x16xf32>
    %49 = arith.select %46, %44, %48 : vector<128x16xi1>, vector<128x16xf32>
    %50 = arith.subf %49, %0 : vector<128x16xf32>
    %c0_37 = arith.constant 0 : index
    %c0_38 = arith.constant 0 : index
    %51 = vector.load %arg3[%c0_37, %c0_38] : memref<128x16xf32, #tpu.memory_space<vmem>>, vector<128x16xf32>
    %52 = arith.mulf %50, %51 : vector<128x16xf32>
    %c0_39 = arith.constant 0 : index
    %c0_40 = arith.constant 0 : index
    %53 = vector.load %arg11[%c0_39, %c0_40] : memref<128x16xf32, #tpu.memory_space<vmem>>, vector<128x16xf32>
    tpu.vector_store %arg11[%c0_39, %c0_40], %52 {strides = array<i32>} : memref<128x16xf32, #tpu.memory_space<vmem>>, vector<128x16xf32>,
    %c0_41 = arith.constant 0 : index
    %c0_42 = arith.constant 0 : index
    %54 = vector.load %arg2[%c0_41, %c0_42] : memref<128x16xf32, #tpu.memory_space<vmem>>, vector<128x16xf32>
    %cst_43 = arith.constant dense<0.000000e+00> : vector<128x32xf32>
    %55 = tpu.matmul %54, %4, %cst_43 {dimension_numbers = #tpu.dot_dimension_numbers<[1], [0], [0], [1], [0, 0, 1, 1], [], []>} : vector<128x16xf32>, vector<16x32xf32>, vector<128x32xf32> -> vector<128x32xf32>
    %56 = vector.broadcast %11 : vector<1x32xf32> to vector<128x32xf32>
    %57 = arith.addf %55, %56 : vector<128x32xf32>
    %cst_44 = arith.constant 0.000000e+00 : f32
    %58 = vector.broadcast %cst_44 : f32 to vector<128x32xf32>
    %59 = arith.cmpf ogt, %57, %58 : vector<128x32xf32>
    %cst_45 = arith.constant 0.00999999977 : f32
    %60 = vector.broadcast %cst_45 : f32 to vector<128x32xf32>
    %61 = arith.mulf %60, %57 : vector<128x32xf32>
    %62 = arith.select %59, %57, %61 : vector<128x32xi1>, vector<128x32xf32>
    %cst_46 = arith.constant dense<0.000000e+00> : vector<128x8xf32>
    %63 = tpu.matmul %62, %8, %cst_46 {dimension_numbers = #tpu.dot_dimension_numbers<[1], [0], [0], [1], [0, 0, 1, 1], [], []>} : vector<128x32xf32>, vector<32x8xf32>, vector<128x8xf32> -> vector<128x8xf32>
    %64 = vector.broadcast %12 : vector<1x8xf32> to vector<128x8xf32>
    %65 = arith.addf %63, %64 : vector<128x8xf32>
    %cst_47 = arith.constant 0.000000e+00 : f32
    %66 = vector.broadcast %cst_47 : f32 to vector<128x8xf32>
    %67 = arith.cmpf ogt, %65, %66 : vector<128x8xf32>
    %cst_48 = arith.constant 0.00999999977 : f32
    %68 = vector.broadcast %cst_48 : f32 to vector<128x8xf32>
    %69 = arith.mulf %68, %65 : vector<128x8xf32>
    %70 = arith.select %67, %65, %69 : vector<128x8xi1>, vector<128x8xf32>
    %c0_49 = arith.constant 0 : index
    %c8 = arith.constant 8 : index
    %71 = vector.load %arg12[%c0_49, %c8] : memref<128x16xf32, #tpu.memory_space<vmem>>, vector<128x8xf32>
    tpu.vector_store %arg12[%c0_49, %c8], %70 {strides = array<i32>} : memref<128x16xf32, #tpu.memory_space<vmem>>, vector<128x8xf32>,
    %72 = arith.mulf %30, %30 : vector<128x8xf32>
    %cst_50 = arith.constant dense<0.000000e+00> : vector<128xf32>
    %73 = vector.multi_reduction <add>, %72, %cst_50 [1] : vector<128x8xf32> to vector<128xf32>
    %74 = vector.shape_cast %73 : vector<128xf32> to vector<128x1xf32>
    %cst_51 = arith.constant 1.000000e-24 : f32
    %75 = vector.broadcast %cst_51 : f32 to vector<128x1xf32>
    %76 = arith.maximumf %74, %75 : vector<128x1xf32>
    %77 = math.rsqrt %76 : vector<128x1xf32>
    %78 = vector.broadcast %77 : vector<128x1xf32> to vector<128x8xf32>
    %79 = arith.mulf %30, %78 : vector<128x8xf32>
    %c0_52 = arith.constant 0 : index
    %c0_53 = arith.constant 0 : index
    %80 = vector.load %arg4[%c0_52, %c0_53] : memref<128x16xf32, #tpu.memory_space<vmem>>, vector<128x16xf32>
    %81 = vector.extract_strided_slice %79 {offsets = [0, 0], sizes = [16, 8], strides = [1, 1]} : vector<128x8xf32> to vector<16x8xf32>
    %82 = vector.extract_strided_slice %80 {offsets = [0, 0], sizes = [16, 16], strides = [1, 1]} : vector<128x16xf32> to vector<16x16xf32>
    %cst_54 = arith.constant dense<0.000000e+00> : vector<16x16xf32>
    %83 = tpu.matmul %81, %81, %cst_54 {dimension_numbers = #tpu.dot_dimension_numbers<[1], [1], [0], [0], [0, 0, 1, 0], [], []>} : vector<16x8xf32>, vector<16x8xf32>, vector<16x16xf32> -> vector<16x16xf32>
    %cst_55 = arith.constant 1.000000e+00 : f32
    %84 = vector.broadcast %cst_55 : f32 to vector<16x16xf32>
    %85 = arith.subf %84, %83 : vector<16x16xf32>
    %86 = arith.mulf %82, %85 : vector<16x16xf32>
    %87 = vector.shape_cast %86 : vector<16x16xf32> to vector<1x16x16xf32>
    %cst_56 = arith.constant dense<0.000000e+00> : vector<1xf32>
    %88 = vector.multi_reduction <add>, %87, %cst_56 [1, 2] : vector<1x16x16xf32> to vector<1xf32>
    %89 = vector.shape_cast %88 : vector<1xf32> to vector<1x1x1xf32>
    %90 = vector.extract %89[0, 0, 0] : f32 from vector<1x1x1xf32>
    %91 = vector.broadcast %90 : f32 to vector<1x1xf32>
    %c0_57 = arith.constant 0 : index
    %c0_58 = arith.constant 0 : index
    %92 = vector.load %arg10[%c0_57, %c0_58] : memref<8x1xf32, #tpu.memory_space<vmem>>, vector<1x1xf32>
    tpu.vector_store %arg10[%c0_57, %c0_58], %91 {strides = array<i32>} : memref<8x1xf32, #tpu.memory_space<vmem>>, vector<1x1xf32>,
    %93 = vector.extract_strided_slice %79 {offsets = [16, 0], sizes = [16, 8], strides = [1, 1]} : vector<128x8xf32> to vector<16x8xf32>
    %94 = vector.extract_strided_slice %80 {offsets = [16, 0], sizes = [16, 16], strides = [1, 1]} : vector<128x16xf32> to vector<16x16xf32>
    %cst_59 = arith.constant dense<0.000000e+00> : vector<16x16xf32>
    %95 = tpu.matmul %93, %93, %cst_59 {dimension_numbers = #tpu.dot_dimension_numbers<[1], [1], [0], [0], [0, 0, 1, 0], [], []>} : vector<16x8xf32>, vector<16x8xf32>, vector<16x16xf32> -> vector<16x16xf32>
    %cst_60 = arith.constant 1.000000e+00 : f32
    %96 = vector.broadcast %cst_60 : f32 to vector<16x16xf32>
    %97 = arith.subf %96, %95 : vector<16x16xf32>
    %98 = arith.mulf %94, %97 : vector<16x16xf32>
    %99 = vector.shape_cast %98 : vector<16x16xf32> to vector<1x16x16xf32>
    %cst_61 = arith.constant dense<0.000000e+00> : vector<1xf32>
    %100 = vector.multi_reduction <add>, %99, %cst_61 [1, 2] : vector<1x16x16xf32> to vector<1xf32>
    %101 = vector.shape_cast %100 : vector<1xf32> to vector<1x1x1xf32>
    %102 = vector.extract %101[0, 0, 0] : f32 from vector<1x1x1xf32>
    %103 = vector.broadcast %102 : f32 to vector<1x1xf32>
    %c1_62 = arith.constant 1 : index
    %c0_63 = arith.constant 0 : index
    %104 = vector.load %arg10[%c1_62, %c0_63] : memref<8x1xf32, #tpu.memory_space<vmem>>, vector<1x1xf32>
    tpu.vector_store %arg10[%c1_62, %c0_63], %103 {strides = array<i32>} : memref<8x1xf32, #tpu.memory_space<vmem>>, vector<1x1xf32>,
    %105 = vector.extract_strided_slice %79 {offsets = [32, 0], sizes = [16, 8], strides = [1, 1]} : vector<128x8xf32> to vector<16x8xf32>
    %106 = vector.extract_strided_slice %80 {offsets = [32, 0], sizes = [16, 16], strides = [1, 1]} : vector<128x16xf32> to vector<16x16xf32>
    %cst_64 = arith.constant dense<0.000000e+00> : vector<16x16xf32>
    %107 = tpu.matmul %105, %105, %cst_64 {dimension_numbers = #tpu.dot_dimension_numbers<[1], [1], [0], [0], [0, 0, 1, 0], [], []>} : vector<16x8xf32>, vector<16x8xf32>, vector<16x16xf32> -> vector<16x16xf32>
    %cst_65 = arith.constant 1.000000e+00 : f32
    %108 = vector.broadcast %cst_65 : f32 to vector<16x16xf32>
    %109 = arith.subf %108, %107 : vector<16x16xf32>
    %110 = arith.mulf %106, %109 : vector<16x16xf32>
    %111 = vector.shape_cast %110 : vector<16x16xf32> to vector<1x16x16xf32>
    %cst_66 = arith.constant dense<0.000000e+00> : vector<1xf32>
    %112 = vector.multi_reduction <add>, %111, %cst_66 [1, 2] : vector<1x16x16xf32> to vector<1xf32>
    %113 = vector.shape_cast %112 : vector<1xf32> to vector<1x1x1xf32>
    %114 = vector.extract %113[0, 0, 0] : f32 from vector<1x1x1xf32>
    %115 = vector.broadcast %114 : f32 to vector<1x1xf32>
    %c2_67 = arith.constant 2 : index
    %c0_68 = arith.constant 0 : index
    %116 = vector.load %arg10[%c2_67, %c0_68] : memref<8x1xf32, #tpu.memory_space<vmem>>, vector<1x1xf32>
    tpu.vector_store %arg10[%c2_67, %c0_68], %115 {strides = array<i32>} : memref<8x1xf32, #tpu.memory_space<vmem>>, vector<1x1xf32>,
    %117 = vector.extract_strided_slice %79 {offsets = [48, 0], sizes = [16, 8], strides = [1, 1]} : vector<128x8xf32> to vector<16x8xf32>
    %118 = vector.extract_strided_slice %80 {offsets = [48, 0], sizes = [16, 16], strides = [1, 1]} : vector<128x16xf32> to vector<16x16xf32>
    %cst_69 = arith.constant dense<0.000000e+00> : vector<16x16xf32>
    %119 = tpu.matmul %117, %117, %cst_69 {dimension_numbers = #tpu.dot_dimension_numbers<[1], [1], [0], [0], [0, 0, 1, 0], [], []>} : vector<16x8xf32>, vector<16x8xf32>, vector<16x16xf32> -> vector<16x16xf32>
    %cst_70 = arith.constant 1.000000e+00 : f32
    %120 = vector.broadcast %cst_70 : f32 to vector<16x16xf32>
    %121 = arith.subf %120, %119 : vector<16x16xf32>
    %122 = arith.mulf %118, %121 : vector<16x16xf32>
    %123 = vector.shape_cast %122 : vector<16x16xf32> to vector<1x16x16xf32>
    %cst_71 = arith.constant dense<0.000000e+00> : vector<1xf32>
    %124 = vector.multi_reduction <add>, %123, %cst_71 [1, 2] : vector<1x16x16xf32> to vector<1xf32>
    %125 = vector.shape_cast %124 : vector<1xf32> to vector<1x1x1xf32>
    %126 = vector.extract %125[0, 0, 0] : f32 from vector<1x1x1xf32>
    %127 = vector.broadcast %126 : f32 to vector<1x1xf32>
    %c3_72 = arith.constant 3 : index
    %c0_73 = arith.constant 0 : index
    %128 = vector.load %arg10[%c3_72, %c0_73] : memref<8x1xf32, #tpu.memory_space<vmem>>, vector<1x1xf32>
    tpu.vector_store %arg10[%c3_72, %c0_73], %127 {strides = array<i32>} : memref<8x1xf32, #tpu.memory_space<vmem>>, vector<1x1xf32>,
    %129 = vector.extract_strided_slice %79 {offsets = [64, 0], sizes = [16, 8], strides = [1, 1]} : vector<128x8xf32> to vector<16x8xf32>
    %130 = vector.extract_strided_slice %80 {offsets = [64, 0], sizes = [16, 16], strides = [1, 1]} : vector<128x16xf32> to vector<16x16xf32>
    %cst_74 = arith.constant dense<0.000000e+00> : vector<16x16xf32>
    %131 = tpu.matmul %129, %129, %cst_74 {dimension_numbers = #tpu.dot_dimension_numbers<[1], [1], [0], [0], [0, 0, 1, 0], [], []>} : vector<16x8xf32>, vector<16x8xf32>, vector<16x16xf32> -> vector<16x16xf32>
    %cst_75 = arith.constant 1.000000e+00 : f32
    %132 = vector.broadcast %cst_75 : f32 to vector<16x16xf32>
    %133 = arith.subf %132, %131 : vector<16x16xf32>
    %134 = arith.mulf %130, %133 : vector<16x16xf32>
    %135 = vector.shape_cast %134 : vector<16x16xf32> to vector<1x16x16xf32>
    %cst_76 = arith.constant dense<0.000000e+00> : vector<1xf32>
    %136 = vector.multi_reduction <add>, %135, %cst_76 [1, 2] : vector<1x16x16xf32> to vector<1xf32>
    %137 = vector.shape_cast %136 : vector<1xf32> to vector<1x1x1xf32>
    %138 = vector.extract %137[0, 0, 0] : f32 from vector<1x1x1xf32>
    %139 = vector.broadcast %138 : f32 to vector<1x1xf32>
    %c4_77 = arith.constant 4 : index
    %c0_78 = arith.constant 0 : index
    %140 = vector.load %arg10[%c4_77, %c0_78] : memref<8x1xf32, #tpu.memory_space<vmem>>, vector<1x1xf32>
    tpu.vector_store %arg10[%c4_77, %c0_78], %139 {strides = array<i32>} : memref<8x1xf32, #tpu.memory_space<vmem>>, vector<1x1xf32>,
    %141 = vector.extract_strided_slice %79 {offsets = [80, 0], sizes = [16, 8], strides = [1, 1]} : vector<128x8xf32> to vector<16x8xf32>
    %142 = vector.extract_strided_slice %80 {offsets = [80, 0], sizes = [16, 16], strides = [1, 1]} : vector<128x16xf32> to vector<16x16xf32>
    %cst_79 = arith.constant dense<0.000000e+00> : vector<16x16xf32>
    %143 = tpu.matmul %141, %141, %cst_79 {dimension_numbers = #tpu.dot_dimension_numbers<[1], [1], [0], [0], [0, 0, 1, 0], [], []>} : vector<16x8xf32>, vector<16x8xf32>, vector<16x16xf32> -> vector<16x16xf32>
    %cst_80 = arith.constant 1.000000e+00 : f32
    %144 = vector.broadcast %cst_80 : f32 to vector<16x16xf32>
    %145 = arith.subf %144, %143 : vector<16x16xf32>
    %146 = arith.mulf %142, %145 : vector<16x16xf32>
    %147 = vector.shape_cast %146 : vector<16x16xf32> to vector<1x16x16xf32>
    %cst_81 = arith.constant dense<0.000000e+00> : vector<1xf32>
    %148 = vector.multi_reduction <add>, %147, %cst_81 [1, 2] : vector<1x16x16xf32> to vector<1xf32>
    %149 = vector.shape_cast %148 : vector<1xf32> to vector<1x1x1xf32>
    %150 = vector.extract %149[0, 0, 0] : f32 from vector<1x1x1xf32>
    %151 = vector.broadcast %150 : f32 to vector<1x1xf32>
    %c5_82 = arith.constant 5 : index
    %c0_83 = arith.constant 0 : index
    %152 = vector.load %arg10[%c5_82, %c0_83] : memref<8x1xf32, #tpu.memory_space<vmem>>, vector<1x1xf32>
    tpu.vector_store %arg10[%c5_82, %c0_83], %151 {strides = array<i32>} : memref<8x1xf32, #tpu.memory_space<vmem>>, vector<1x1xf32>,
    %153 = vector.extract_strided_slice %79 {offsets = [96, 0], sizes = [16, 8], strides = [1, 1]} : vector<128x8xf32> to vector<16x8xf32>
    %154 = vector.extract_strided_slice %80 {offsets = [96, 0], sizes = [16, 16], strides = [1, 1]} : vector<128x16xf32> to vector<16x16xf32>
    %cst_84 = arith.constant dense<0.000000e+00> : vector<16x16xf32>
    %155 = tpu.matmul %153, %153, %cst_84 {dimension_numbers = #tpu.dot_dimension_numbers<[1], [1], [0], [0], [0, 0, 1, 0], [], []>} : vector<16x8xf32>, vector<16x8xf32>, vector<16x16xf32> -> vector<16x16xf32>
    %cst_85 = arith.constant 1.000000e+00 : f32
    %156 = vector.broadcast %cst_85 : f32 to vector<16x16xf32>
    %157 = arith.subf %156, %155 : vector<16x16xf32>
    %158 = arith.mulf %154, %157 : vector<16x16xf32>
    %159 = vector.shape_cast %158 : vector<16x16xf32> to vector<1x16x16xf32>
    %cst_86 = arith.constant dense<0.000000e+00> : vector<1xf32>
    %160 = vector.multi_reduction <add>, %159, %cst_86 [1, 2] : vector<1x16x16xf32> to vector<1xf32>
    %161 = vector.shape_cast %160 : vector<1xf32> to vector<1x1x1xf32>
    %162 = vector.extract %161[0, 0, 0] : f32 from vector<1x1x1xf32>
    %163 = vector.broadcast %162 : f32 to vector<1x1xf32>
    %c6 = arith.constant 6 : index
    %c0_87 = arith.constant 0 : index
    %164 = vector.load %arg10[%c6, %c0_87] : memref<8x1xf32, #tpu.memory_space<vmem>>, vector<1x1xf32>
    tpu.vector_store %arg10[%c6, %c0_87], %163 {strides = array<i32>} : memref<8x1xf32, #tpu.memory_space<vmem>>, vector<1x1xf32>,
    %165 = vector.extract_strided_slice %79 {offsets = [112, 0], sizes = [16, 8], strides = [1, 1]} : vector<128x8xf32> to vector<16x8xf32>
    %166 = vector.extract_strided_slice %80 {offsets = [112, 0], sizes = [16, 16], strides = [1, 1]} : vector<128x16xf32> to vector<16x16xf32>
    %cst_88 = arith.constant dense<0.000000e+00> : vector<16x16xf32>
    %167 = tpu.matmul %165, %165, %cst_88 {dimension_numbers = #tpu.dot_dimension_numbers<[1], [1], [0], [0], [0, 0, 1, 0], [], []>} : vector<16x8xf32>, vector<16x8xf32>, vector<16x16xf32> -> vector<16x16xf32>
    %cst_89 = arith.constant 1.000000e+00 : f32
    %168 = vector.broadcast %cst_89 : f32 to vector<16x16xf32>
    %169 = arith.subf %168, %167 : vector<16x16xf32>
    %170 = arith.mulf %166, %169 : vector<16x16xf32>
    %171 = vector.shape_cast %170 : vector<16x16xf32> to vector<1x16x16xf32>
    %cst_90 = arith.constant dense<0.000000e+00> : vector<1xf32>
    %172 = vector.multi_reduction <add>, %171, %cst_90 [1, 2] : vector<1x16x16xf32> to vector<1xf32>
    %173 = vector.shape_cast %172 : vector<1xf32> to vector<1x1x1xf32>
    %174 = vector.extract %173[0, 0, 0] : f32 from vector<1x1x1xf32>
    %175 = vector.broadcast %174 : f32 to vector<1x1xf32>
    %c7 = arith.constant 7 : index
    %c0_91 = arith.constant 0 : index
    %176 = vector.load %arg10[%c7, %c0_91] : memref<8x1xf32, #tpu.memory_space<vmem>>, vector<1x1xf32>
    tpu.vector_store %arg10[%c7, %c0_91], %175 {strides = array<i32>} : memref<8x1xf32, #tpu.memory_space<vmem>>, vector<1x1xf32>,
    return
  }
  func.func @transform_0(%arg0: i32) -> (i32, i32) {
    %c0_i32 = arith.constant 0 : i32
    %c0_i32_0 = arith.constant 0 : i32
    return %arg0, %c0_i32 : i32, i32
  }
  func.func @transform_1(%arg0: i32) -> (i32, i32) {
    %c0_i32 = arith.constant 0 : i32
    %c0_i32_0 = arith.constant 0 : i32
    return %arg0, %c0_i32 : i32, i32
  }
  func.func @transform_2(%arg0: i32) -> (i32, i32) {
    %c0_i32 = arith.constant 0 : i32
    %c0_i32_0 = arith.constant 0 : i32
    return %arg0, %c0_i32 : i32, i32
  }
  func.func @transform_3(%arg0: i32) -> (i32, i32) {
    %c0_i32 = arith.constant 0 : i32
    %c0_i32_0 = arith.constant 0 : i32
    return %arg0, %c0_i32 : i32, i32
  }
  func.func @transform_4(%arg0: i32) -> (i32, i32, i32) {
    %c0_i32 = arith.constant 0 : i32
    %c0_i32_0 = arith.constant 0 : i32
    %c0_i32_1 = arith.constant 0 : i32
    %c0_i32_2 = arith.constant 0 : i32
    return %c0_i32, %c0_i32_0, %c0_i32_1 : i32, i32, i32
  }
  func.func @transform_5(%arg0: i32) -> (i32, i32, i32) {
    %c0_i32 = arith.constant 0 : i32
    %c0_i32_0 = arith.constant 0 : i32
    %c0_i32_1 = arith.constant 0 : i32
    %c0_i32_2 = arith.constant 0 : i32
    return %c0_i32, %c0_i32_0, %c0_i32_1 : i32, i32, i32
  }
  func.func @transform_6(%arg0: i32) -> (i32, i32) {
    %c0_i32 = arith.constant 0 : i32
    %c0_i32_0 = arith.constant 0 : i32
    %c0_i32_1 = arith.constant 0 : i32
    return %c0_i32, %c0_i32_0 : i32, i32
  }
  func.func @transform_7(%arg0: i32) -> (i32, i32) {
    %c0_i32 = arith.constant 0 : i32
    %c0_i32_0 = arith.constant 0 : i32
    %c0_i32_1 = arith.constant 0 : i32
    return %c0_i32, %c0_i32_0 : i32, i32
  }
  func.func @transform_8(%arg0: i32) -> (i32, i32) {
    %c0_i32 = arith.constant 0 : i32
    %c0_i32_0 = arith.constant 0 : i32
    %c0_i32_1 = arith.constant 0 : i32
    return %c0_i32, %c0_i32_0 : i32, i32
  }
  func.func @transform_9(%arg0: i32) -> (i32, i32) {
    %c0_i32 = arith.constant 0 : i32
    %c0_i32_0 = arith.constant 0 : i32
    return %arg0, %c0_i32 : i32, i32
  }
  func.func @transform_10(%arg0: i32) -> (i32, i32) {
    %c0_i32 = arith.constant 0 : i32
    %c0_i32_0 = arith.constant 0 : i32
    return %arg0, %c0_i32 : i32, i32
  }
  func.func @transform_11(%arg0: i32) -> (i32, i32) {
    %c0_i32 = arith.constant 0 : i32
    %c0_i32_0 = arith.constant 0 : i32
    return %arg0, %c0_i32 : i32, i32
  }
}

</mosaic_0001>

<bundles_post_ra>
// kernel: custom-call.47
= control target key start
LH: loop header
LB: loop body
LE: loop exit
PB: predicated region body
PF: predicated region fallthrough
CT: control target
= control target key end

     0   :  { %s885_s9 = smov 0   ;;  %s887_s10 = smov 0   ;;  %s1142_s0 = inlined_call_operand.vmem [shape: f32[16,32,16], index: 0, kind: input, shape index: {}]   ;;  %s1143_s1 = inlined_call_operand.vmem [shape: f32[16,32,16], index: 1, kind: output, shape index: {0}]   ;;  %s1144_s2 = inlined_call_operand.vmem [shape: f32[16,16], index: 2, kind: output, shape index: {1}]  }
   0x1   :  { %s889_s11 = smov 0   ;;  %s891_s12 = smov 0  }
   0x2   :  { %s893_s13 = smov 0  }
   0x3 LB: > { %s28_s14 = sadd.s32 1, %s858_s12  ;;  %s709_s15 = sadd.s32 4294967295, %s862_s13   ;;  %s862_s13 = sphi %s893_s13, %s9_s13   ;;  %s858_s12 = sphi %s891_s12, %s1159_s12   ;;  %s854_s11 = sphi %s889_s11, %s1158_s11   ;;  %s850_s10 = sphi %s887_s10, %s1157_s10   ;;  %s846_s9 = sphi %s885_s9, %s1156_s9  }
   0x4   : > { %p30_p0 = scmp.ge.s32.totalorder %s28_s14, 16  ;;  %s33_s16 = ssub.s32 0, %s858_s12 }
   0x5   : > { %s711_s17 = smin.u32 %s858_s12, %s33_s16  ;;  %p57_p1 = scmp.ne.s32.totalorder %s850_s10, %s846_s9 }
   0x6   : > { %s1161_s14 = smov (%p30_p0, %s28_s14), 0  ;;  %s35_s18 = sshrl.u32 %s711_s17, 3 }
   0x7   : > { %s39_s19 = ssub.s32 0, %s1161_s14  ;;  %p58_p2 = scmp.eq.s32.totalorder %s709_s15, 15 }
   0x8   : > { %s712_s20 = smin.u32 %s39_s19, %s1161_s14  ;;  %s47_s24 = sadd.s32 1, %s850_s10 }
   0x9   : > { %s41_s21 = sshrl.u32 %s712_s20, 3  ;;  %p922_p3 = por %p58_p2, %p57_p1 }
   0xa   : > { %s44_s23 = ssub.s32 %s35_s18, %s41_s21  ;;  %p714_p5 = scmp.ge.s32.totalorder %s862_s13, 16 }
   0xb   : > { %p45_p4 = scmp.eq.s32.totalorder %s44_s23, 0  ;;  %s82_s26 = sand.u32 (!%p714_p5), 1, %s862_s13  }
   0xc   : > { %80 = sbr.rel (%p714_p5) target bundleno = 19 (0x13), region = 16  ;;  %s758_s27 = sshll.u32 (!%p714_p5), %s858_s12, 5 }
   0xd   : > { %s928_s25 = scalar_select %p45_p4, %s850_s10, %s47_s24  }
   0xe   : > { %s715_s28 = sshll.u32 (!%p714_p5), %s82_s26, 5  ;;  %s90_s3 = scalar_lea.vmem (!%p714_p5), %s1142_s0, %s758_s27 }
   0xf   : > { %v124_v0 = vld [vmem:[%s90_s3] sm:$0xff] (!%p714_p5)  ;;  %v126_v1 = vld [vmem:[%s90_s3 + $0x8] sm:$0xff] (!%p714_p5)  ;;  %v128_v2 = vld [vmem:[%s90_s3 + $0x10] sm:$0xff] (!%p714_p5)  ;;  %s84_s4 = scalar_lea.vmem (!%p714_p5), [#allocation0], %s715_s28 }
  0x10   : > { %125 = vst [vmem:[%s84_s4] sm:$0xff] (!%p714_p5), %v124_v0  ;;  %127 = vst [vmem:[%s84_s4 + $0x8] sm:$0xff] (!%p714_p5), %v126_v1  ;;  %v130_v3 = vld [vmem:[%s90_s3 + $0x18] sm:$0xff] (!%p714_p5) }
  0x11   : > { %129 = vst [vmem:[%s84_s4 + $0x10] sm:$0xff] (!%p714_p5), %v128_v2  ;;  %131 = vst [vmem:[%s84_s4 + $0x18] sm:$0xff] (!%p714_p5), %v130_v3 }
  0x13 PF: > { %p718_p6 = scmp.ge.s32.totalorder %s862_s13, 1  ;;  %p136_p7 = scmp.lt.s32.totalorder %s862_s13, 17 }
  0x15   : > { %p137_p8 = pnand %p718_p6, %p136_p7 }
  0x17   : > { %140 = sbr.rel (%p137_p8) target bundleno = 349 (0x15d), region = 54 }
  0x1e   : > { %s143_s5 = sand.u32 1, %s709_s15   ;;  %s157_s6 = sand.u32 1, %s846_s9   ;;  %v868_v8 = vmov 0.0  }
  0x1f   : > { %s719_s7 = sshll.u32 %s143_s5, 5  ;;  %s941_s8 = sshll.u32 %s157_s6, 3 }
  0x20   : > { %s168_s16 = sand.u32 7, %s854_s11   ;;  %s145_s17 = scalar_lea.vmem [#allocation0], %s719_s7 }
  0x21   : > { %v170_v4 = vld [vmem:[%s145_s17] sm:$0xff]  ;;  %v722_v5 = vld [vmem:[%s145_s17 + $0x8] sm:$0xff]  ;;  %v724_v6 = vld [vmem:[%s145_s17 + $0x10] sm:$0xff]  ;;  %s159_s18 = scalar_lea.vmem [#allocation2], %s941_s8  ;;  %s949_s20 = scalar_lea.vmem [#allocation1], %s719_s7 }
  0x22   : > { %s947_s19 = scalar_lea.vmem %s159_s18, %s168_s16 [#allocation2]  ;;  %171 = vst [vmem:[%s949_s20] sm:$0xff] %v170_v4  ;;  %723 = vst [vmem:[%s949_s20 + $0x8] sm:$0xff] %v722_v5  ;;  %v726_v7 = vld [vmem:[%s145_s17 + $0x18] sm:$0xff]  ;;  %s956_s9 = smov 0  }
  0x23   : > { %725 = vst [vmem:[%s949_s20 + $0x10] sm:$0xff] %v724_v6  ;;  %727 = vst [vmem:[%s949_s20 + $0x18] sm:$0xff] %v726_v7 }
  0x24   : > { %184 = vst [vmem:[%s947_s19] sm:$0x1] %v868_v8 }
  0x25 LB: >> { %v192_v9 = vlaneseq  ;;  %v966_v12 = vstv %s866_s9  ;;  %s249_s15 = scalar_lea.vmem %s949_s20, %s866_s9 [#allocation1]  ;;  %s361_s21 = scalar_lea.vmem [#allocation3], %s866_s9  ;;  %s866_s9 = sphi %s956_s9, %s190_s9  }
  0x26   : >> { %s378_s23 = smov [#allocation3] }
  0x27   : >> { %v963_v11 = vshrl.u32 %v192_v9, 7 }
  0x29   : >> { %v191_v10 = vld [vmem:[%s949_s20] sm:$0xff]  ;;  %vm196_vm0 = vcmp.gt.s32.totalorder %v963_v11, %v966_v12  ;;  %v728_v13 = vld [vmem:[%s949_s20 + $0x8] sm:$0xff]  ;;  %v203_v14 = vadd.s32 8, %v963_v11  ;;  %v213_v16 = vadd.s32 16, %v963_v11  ;;  %v223_v18 = vadd.s32 24, %v963_v11 }
  0x2a   : >> { %v729_v15 = vld [vmem:[%s949_s20 + $0x10] sm:$0xff]  ;;  %v730_v17 = vld [vmem:[%s949_s20 + $0x18] sm:$0xff]  ;;  %v197_v19 = vsel %vm196_vm0, %v191_v10, 0.0  ;;  %v984_v36 = vld [vmem:[%s249_s15] ss:$0 sm:$0xff]  ;;  %v288_v11 = vmov %v963_v11  ;;  %s285_s20 = smov %s949_s20  ;;  %v1009_v10 = vand.u32 127, %v192_v9 }
  0x2b   : >> { %v198_v20 = vmul.f32 %v197_v19, %v197_v19  ;;  %vm205_vm1 = vcmp.gt.s32.totalorder %v203_v14, %v966_v12  ;;  %vm215_vm2 = vcmp.gt.s32.totalorder %v213_v16, %v966_v12  ;;  %vm225_vm3 = vcmp.gt.s32.totalorder %v223_v18, %v966_v12  ;;  %v733_v5 = vld [vmem:[%s285_s20 + $0x10] sm:$0xff]  ;;  %v289_v6 = vld [vmem:[%s285_s20] sm:$0xff]  ;;  %v734_v7 = vld [vmem:[%s285_s20 + $0x18] sm:$0xff] }
  0x2c   : >> { %v206_v21 = vsel %vm205_vm1, %v728_v13, 0.0  ;;  %v216_v22 = vsel %vm215_vm2, %v729_v15, 0.0  ;;  %v228_v23 = vsel %vm225_vm3, %v730_v17, 0.0  ;;  %v251_v37 = vand.u32 2147483647, %v984_v36  ;;  %v732_v8 = vld [vmem:[%s285_s20 + $0x8] sm:$0xff]  ;;  %s1041_s20 = smov %s949_s20 }
  0x2d   : >> { %v207_v24 = vmul.f32 %v206_v21, %v206_v21  ;;  %v217_v25 = vmul.f32 %v216_v22, %v216_v22  ;;  %v229_v27 = vmul.f32 %v228_v23, %v228_v23  ;;  %vm276_vm9 = vcmp.lt.f32.partialorder %v984_v36, 0.0 }
  0x2e   : >> { %v252_v42 = vmax.f32 %v251_v37, 0.0  ;;  %v343_v2 = vadd.s32 24, %v288_v11  ;;  %v325_v3 = vadd.s32 16, %v288_v11  ;;  %v307_v4 = vadd.s32 8, %v288_v11 }
  0x2f   : >> { %v208_v26 = vadd.f32 %v207_v24, %v198_v20  ;;  %vm292_vm12 = vcmp.gt.s32.totalorder %v288_v11, %v966_v12  ;;  %vm1014_vm0 = vcmp.eq.s32.totalorder %v1009_v10, %v966_v12  ;;  %v381_v11 = vmov %v963_v11 }
  0x30   : >> { %vm345_vm10 = vcmp.gt.s32.totalorder %v343_v2, %v966_v12  ;;  %vm346_vm11 = vcmp.lt.s32.totalorder %v343_v2, 32  ;;  %vm327_vm13 = vcmp.gt.s32.totalorder %v325_v3, %v966_v12  ;;  %vm309_vm15 = vcmp.gt.s32.totalorder %v307_v4, %v966_v12 }
  0x31   : >> { %v218_v28 = vadd.f32 %v217_v25, %v208_v26  ;;  %vm347_vm14 = vmand %vm345_vm10, %vm346_vm11  ;;  %v293_v13 = vsel %vm292_vm12, %v289_v6, 0.0  ;;  %v328_v14 = vsel %vm327_vm13, %v733_v5, 0.0  ;;  %v310_v16 = vsel %vm309_vm15, %v732_v8, 0.0 }
  0x32   : >> { %v348_v15 = vsel %vm347_vm14, %v734_v7, 0.0 }
  0x33   : >> { %v230_v29 = vadd.f32 %v229_v27, %v218_v28 }
  0x35   : >> { %v231_v30 = vrot.slane %v230_v29, 4 }
  0x37   : >> { %v232_v31 = vadd.f32 %v231_v30, %v230_v29 }
  0x39   : >> { %v233_v32 = vrot.slane %v232_v31, 2 }
  0x3b   : >> { %v234_v33 = vadd.f32 %v233_v32, %v232_v31 }
  0x3d   : >> { %v235_v34 = vrot.slane %v234_v33, 1 }
  0x3f   : >> { %v979_v35 = vadd.f32 %v235_v34, %v234_v33 }
  0x41   : >> { %810 = vrsqrt.f32 %v979_v35  ;;  %vm239_vm4 = vcmp.eq.f32.partialorder %v979_v35, inf  ;;  %v242_v39 = vand.u32 2147483648, %v979_v35  ;;  %vm241_vm5 = vcmp.eq.f32.partialorder %v979_v35, 0.0 }
  0x4b   : >> { %v811_v38 = vpop.eup %810 }
  0x4c   : >> { %v238_v40 = vmul.f32 %v811_v38, %v979_v35 }
  0x4e   : >> { %v240_v41 = vsel %vm239_vm4, %v979_v35, %v238_v40  ;;  %v869_v35 = vmov 1.0   ;;  %v374_v40 = vld [vmem:[%s947_s19] ss:$0 sm:$0xff] }
  0x4f   : >> { %v243_v43 = vsel %vm241_vm5, %v242_v39, %v240_v41 }
  0x50   : >> { %v253_v44 = vand.u32 2147483647, %v243_v43  ;;  %v384_v43 = vld [vmem:[%s1041_s20] sm:$0xff] }
  0x52   : >> { %v254_v45 = vmax.f32 %v252_v42, %v253_v44 }
  0x54   : >> { %812 = vrcp.f32 %v254_v45  ;;  %vm266_vm8 = vcmp.eq.f32.partialorder %v254_v45, 0.0 }
  0x5e   : >> { %v813_v46 = vpop.eup %812 }
  0x5f   : >> { %v256_v47 = vmul.f32 %v813_v46, %v251_v37  ;;  %v259_v48 = vmul.f32 0.0, %v813_v46  ;;  %v263_v49 = vmul.f32 %v813_v46, %v253_v44  ;;  %v736_v44 = vld [vmem:[%s1041_s20 + $0x8] sm:$0xff]  ;;  %v400_v46 = vadd.s32 24, %v381_v11 }
  0x60   : >> { %v419_v11 = vmov %v963_v11 }
  0x61   : >> { %v257_v50 = vmul.f32 %v256_v47, %v256_v47  ;;  %v260_v51 = vmul.f32 %v259_v48, %v259_v48  ;;  %v264_v52 = vmul.f32 %v263_v49, %v263_v49  ;;  %v740_v47 = vld [vmem:[%s1041_s20 + $0x18] sm:$0xff]  ;;  %vm406_vm1 = vcmp.lt.s32.totalorder %v400_v46, 32 }
  0x62   : >> { %v461_v3 = vadd.s32 16, %v419_v11  ;;  %vm436_vm2 = vcmp.ge.s32.totalorder %v419_v11, %v966_v12  ;;  %v482_v4 = vadd.s32 24, %v419_v11 }
  0x63   : >> { %v261_v53 = vadd.f32 %v260_v51, %v257_v50  ;;  %vm1062_vm4 = vmand %vm1014_vm0, %vm436_vm2 }
  0x65   : >> { %v265_v54 = vadd.f32 %v264_v52, %v261_v53 }
  0x67   : >> { %814 = vrsqrt.f32 %v265_v54  ;;  %vm269_vm6 = vcmp.eq.f32.partialorder %v265_v54, inf  ;;  %v272_v56 = vand.u32 2147483648, %v265_v54  ;;  %vm271_vm7 = vcmp.eq.f32.partialorder %v265_v54, 0.0 }
  0x71   : >> { %v815_v55 = vpop.eup %814 }
  0x72   : >> { %v268_v57 = vmul.f32 %v815_v55, %v265_v54 }
  0x74   : >> { %v270_v58 = vsel %vm269_vm6, %v265_v54, %v268_v57  ;;  %vm499_vm6 = vcmp.ge.s32.totalorder %v482_v4, %v966_v12 }
  0x75   : >> { %v273_v59 = vsel %vm271_vm7, %v272_v56, %v270_v58  ;;  %vm1085_vm10 = vmand %vm1014_vm0, %vm499_vm6 }
  0x76   : >> { %v274_v60 = vmul.f32 %v273_v59, %v254_v45  ;;  %v738_v45 = vld [vmem:[%s1041_s20 + $0x10] sm:$0xff]  ;;  %s1053_s20 = smov %s1041_s20 }
  0x77   : >> { %v426_v6 = vld [vmem:[%s1053_s20] sm:$0xff]  ;;  %v742_v7 = vld [vmem:[%s1053_s20 + $0x8] sm:$0xff]  ;;  %v745_v8 = vld [vmem:[%s1053_s20 + $0x10] sm:$0xff]  ;;  %s503_s24 = scalar_lea.vmem %s1053_s20, %s866_s9  ;;  %s190_s9 = sadd.s32 1, %s866_s9  }
  0x78   : >> { %v275_v61 = vsel %vm266_vm8, 0.0, %v274_v60  ;;  %vm428_vm8 = vcmp.gt.s32.totalorder %v1009_v10, %v966_v12  ;;  %p187_p9 = scmp.ge.s32.totalorder %s190_s9, 16  }
  0x79   : >> { %v277_v62 = vxor.u32 2147483648, %v275_v61  ;;  %s759_s26 = sshll.u32 (%p187_p9), %s854_s11, 5 }
  0x7a   : > { %s524_s29 = scalar_lea.vmem (%p187_p9), %s1143_s1, %s759_s26 }
  0x7b   : >> { %v278_v63 = vsel %vm276_vm9, %v275_v61, %v277_v62 }
  0x7c   : >> { %v998_v0 = vsel %vm241_vm5, %v984_v36, %v278_v63  ;;  %816 = vrcp.f32 %v278_v63  ;;  %v279_v17 = vsub.f32 %v278_v63, %v984_v36 }
  0x7d   : >> { %v284_v1 = vsub.f32 %v984_v36, %v998_v0 }
  0x7f   : >> { %818 = vrcp.f32 %v284_v1  ;;  %v440_v1 = vadd.s32 8, %v419_v11 }
  0x81   : >> { %vm457_vm3 = vcmp.ge.s32.totalorder %v440_v1, %v966_v12 }
  0x82   : >> { %vm1071_vm7 = vmand %vm1014_vm0, %vm457_vm3 }
  0x86   : >> { %v817_v18 = vpop.eup %816 }
  0x87   : >> { %v281_v9 = vmul.f32 %v817_v18, %v279_v17 }
  0x89   : >> { %v819_v19 = vpop.eup %818  ;;  %v283_v33 = vsel %vm241_vm5, 0.0, %v281_v9 }
  0x8a   : >> { %v330_v21 = vmul.f32 %v819_v19, %v328_v14  ;;  %v295_v22 = vmul.f32 %v819_v19, %v293_v13  ;;  %v350_v23 = vmul.f32 %v819_v19, %v348_v15  ;;  %v312_v24 = vmul.f32 %v819_v19, %v310_v16  ;;  %v748_v15 = vld [vmem:[%s1053_s20 + $0x18] sm:$0xff] }
  0x8b   : >> { %v367_v34 = vsel %vm1014_vm0, %v283_v33, 0.0 }
  0x8c   : >> { %v331_v25 = vsel %vm241_vm5, 0.0, %v330_v21  ;;  %v296_v26 = vsel %vm241_vm5, 0.0, %v295_v22  ;;  %v351_v27 = vsel %vm241_vm5, 0.0, %v350_v23  ;;  %v313_v28 = vsel %vm241_vm5, 0.0, %v312_v24 }
  0x8d   : >> { %v336_v29 = vsel %vm1014_vm0, %v331_v25, 0.0  ;;  %v301_v30 = vsel %vm1014_vm0, %v296_v26, 0.0  ;;  %v356_v31 = vsel %vm1014_vm0, %v351_v27, 0.0  ;;  %v318_v32 = vsel %vm1014_vm0, %v313_v28, 0.0 }
  0x8e   : >> { %337 = vadd.xlane.f32.xlu1 %v336_v29  ;;  %302 = vadd.xlane.f32.xlu0 %v301_v30  ;;  %vm478_vm5 = vcmp.ge.s32.totalorder %v461_v3, %v966_v12 }
  0x8f   : >> { %vm1079_vm9 = vmand %vm1014_vm0, %vm478_vm5 }
  0x92   : >> { %357 = vadd.xlane.f32.xlu1 %v356_v31  ;;  %319 = vadd.xlane.f32.xlu0 %v318_v32 }
  0x96   : >> { %368 = vadd.xlane.f32.xlu0 %v367_v34 }
 0x11b   : >> { %v338_v36 = vpop.xlane.xlu1 %337  ;;  %v303_v37 = vpop.xlane.xlu0 %302 }
 0x11c   : >> { %340 = vst [vmem:[#allocation3 + $0x10] sm:$0xff] %v338_v36  ;;  %304 = vst [vmem:[#allocation3] sm:$0xff] %v303_v37 }
 0x11f   : >> { %v358_v38 = vpop.xlane.xlu1 %357  ;;  %v320_v39 = vpop.xlane.xlu0 %319 }
 0x120   : >> { %360 = vst [vmem:[#allocation3 + $0x18] sm:$0xff] %v358_v38  ;;  %322 = vst [vmem:[#allocation3 + $0x8] sm:$0xff] %v320_v39 }
 0x121   : >> { %362 = vst [vmem:[%s361_s21] sm:$0x1] %v869_v35 }
 0x123   : >> { %v369_v41 = vpop.xlane.xlu0 %368 }
 0x124   : >> { %v375_v42 = vsel %vm1014_vm0, %v369_v41, %v374_v40 }
 0x125   : >> { %376 = vst [vmem:[%s947_s19] sm:$0x1] %v375_v42 }
 0x128   : >> { %v383_v48 = vld [vmem:[%s378_s23] sm:$0xff]  ;;  %v735_v49 = vld [vmem:[%s378_s23 + $0x8] sm:$0xff]  ;;  %v737_v50 = vld [vmem:[%s378_s23 + $0x10] sm:$0xff] }
 0x129   : >> { %v385_v51 = vmul.f32 %v384_v43, %v383_v48  ;;  %v391_v52 = vmul.f32 %v736_v44, %v735_v49  ;;  %v739_v53 = vld [vmem:[%s378_s23 + $0x18] sm:$0xff]  ;;  %v398_v56 = vmul.f32 %v738_v45, %v737_v50  ;;  %s416_s23 = smov %s378_s23 }
 0x12a   : >> { %v405_v54 = vmul.f32 %v740_v47, %v739_v53  ;;  %v424_v13 = vld [vmem:[%s416_s23] sm:$0xff]  ;;  %v741_v17 = vld [vmem:[%s416_s23 + $0x8] sm:$0xff]  ;;  %v744_v18 = vld [vmem:[%s416_s23 + $0x10] sm:$0xff] }
 0x12b   : >> { %v392_v55 = vadd.f32 %v391_v52, %v385_v51  ;;  %v747_v11 = vld [vmem:[%s416_s23 + $0x18] sm:$0xff] }
 0x12c   : >> { %v407_v58 = vsel %vm406_vm1, %v405_v54, 0.0 }
 0x12d   : >> { %v399_v57 = vadd.f32 %v398_v56, %v392_v55 }
 0x12f   : >> { %v408_v59 = vadd.f32 %v407_v58, %v399_v57 }
 0x131   : >> { %v409_v60 = vrot.slane %v408_v59, 4 }
 0x133   : >> { %v410_v61 = vadd.f32 %v409_v60, %v408_v59 }
 0x135   : >> { %v411_v62 = vrot.slane %v410_v61, 2 }
 0x137   : >> { %v412_v63 = vadd.f32 %v411_v62, %v410_v61 }
 0x139   : >> { %v413_v2 = vrot.slane %v412_v63, 1 }
 0x13b   : >> { %v414_v5 = vadd.f32 %v413_v2, %v412_v63 }
 0x13d   : >> { %v420_v16 = vmul.f32 %v414_v5, %v369_v41 }
 0x13f   : >> { %v425_v21 = vmul.f32 %v424_v13, %v420_v16  ;;  %v445_v22 = vmul.f32 %v741_v17, %v420_v16  ;;  %v466_v23 = vmul.f32 %v744_v18, %v420_v16  ;;  %v487_v24 = vmul.f32 %v747_v11, %v420_v16 }
 0x141   : >> { %v429_v26 = vsub.f32 %v426_v6, %v425_v21  ;;  %v450_v27 = vsub.f32 %v742_v7, %v445_v22  ;;  %v471_v12 = vsub.f32 %v745_v8, %v466_v23  ;;  %v492_v10 = vsub.f32 %v748_v15, %v487_v24 }
 0x143   : >> { %v430_v28 = vsel %vm428_vm8, %v429_v26, %v426_v6  ;;  %v451_v29 = vsel %vm428_vm8, %v450_v27, %v742_v7  ;;  %v472_v30 = vsel %vm428_vm8, %v471_v12, %v745_v8  ;;  %v493_v31 = vsel %vm428_vm8, %v492_v10, %v748_v15 }
 0x144   : >> { %v438_v32 = vsel %vm1062_vm4, %v424_v13, %v430_v28  ;;  %v459_v33 = vsel %vm1071_vm7, %v741_v17, %v451_v29  ;;  %v480_v34 = vsel %vm1079_vm9, %v744_v18, %v472_v30  ;;  %v501_v36 = vsel %vm1085_vm10, %v747_v11, %v493_v31 }
 0x145   : >> { %439 = vst [vmem:[%s1053_s20] sm:$0xff] %v438_v32  ;;  %743 = vst [vmem:[%s1053_s20 + $0x8] sm:$0xff] %v459_v33 }
 0x146   : >> { %746 = vst [vmem:[%s1053_s20 + $0x10] sm:$0xff] %v480_v34  ;;  %749 = vst [vmem:[%s1053_s20 + $0x18] sm:$0xff] %v501_v36 }
 0x149   : > { %189 = sbr.rel (!%p187_p9) target bundleno = 37 (0x25), region = 206 }
 0x14d   : >> { %v504_v37 = vld [vmem:[%s503_s24] ss:$0 sm:$0xff] }
 0x14e   : >> { %v509_v38 = vsel %vm1014_vm0, %v998_v0, %v504_v37 }
 0x14f   : >> { %510 = vst [vmem:[%s503_s24] sm:$0x1] %v509_v38 }
 0x150   : > { %p572_p10 = scmp.lt.s32.totalorder (%p922_p3), %s854_s11, 0  ;;  %s573_s30 = ssub.s32 (%p922_p3), 0, %s854_s11  ;;  %v607_v20 = vld [vmem:[%s159_s18] sm:$0xff] (%p922_p3) }
 0x151   : > { %s754_s3 = smin.u32 (%p922_p3), %s854_s11, %s573_s30 }
 0x152   : > { %571 = sbr.rel (!%p922_p3) target bundleno = 349 (0x15d), region = 99  ;;  %s575_s4 = sshrl.u32 (%p922_p3), %s754_s3, 3 }
 0x153   : > { %s576_s5 = ssub.s32 (%p922_p3), 0, %s575_s4 }
 0x156   : > { %v558_v39 = vld [vmem:[%s949_s20] sm:$0xff]  ;;  %v560_v35 = vld [vmem:[%s949_s20 + $0x8] sm:$0xff]  ;;  %v562_v40 = vld [vmem:[%s949_s20 + $0x10] sm:$0xff] }
 0x157   : > { %v564_v0 = vld [vmem:[%s949_s20 + $0x18] sm:$0xff]  ;;  %559 = vst [vmem:[%s524_s29] sm:$0xff] %v558_v39  ;;  %561 = vst [vmem:[%s524_s29 + $0x8] sm:$0xff] %v560_v35 }
 0x158   : > { %563 = vst [vmem:[%s524_s29 + $0x10] sm:$0xff] %v562_v40  ;;  %565 = vst [vmem:[%s524_s29 + $0x18] sm:$0xff] %v564_v0 }
 0x159   : > { %s1163_s5 = smov (!%p572_p10, %s576_s5), %s575_s4 }
 0x15a   : > { %s755_s6 = sshll.u32 %s1163_s5, 3 }
 0x15b   : > { %s579_s17 = scalar_lea.vmem %s1144_s2, %s755_s6 }
 0x15c   : > { %608 = vst [vmem:[%s579_s17] sm:$0xff] %v607_v20 }
 0x15d PF: > { %s9_s13 = sadd.s32 1, %s862_s13   ;;  %s1156_s9 = smov %s850_s10 }
 0x15e   : > { %p6_p11 = scmp.ge.s32.totalorder %s9_s13, 18   ;;  %s1157_s10 = smov %s928_s25 }
 0x15f   : > { %s1158_s11 = smov %s858_s12  ;;  %s1159_s12 = smov %s1161_s14 }
 0x160   :  { %8 = sbr.rel (!%p6_p11) target bundleno = 3 (0x3), region = 217 }

// kernel: custom-call.48
= control target key start
LH: loop header
LB: loop body
LE: loop exit
PB: predicated region body
PF: predicated region fallthrough
CT: control target
= control target key end

     0   :  { %s404_s6 = smov 0   ;;  %s481_s0 = inlined_call_operand.vmem [shape: f32[16,16,16], index: 0, kind: input, shape index: {}]   ;;  %s482_s1 = inlined_call_operand.vmem [shape: f32[16,16,16], index: 1, kind: output, shape index: {}]  }
   0x1 LB: > { %s348_s7 = sadd.s32 4294967295, %s391_s6   ;;  %p350_p0 = scmp.ge.s32.totalorder %s391_s6, 16  ;;  %s391_s6 = sphi %s404_s6, %s7_s6  }
   0x2   : > { %s23_s8 = sand.u32 (!%p350_p0), 1, %s391_s6   ;;  %s352_s9 = sshll.u32 (!%p350_p0), %s391_s6, 4 }
   0x3   : > { %21 = sbr.rel (%p350_p0) target bundleno = 10 (0xa), region = 16  ;;  %s351_s10 = sshll.u32 (!%p350_p0), %s23_s8, 4 }
   0x4   : > { %s27_s13 = scalar_lea.vmem (!%p350_p0), %s481_s0, %s352_s9  ;;  %s25_s14 = scalar_lea.vmem (!%p350_p0), [#allocation0], %s351_s10 }
   0x5   : > { %v40_v0 = vld [vmem:[%s27_s13] sm:$0xff] (!%p350_p0)  ;;  %v42_v1 = vld [vmem:[%s27_s13 + $0x8] sm:$0xff] (!%p350_p0) }
   0x6   : > { %41 = vst [vmem:[%s25_s14] sm:$0xff] (!%p350_p0), %v40_v0  ;;  %43 = vst [vmem:[%s25_s14 + $0x8] sm:$0xff] (!%p350_p0), %v42_v1 }
   0xa PF: > { %p353_p1 = scmp.ge.s32.totalorder %s391_s6, 1  ;;  %p48_p2 = scmp.lt.s32.totalorder %s391_s6, 17 }
   0xc   : > { %p49_p3 = pnand %p353_p1, %p48_p2 }
   0xd   : > { %s55_s15 = sand.u32 (!%p49_p3), 1, %s348_s7   ;;  %v66_v2 = vlaneseq (!%p49_p3)  ;;  %vm87_vm0 = vcmask (!%p49_p3), 130048   ;;  %v393_v42 = vmov (!%p49_p3), 0.0   ;;  %s373_s18 = sshll.u32 (!%p49_p3), %s348_s7, 4 }
   0xe   : > { %52 = sbr.rel (%p49_p3) target bundleno = 2196 (0x894), region = 39  ;;  %s354_s16 = sshll.u32 (!%p49_p3), %s55_s15, 4 }
   0xf   : > { %v420_v3 = vand.u32 (!%p49_p3), 127, %v66_v2  ;;  %v69_v4 = vshrl.u32 (!%p49_p3), %v66_v2, 7  ;;  %s422_s17 = scalar_lea.vmem (!%p49_p3), [#allocation0], %s354_s16  ;;  %s290_s21 = scalar_lea.vmem (!%p49_p3), %s482_s1, %s373_s18 }
  0x10   : > { %v72_v5 = vld [vmem:[%s422_s17] sm:$0xff] (!%p49_p3)  ;;  %v363_v38 = vld [vmem:[%s422_s17 + $0x8] ss:$0 sm:$0xff] (!%p49_p3)  ;;  %v364_v48 = vld [vmem:[%s422_s17 + $0x9] ss:$0 sm:$0xff] (!%p49_p3) }
  0x11   : > { %v356_v6 = vld [vmem:[%s422_s17 + $0x1] ss:$0 sm:$0xff] (!%p49_p3)  ;;  %vm71_vm1 = vcmp.eq.s32.totalorder (!%p49_p3), %v420_v3, %v69_v4  ;;  %vm75_vm2 = vcmp.eq.s32.totalorder (!%p49_p3), %v420_v3, 0  ;;  %v357_v11 = vld [vmem:[%s422_s17 + $0x2] ss:$0 sm:$0xff] (!%p49_p3)  ;;  %vm91_vm3 = vcmp.eq.s32.totalorder (!%p49_p3), %v420_v3, 1 }
  0x12   : > { %v88_v7 = vsel (!%p49_p3), %vm87_vm0, %v356_v6, 0.0  ;;  %v76_v8 = vsel (!%p49_p3), %vm75_vm2, %v72_v5, 1.0  ;;  %v99_v12 = vsel (!%p49_p3), %vm87_vm0, %v357_v11, 0.0  ;;  %v358_v16 = vld [vmem:[%s422_s17 + $0x3] ss:$0 sm:$0xff] (!%p49_p3)  ;;  %vm102_vm4 = vcmp.eq.s32.totalorder (!%p49_p3), %v420_v3, 2 }
  0x13   : > { %v77_v9 = vsel (!%p49_p3), %vm71_vm1, %v76_v8, 0.0  ;;  %v110_v17 = vsel (!%p49_p3), %vm87_vm0, %v358_v16, 0.0  ;;  %v359_v21 = vld [vmem:[%s422_s17 + $0x4] ss:$0 sm:$0xff] (!%p49_p3)  ;;  %vm113_vm5 = vcmp.eq.s32.totalorder (!%p49_p3), %v420_v3, 3  ;;  %vm124_vm6 = vcmp.eq.s32.totalorder (!%p49_p3), %v420_v3, 4 }
  0x14   : > { %v92_v10 = vmul.f32 (!%p49_p3), %v88_v7, %v77_v9  ;;  %v121_v22 = vsel (!%p49_p3), %vm87_vm0, %v359_v21, 0.0  ;;  %v360_v26 = vld [vmem:[%s422_s17 + $0x5] ss:$0 sm:$0xff] (!%p49_p3)  ;;  %v361_v31 = vld [vmem:[%s422_s17 + $0x6] ss:$0 sm:$0xff] (!%p49_p3)  ;;  %vm135_vm7 = vcmp.eq.s32.totalorder (!%p49_p3), %v420_v3, 5 }
  0x15   : > { %v132_v27 = vsel %vm87_vm0, %v360_v26, 0.0  ;;  %v143_v32 = vsel %vm87_vm0, %v361_v31, 0.0  ;;  %v82_v36 = vadd.s32 8, %v69_v4  ;;  %v362_v37 = vld [vmem:[%s422_s17 + $0x7] ss:$0 sm:$0xff]  ;;  %vm146_vm8 = vcmp.eq.s32.totalorder %v420_v3, 6 }
  0x16   : > { %93 = vadd.xlane.f32.xlu0 %v92_v10  ;;  %v154_v39 = vsel %vm87_vm0, %v362_v37, 0.0  ;;  %v165_v44 = vsel %vm87_vm0, %v363_v38, 0.0  ;;  %vm157_vm10 = vcmp.eq.s32.totalorder %v420_v3, 7  ;;  %vm168_vm11 = vcmp.eq.s32.totalorder %v420_v3, 8  ;;  %v365_v56 = vld [vmem:[%s422_s17 + $0xa] ss:$0 sm:$0xff] }
  0x17   : > { %vm83_vm9 = vcmp.eq.s32.totalorder %v420_v3, %v82_v36  ;;  %v180_v51 = vsel %vm87_vm0, %v364_v48, 0.0  ;;  %vm183_vm12 = vcmp.eq.s32.totalorder %v420_v3, 9  ;;  %v195_v59 = vsel %vm87_vm0, %v365_v56, 0.0  ;;  %v366_v0 = vld [vmem:[%s422_s17 + $0xb] ss:$0 sm:$0xff] }
  0x18   : > { %v84_v43 = vsel %vm83_vm9, 1.0, %v393_v42  ;;  %vm198_vm13 = vcmp.eq.s32.totalorder %v420_v3, 10  ;;  %v210_v4 = vsel %vm87_vm0, %v366_v0, 0.0  ;;  %vm213_vm14 = vcmp.eq.s32.totalorder %v420_v3, 11 }
  0x19   : > { %v173_v46 = vmul.f32 %v165_v44, %v84_v43  ;;  %vm228_vm15 = vcmp.eq.s32.totalorder %v420_v3, 12  ;;  %vm243_vm1 = vcmp.eq.s32.totalorder %v420_v3, 13  ;;  %vm258_vm2 = vcmp.eq.s32.totalorder %v420_v3, 14 }
  0xa3   : > { %v94_v13 = vpop.xlane.xlu0 %93 }
  0xa4   : > { %v95_v14 = vsel %vm91_vm3, %v94_v13, %v77_v9  ;;  %v367_v9 = vld [vmem:[%s422_s17 + $0xc] ss:$0 sm:$0xff]  ;;  %vm273_vm3 = vcmp.eq.s32.totalorder %v420_v3, 15 }
  0xa5   : > { %v103_v15 = vmul.f32 %v99_v12, %v95_v14  ;;  %v225_v12 = vsel %vm87_vm0, %v367_v9, 0.0 }
  0xa7   : > { %104 = vadd.xlane.f32.xlu0 %v103_v15 }
 0x134   : > { %v105_v18 = vpop.xlane.xlu0 %104 }
 0x135   : > { %v106_v19 = vsel %vm102_vm4, %v105_v18, %v95_v14 }
 0x136   : > { %v114_v20 = vmul.f32 %v110_v17, %v106_v19  ;;  %v368_v17 = vld [vmem:[%s422_s17 + $0xd] ss:$0 sm:$0xff] }
 0x138   : > { %115 = vadd.xlane.f32.xlu1 %v114_v20  ;;  %v240_v20 = vsel %vm87_vm0, %v368_v17, 0.0 }
 0x1c5   : > { %v116_v23 = vpop.xlane.xlu1 %115 }
 0x1c6   : > { %v117_v24 = vsel %vm113_vm5, %v116_v23, %v106_v19 }
 0x1c7   : > { %v125_v25 = vmul.f32 %v121_v22, %v117_v24 }
 0x1c9   : > { %126 = vadd.xlane.f32.xlu1 %v125_v25  ;;  %v369_v25 = vld [vmem:[%s422_s17 + $0xe] ss:$0 sm:$0xff] }
 0x256   : > { %v127_v28 = vpop.xlane.xlu1 %126 }
 0x257   : > { %v128_v29 = vsel %vm124_vm6, %v127_v28, %v117_v24  ;;  %v255_v28 = vsel %vm87_vm0, %v369_v25, 0.0 }
 0x258   : > { %v136_v30 = vmul.f32 %v132_v27, %v128_v29 }
 0x25a   : > { %137 = vadd.xlane.f32.xlu0 %v136_v30 }
 0x2e7   : > { %v138_v33 = vpop.xlane.xlu0 %137 }
 0x2e8   : > { %v139_v34 = vsel %vm135_vm7, %v138_v33, %v128_v29  ;;  %v370_v33 = vld [vmem:[%s422_s17 + $0xf] ss:$0 sm:$0xff] }
 0x2e9   : > { %v147_v35 = vmul.f32 %v143_v32, %v139_v34  ;;  %v270_v36 = vsel %vm87_vm0, %v370_v33, 0.0 }
 0x2eb   : > { %148 = vadd.xlane.f32.xlu1 %v147_v35 }
 0x378   : > { %v149_v40 = vpop.xlane.xlu1 %148 }
 0x379   : > { %v150_v41 = vsel %vm146_vm8, %v149_v40, %v139_v34 }
 0x37a   : > { %v158_v45 = vmul.f32 %v154_v39, %v150_v41 }
 0x37c   : > { %159 = vadd.xlane.f32.xlu0 %v158_v45 }
 0x380   : > { %174 = vadd.xlane.f32.xlu0 %v173_v46 }
 0x409   : > { %v160_v47 = vpop.xlane.xlu0 %159 }
 0x40a   : > { %v161_v49 = vsel %vm157_vm10, %v160_v47, %v150_v41 }
 0x40b   : > { %v169_v50 = vmul.f32 %v165_v44, %v161_v49 }
 0x40d   : > { %170 = vadd.xlane.f32.xlu1 %v169_v50  ;;  %v175_v52 = vpop.xlane.xlu0 %174 }
 0x40e   : > { %v176_v53 = vsel %vm168_vm11, %v175_v52, %v84_v43 }
 0x40f   : > { %v188_v54 = vmul.f32 %v180_v51, %v176_v53 }
 0x411   : > { %189 = vadd.xlane.f32.xlu0 %v188_v54 }
 0x49a   : > { %v171_v55 = vpop.xlane.xlu1 %170 }
 0x49b   : > { %v172_v57 = vsel %vm168_vm11, %v171_v55, %v161_v49 }
 0x49c   : > { %v184_v58 = vmul.f32 %v180_v51, %v172_v57 }
 0x49e   : > { %185 = vadd.xlane.f32.xlu1 %v184_v58  ;;  %v190_v60 = vpop.xlane.xlu0 %189 }
 0x49f   : > { %v191_v61 = vsel %vm183_vm12, %v190_v60, %v176_v53 }
 0x4a0   : > { %v203_v62 = vmul.f32 %v195_v59, %v191_v61 }
 0x4a2   : > { %204 = vadd.xlane.f32.xlu0 %v203_v62 }
 0x52b   : > { %v186_v63 = vpop.xlane.xlu1 %185 }
 0x52c   : > { %v187_v1 = vsel %vm183_vm12, %v186_v63, %v172_v57 }
 0x52d   : > { %v199_v2 = vmul.f32 %v195_v59, %v187_v1 }
 0x52f   : > { %200 = vadd.xlane.f32.xlu1 %v199_v2  ;;  %v205_v5 = vpop.xlane.xlu0 %204 }
 0x530   : > { %v206_v6 = vsel %vm198_vm13, %v205_v5, %v191_v61 }
 0x531   : > { %v218_v7 = vmul.f32 %v210_v4, %v206_v6 }
 0x533   : > { %219 = vadd.xlane.f32.xlu0 %v218_v7 }
 0x5bc   : > { %v201_v8 = vpop.xlane.xlu1 %200 }
 0x5bd   : > { %v202_v10 = vsel %vm198_vm13, %v201_v8, %v187_v1 }
 0x5be   : > { %v214_v11 = vmul.f32 %v210_v4, %v202_v10 }
 0x5c0   : > { %215 = vadd.xlane.f32.xlu1 %v214_v11  ;;  %v220_v13 = vpop.xlane.xlu0 %219 }
 0x5c1   : > { %v221_v14 = vsel %vm213_vm14, %v220_v13, %v206_v6 }
 0x5c2   : > { %v233_v15 = vmul.f32 %v225_v12, %v221_v14 }
 0x5c4   : > { %234 = vadd.xlane.f32.xlu0 %v233_v15 }
 0x64d   : > { %v216_v16 = vpop.xlane.xlu1 %215 }
 0x64e   : > { %v217_v18 = vsel %vm213_vm14, %v216_v16, %v202_v10 }
 0x64f   : > { %v229_v19 = vmul.f32 %v225_v12, %v217_v18 }
 0x651   : > { %230 = vadd.xlane.f32.xlu1 %v229_v19  ;;  %v235_v21 = vpop.xlane.xlu0 %234 }
 0x652   : > { %v236_v22 = vsel %vm228_vm15, %v235_v21, %v221_v14 }
 0x653   : > { %v248_v23 = vmul.f32 %v240_v20, %v236_v22 }
 0x655   : > { %249 = vadd.xlane.f32.xlu0 %v248_v23 }
 0x6de   : > { %v231_v24 = vpop.xlane.xlu1 %230 }
 0x6df   : > { %v232_v26 = vsel %vm228_vm15, %v231_v24, %v217_v18 }
 0x6e0   : > { %v244_v27 = vmul.f32 %v240_v20, %v232_v26 }
 0x6e2   : > { %245 = vadd.xlane.f32.xlu1 %v244_v27  ;;  %v250_v29 = vpop.xlane.xlu0 %249 }
 0x6e3   : > { %v251_v30 = vsel %vm243_vm1, %v250_v29, %v236_v22 }
 0x6e4   : > { %v263_v31 = vmul.f32 %v255_v28, %v251_v30 }
 0x6e6   : > { %264 = vadd.xlane.f32.xlu0 %v263_v31 }
 0x76f   : > { %v246_v32 = vpop.xlane.xlu1 %245 }
 0x770   : > { %v247_v34 = vsel %vm243_vm1, %v246_v32, %v232_v26 }
 0x771   : > { %v259_v35 = vmul.f32 %v255_v28, %v247_v34 }
 0x773   : > { %260 = vadd.xlane.f32.xlu1 %v259_v35  ;;  %v265_v37 = vpop.xlane.xlu0 %264 }
 0x774   : > { %v266_v38 = vsel %vm258_vm2, %v265_v37, %v251_v30 }
 0x775   : > { %v278_v39 = vmul.f32 %v270_v36, %v266_v38 }
 0x777   : > { %279 = vadd.xlane.f32.xlu0 %v278_v39 }
 0x800   : > { %v261_v40 = vpop.xlane.xlu1 %260 }
 0x801   : > { %v262_v41 = vsel %vm258_vm2, %v261_v40, %v247_v34 }
 0x802   : > { %v274_v42 = vmul.f32 %v270_v36, %v262_v41 }
 0x804   : > { %275 = vadd.xlane.f32.xlu1 %v274_v42  ;;  %v280_v43 = vpop.xlane.xlu0 %279 }
 0x805   : > { %v281_v44 = vsel %vm273_vm3, %v280_v43, %v266_v38 }
 0x806   : > { %306 = vst [vmem:[%s290_s21 + $0x8] sm:$0xff] %v281_v44 }
 0x891   : > { %v276_v45 = vpop.xlane.xlu1 %275 }
 0x892   : > { %v277_v46 = vsel %vm273_vm3, %v276_v45, %v262_v41 }
 0x893   : > { %304 = vst [vmem:[%s290_s21] sm:$0xff] %v277_v46 }
 0x894 PF: > { %s7_s6 = sadd.s32 1, %s391_s6  }
 0x895   : > { %p4_p4 = scmp.ge.s32.totalorder %s7_s6, 18  }
 0x897   :  { %6 = sbr.rel (!%p4_p4) target bundleno = 1 (0x1), region = 104 }

// kernel: anelr_forward_batched.1
= control target key start
LH: loop header
LB: loop body
LE: loop exit
PB: predicated region body
PF: predicated region fallthrough
CT: control target
= control target key end

     0   :  { %s5284_s0 = inlined_call_operand.vmem [shape: f32[256,16], index: 0, kind: input, shape index: {}]   ;;  %s5285_s1 = inlined_call_operand.hbm [shape: f32[256,16], index: 1, kind: input, shape index: {}]   ;;  %s5286_s2 = inlined_call_operand.hbm [shape: f32[256,16], index: 2, kind: input, shape index: {}]   ;;  %s5287_s3 = inlined_call_operand.hbm [shape: f32[256,16], index: 3, kind: input, shape index: {}]   ;;  %s5288_s4 = inlined_call_operand.vmem [shape: f32[2,16,32], index: 4, kind: input, shape index: {}]   ;;  %s5289_s5 = inlined_call_operand.vmem [shape: f32[2,32,8], index: 5, kind: input, shape index: {}]   ;;  %s5290_s6 = inlined_call_operand.vmem [shape: f32[8,32], index: 6, kind: input, shape index: {}]   ;;  %s5291_s7 = inlined_call_operand.vmem [shape: f32[32,16], index: 7, kind: input, shape index: {}]   ;;  %s5292_s8 = inlined_call_operand.vmem [shape: f32[8,32], index: 8, kind: input, shape index: {}]   ;;  %s5293_s9 = inlined_call_operand.vmem [shape: f32[16,1], index: 9, kind: output, shape index: {0}]   ;;  %s5294_s10 = inlined_call_operand.vmem [shape: f32[256,16], index: 10, kind: output, shape index: {1}]   ;;  %s5295_s11 = inlined_call_operand.vmem [shape: f32[256,16], index: 11, kind: output, shape index: {2}]  }
   0x1   :  { %5305 = sst [smem:[#allocation11_spill]] %s5286_s2 }
   0x2   :  { %5306 = sst [smem:[#allocation12_spill]] %s5291_s7 }
   0x3   :  { %5307 = sst [smem:[#allocation13_spill]] %s5293_s9 }
   0x4   :  { %5308 = sst [smem:[#allocation14_spill]] %s5294_s10 }
   0x5   :  { %17 = vsyncpa [#allocation3], 0 }
   0x6   :  { %19 = vsyncpa [#allocation3 + $0x1], 0 }
   0x7   :  { %20 = vsyncpa [#allocation5], 0 }
   0x8   :  { %22 = vsyncpa [#allocation5 + $0x1], 0  ;;  %s4273_s17 = smov 0   ;;  %s4275_s18 = smov 0  }
   0x9   :  { %s4277_s19 = smov 0   ;;  %s4279_s20 = smov 0  }
   0xa LB: > { %s4292_s21 = sadd.s32 4294967295, %s4205_s20   ;;  %s4295_s22 = sadd.s32 1, %s4205_s20   ;;  %s4205_s20 = sphi %s4279_s20, %s5329_s20   ;;  %s4201_s19 = sphi %s4277_s19, %s5333_s19   ;;  %s4197_s18 = sphi %s4275_s18, %s5332_s18   ;;  %s4193_s17 = sphi %s4273_s17, %s5331_s17  }
   0xb   : > { %5309 = sst [smem:[#allocation9_spill]] %s4295_s22  ;;  %s58_s23 = ssub.s32 %s4205_s20, %s4295_s22 }
   0xc   : > { %s61_s24 = sadd.s32 1, %s4201_s19  ;;  %p59_p0 = scmp.eq.s32.totalorder %s58_s23, 0 }
   0xd   : > { %p68_p1 = scmp.ne.s32.totalorder %s4201_s19, %s4197_s18  ;;  %p69_p2 = scmp.eq.s32.totalorder %s4205_s20, 0 }
   0xe   : > { %p74_p3 = scmp.ne.s32.totalorder %s4197_s18, %s4193_s17  ;;  %p75_p5 = scmp.eq.s32.totalorder %s4292_s21, 0 }
   0xf   : > { %s4305_s25 = scalar_select %p59_p0, %s4201_s19, %s61_s24  }
  0x10   : > { %p70_p4 = por %p69_p2, %p68_p1  ;;  %p3993_p6 = scmp.lt.s32.totalorder %s4205_s20, 2 }
  0x11   : > { %5310 = sst [smem:[#allocation10_spill]] %s4305_s25  ;;  %p4309_p7 = por %p75_p5, %p74_p3 }
  0x12   : > { %s5296_s27 = sand.u32 1, %s4201_s19   ;;  %s4319_s29 = sshll.u32 %s4205_s20, 11 }
  0x13   : > { %s5311_s26 = scalar_select %p4309_p7, 1, 0 }
  0x14   : > { %s4316_s28 = sshll.u32 %s5296_s27, 7  ;;  %p4321_p8 = pnand %p3993_p6, %p70_p4 }
  0x15   : > { %s378_s12 = sand.u32 1, %s4205_s20   ;;  %s5313_s2 = sld [smem:[#allocation11_spill]] }
  0x16   : > { %s382_s16 = scalar_lea.vmem [#allocation4], %s4316_s28  ;;  %s4337_s23 = scalar_lea.sflag [#allocation5], %s378_s12 }
  0x17   : > { %s389_s17 = sshll.u32 %s382_s16, 4  ;;  %p4343_p12 = pneg %p4321_p8  ;;  %s4334_s17 = int_to_ptr.vmem [resolvable:$true] %s389_s17 }
  0x1b   : > { %s4330_s15 = scalar_lea.hbm %s5313_s2, %s4319_s29  ;;  %s4082_s16 = scalar_lea.hbm %s5313_s2, 4096 }
  0x1c   : > { %s4077_s24 = scalar_lea.hbm %s4330_s15, 2048  ;;  %p4083_p1 = scmp.lt.u32.totalorder %s4330_s15, %s5313_s2 }
  0x1d   : > { %p4078_p11 = scmp.ne.s32.totalorder %s4330_s15, %s4077_s24  ;;  %p4084_p2 = scmp.lt.u32.totalorder %s4082_s16, %s4077_s24 }
  0x1e   : > { %p4086_p4 = scmp.lt.u32.totalorder %s4077_s24, %s4330_s15 }
  0x1f   : > { %p4080_p13 = pnand %p4343_p12, %p4078_p11  ;;  %p4085_p3 = por %p4084_p2, %p4083_p1 }
  0x21   : > { %p4081_p0 = pneg %p4080_p13  ;;  %p4087_p5 = por %p4086_p4, %p4085_p3 }
  0x23   : > { %p4088_p6 = pnand %p4087_p5, %p4081_p0 }
  0x25   : > { %4091 = shalt.err (!%p4088_p6)
}
  0x26   : > { %s4092_s12 = scalar_lea.vmem %s4334_s17, 2048  ;;  %s4207_s13 = smov [#allocation4]  }
  0x27   : > { %p4093_p11 = scmp.ne.s32.totalorder %s4334_s17, %s4092_s12  ;;  %s4097_s14 = sshll.u32 %s4207_s13, 4  ;;  %s4098_s14 = int_to_ptr.vmem [resolvable:$false] %s4097_s14 }
  0x28   : > { %s4099_s22 = scalar_lea.vmem %s4098_s14, 4096  ;;  %p4100_p10 = scmp.lt.s32.totalorder %s4334_s17, %s4098_s14 }
  0x29   : > { %p4095_p13 = pnand %p4093_p11, %p4343_p12  ;;  %p4101_p7 = scmp.lt.s32.totalorder %s4099_s22, %s4092_s12 }
  0x2b   : > { %p4096_p9 = pneg %p4095_p13  ;;  %p4102_p1 = por %p4101_p7, %p4100_p10 }
  0x2d   : > { %p4103_p2 = pnand %p4102_p1, %p4096_p9 }
  0x2f   : > { %4106 = shalt.err (!%p4103_p2)
}
  0x30   : > { %s5300_s25 = smov 128   ;;  %s5302_s24 = smov 8  }
  0x31   : > { %3989 = dma.hbm_to_vmem [thread:$0]  (!%p4321_p8), %s4330_s15, 2048, %s4334_s17, %s4337_s23, %s5300_s25, %s5300_s25, %s5302_s24  }
  0x32   : > { %p5315_p7 = scmp.lt.s32.totalorder %s4205_s20, 3  ;;  %p5316_p9 = scmp.ge.s32.totalorder %s4205_s20, 1 }
  0x33   : > { %s4382_s14 = scalar_lea.hbm %s5285_s1, %s4319_s29  ;;  %s361_s22 = scalar_lea.vmem [#allocation2], %s4316_s28 }
  0x34   : > { %p4374_p10 = pnand %p5316_p9, %p5315_p7  ;;  %s368_s2 = sshll.u32 %s361_s22, 4  ;;  %s4385_s2 = int_to_ptr.vmem [resolvable:$true] %s368_s2 }
  0x35   : > { %s4391_s20 = scalar_lea.hbm %s5287_s3, %s4319_s29  ;;  %s5318_s25 = sand.u32 1, %s4201_s19  }
  0x36   : > { %s5317_s16 = scalar_select %p4374_p10, 1, 0 }
  0x37   : > { %s4395_s24 = scalar_lea.sflag [#allocation3], %s5318_s25  ;;  %s4107_s9 = scalar_lea.hbm %s4382_s14, 2048 }
  0x38   : > { %p4108_p0 = scmp.ne.s32.totalorder %s4382_s14, %s4107_s9  ;;  %s4112_s10 = scalar_lea.hbm %s5285_s1, 4096 }
  0x39   : > { %p4113_p5 = scmp.lt.u32.totalorder %s4382_s14, %s5285_s1  ;;  %p4114_p6 = scmp.lt.u32.totalorder %s4112_s10, %s4107_s9 }
  0x3a   : > { %p4110_p3 = pnand %p4108_p0, %p4343_p12  ;;  %p4116_p13 = scmp.lt.u32.totalorder %s4107_s9, %s4382_s14 }
  0x3b   : > { %p4115_p11 = por %p4114_p6, %p4113_p5 }
  0x3c   : > { %p4111_p4 = pneg %p4110_p3 }
  0x3d   : > { %p4117_p1 = por %p4116_p13, %p4115_p11 }
  0x3f   : > { %p4118_p2 = pnand %p4117_p1, %p4111_p4 }
  0x41   : > { %4121 = shalt.err (!%p4118_p2)
}
  0x42   : > { %s4122_s29 = scalar_lea.vmem %s4385_s2, 2048  ;;  %s4210_s25 = smov [#allocation2]  }
  0x43   : > { %p4123_p7 = scmp.ne.s32.totalorder %s4385_s2, %s4122_s29  ;;  %s4127_s15 = sshll.u32 %s4210_s25, 4  ;;  %s4128_s15 = int_to_ptr.vmem [resolvable:$false] %s4127_s15 }
  0x44   : > { %s4129_s7 = scalar_lea.vmem %s4128_s15, 4096  ;;  %p4130_p3 = scmp.lt.s32.totalorder %s4385_s2, %s4128_s15 }
  0x45   : > { %p4125_p9 = pnand %p4123_p7, %p4343_p12  ;;  %p4131_p10 = scmp.lt.s32.totalorder %s4129_s7, %s4122_s29 }
  0x47   : > { %p4126_p0 = pneg %p4125_p9  ;;  %p4132_p5 = por %p4131_p10, %p4130_p3 }
  0x49   : > { %p4133_p6 = pnand %p4132_p5, %p4126_p0 }
  0x4b   : > { %4136 = shalt.err (!%p4133_p6)
}
  0x4c   : > { %s5319_s9 = smov 8   ;;  %s5320_s10 = smov 128  }
  0x4d   : > { %3986 = dma.hbm_to_vmem [thread:$0]  (!%p4321_p8), %s4382_s14, 2048, %s4385_s2, %s4395_s24, %s5320_s10, %s5320_s10, %s5319_s9  }
  0x4e   : > { %s403_s17 = scalar_lea.vmem [#allocation6], %s4316_s28  ;;  %s4137_s13 = scalar_lea.hbm %s4391_s20, 2048 }
  0x4f   : > { %s410_s12 = sshll.u32 %s403_s17, 4  ;;  %p4138_p10 = scmp.ne.s32.totalorder %s4391_s20, %s4137_s13  ;;  %s4423_s12 = int_to_ptr.vmem [resolvable:$true] %s410_s12 }
  0x50   : > { %s4142_s25 = scalar_lea.hbm %s5287_s3, 4096  ;;  %p4143_p13 = scmp.lt.u32.totalorder %s4391_s20, %s5287_s3 }
  0x51   : > { %p4140_p4 = pnand %p4138_p10, %p4343_p12  ;;  %p4144_p1 = scmp.lt.u32.totalorder %s4142_s25, %s4137_s13 }
  0x52   : > { %p4146_p7 = scmp.lt.u32.totalorder %s4137_s13, %s4391_s20 }
  0x53   : > { %p4141_p11 = pneg %p4140_p4  ;;  %p4145_p2 = por %p4144_p1, %p4143_p13 }
  0x55   : > { %p4147_p9 = por %p4146_p7, %p4145_p2 }
  0x57   : > { %p4148_p0 = pnand %p4147_p9, %p4141_p11 }
  0x59   : > { %4151 = shalt.err (!%p4148_p0)
}
  0x5a   : > { %s4152_s2 = scalar_lea.vmem %s4423_s12, 2048  ;;  %s4211_s28 = smov [#allocation6]  }
  0x5b   : > { %p4153_p3 = scmp.ne.s32.totalorder %s4423_s12, %s4152_s2  ;;  %s4157_s24 = sshll.u32 %s4211_s28, 4  ;;  %s4158_s24 = int_to_ptr.vmem [resolvable:$false] %s4157_s24 }
  0x5c   : > { %s4159_s14 = scalar_lea.vmem %s4158_s24, 4096  ;;  %p4160_p10 = scmp.lt.s32.totalorder %s4423_s12, %s4158_s24 }
  0x5d   : > { %p4155_p5 = pnand %p4153_p3, %p4343_p12  ;;  %p4161_p4 = scmp.lt.s32.totalorder %s4159_s14, %s4152_s2 }
  0x5f   : > { %p4156_p6 = pneg %p4155_p5  ;;  %p4162_p13 = por %p4161_p4, %p4160_p10 }
  0x61   : > { %p4163_p1 = pnand %p4162_p13, %p4156_p6 }
  0x63   : > { %4166 = shalt.err (!%p4163_p1)
}
  0x64   : > { %3992 = dma.hbm_to_vmem [thread:$0]  (!%p4321_p8), %s4391_s20, 2048, %s4423_s12, %s4337_s23, %s5320_s10, %s5320_s10, %s5319_s9  }
  0x65   : > { %p5321_p12 = scmp.ne.s32.totalorder %s5317_s16, 0 }
  0x66   : > { %s424_s27 = sand.u32 (!%p5321_p12), 1, %s4197_s18   ;;  %p5322_p11 = scmp.ne.s32.totalorder (!%p5321_p12), %s5311_s26, 0 }
  0x67   : > { %422 = sbr.rel (%p5321_p12) target bundleno = 1294 (0x50e), region = 56  ;;  %s4453_s17 = sshll.u32 (!%p5321_p12), %s424_s27, 7 }
  0x68   : > { %s425_s13 = scalar_lea.sflag (!%p5321_p12), [#allocation3], %s424_s27  ;;  %s4456_s22 = scalar_lea.vmem (!%p5321_p12), [#allocation2], %s4453_s17 }
  0x6e   : > { %4184 = dma.done.wait (%p5322_p11), %s425_s13, 2048  }
  0x6f   : > { %4186 = vsyncadd (%p5322_p11), %s425_s13, 4294965248  ;;  %s433_s30 = sand.u32 1, %s4292_s21   ;;  %s4464_s16 = scalar_lea.vmem [#allocation4], %s4453_s17 }
  0x70   : > { %s434_s23 = scalar_lea.sflag [#allocation5], %s433_s30 }
  0x71   : > { %4188 = dma.done.wait (%p5322_p11), %s434_s23, 4096  }
  0x72   : > { %4190 = vsyncadd (%p5322_p11), %s434_s23, 4294963200  ;;  %s3350_s20 = sshll.u32 %s4292_s21, 4  ;;  %vm574_vm0 = vcmask 130048   ;;  %v550_v0 = vld [vmem:[%s5288_s4] sm:$0xff]  ;;  %v551_v1 = vld [vmem:[%s5288_s4 + $0x8] sm:$0xff]  ;;  %vm820_vm3 = vcmask 261120  }
  0x73   : > { %p510_p8 = scmp.lt.s32.totalorder %s3350_s20, 31  ;;  %v3881_v3 = vpack.c.bf16 %v551_v1, %v550_v0  ;;  %v555_v19 = vld [vmem:[%s5289_s5] sm:$0xff]  ;;  %v556_v20 = vld [vmem:[%s5289_s5 + $0x8] sm:$0xff]  ;;  %v557_v22 = vld [vmem:[%s5289_s5 + $0x10] sm:$0xff]  ;;  %s5009_s7 = scalar_lea.vmem [#allocation6], %s4453_s17 }
  0x74   : > { %v3885_v21 = vpack.c.bf16 %v556_v20, %v555_v19  ;;  %v558_v23 = vld [vmem:[%s5289_s5 + $0x18] sm:$0xff]  ;;  %v1079_v25 = vld [vmem:[%s5290_s6] sm:$0xff]  ;;  %p518_p2 = scmp.lt.s32.totalorder %s4292_s21, 1 }
  0x75   : > { %s5335_s20 = smov (!%p510_p8, %s3350_s20), 31  ;;  %3882 = vmatprep.subr.bf16.mxu0 %v3881_v3  ;;  %v3889_v24 = vpack.c.bf16 %v558_v23, %v557_v22  ;;  %v4535_v26 = vld [vmem:[%s5292_s8] ss:$0 sm:$0xff] }
  0x76   : > { %s4471_s9 = sshll.u32 %s5335_s20, 3  ;;  %3884 = vmatpush3.bf16.msra.mxu0 %v3881_v3  ;;  %3886 = vmatprep.subr.bf16.mxu1 %v3885_v21  ;;  %s5323_s20 = sld [smem:[#allocation12_spill]] }
  0x77   : > { %s4477_s29 = scalar_lea.vmem %s5284_s0, %s4471_s9  ;;  %3888 = vmatpush3.bf16.msra.mxu1 %v3885_v21  ;;  %3707 = vmatprep.subr.mxu0 %v1079_v25  ;;  %s4586_s13 = scalar_lea.vmem %s5295_s11, %s4471_s9 }
  0x78   : > { %v534_v2 = vld [vmem:[%s4477_s29] sm:$0xff]  ;;  %v535_v4 = vld [vmem:[%s4477_s29 + $0x8] sm:$0xff]  ;;  %v536_v5 = vld [vmem:[%s4477_s29 + $0x10] sm:$0xff]  ;;  %3890 = vmatprep.subr.bf16.mxu1 %v3889_v24  ;;  %s5337_s21 = smov (!%p518_p2, %s4292_s21), 1 }
  0x79   : > { %3651 = vmatprep.mubr.msk.f32.mxu0 %vm574_vm0, %v534_v2  ;;  %v537_v6 = vld [vmem:[%s4477_s29 + $0x18] sm:$0xff]  ;;  %v538_v7 = vld [vmem:[%s4477_s29 + $0x20] sm:$0xff]  ;;  %v539_v8 = vld [vmem:[%s4477_s29 + $0x28] sm:$0xff] }
  0x7a   : > { %3652 = vmatmul.mubr.msk.f32.vlgmr.msra.gmra.mrb[0].mxu0 %vm574_vm0, %v535_v4  ;;  %v540_v9 = vld [vmem:[%s4477_s29 + $0x30] sm:$0xff]  ;;  %v541_v10 = vld [vmem:[%s4477_s29 + $0x38] sm:$0xff]  ;;  %v542_v11 = vld [vmem:[%s4477_s29 + $0x40] sm:$0xff] }
  0x7b   : > { %3654 = vmatprep.mubr.msk.f32.mxu0 %vm574_vm0, %v536_v5  ;;  %v543_v12 = vld [vmem:[%s4477_s29 + $0x48] sm:$0xff]  ;;  %v544_v13 = vld [vmem:[%s4477_s29 + $0x50] sm:$0xff]  ;;  %v545_v14 = vld [vmem:[%s4477_s29 + $0x58] sm:$0xff]  ;;  %3892 = vmatpush3.bf16.msra.mxu1 %v3889_v24 }
  0x7c   : > { %v546_v15 = vld [vmem:[%s4477_s29 + $0x60] sm:$0xff]  ;;  %v547_v16 = vld [vmem:[%s4477_s29 + $0x68] sm:$0xff]  ;;  %v548_v17 = vld [vmem:[%s4477_s29 + $0x70] sm:$0xff]  ;;  %3708 = vmatpush3.msra.mxu0 %v1079_v25  ;;  %s5324_s10 = smov %s5323_s20 }
  0x7d   : > { %v549_v18 = vld [vmem:[%s4477_s29 + $0x78] sm:$0xff] }
  0x7e   : > { %3655 = vmatmul.mubr.msk.f32.gmra.mrb[2].mxu0 %vm574_vm0, %v537_v6 }
  0x7f   : > { %3657 = vmatprep.mubr.msk.f32.mxu0 %vm574_vm0, %v538_v7 }
  0x82   : > { %3658 = vmatmul.mubr.msk.f32.gmra.mrb[4].mxu0 %vm574_vm0, %v539_v8 }
  0x83   : > { %3660 = vmatprep.mubr.msk.f32.mxu0 %vm574_vm0, %v540_v9 }
  0x86   : > { %3661 = vmatmul.mubr.msk.f32.gmra.mrb[6].mxu0 %vm574_vm0, %v541_v10 }
  0x87   : > { %3663 = vmatprep.mubr.msk.f32.mxu0 %vm574_vm0, %v542_v11 }
  0x8a   : > { %3664 = vmatmul.mubr.msk.f32.gmra.mrb[8].mxu0 %vm574_vm0, %v543_v12 }
  0x8b   : > { %3666 = vmatprep.mubr.msk.f32.mxu0 %vm574_vm0, %v544_v13 }
  0x8e   : > { %3667 = vmatmul.mubr.msk.f32.gmra.mrb[10].mxu0 %vm574_vm0, %v545_v14 }
  0x8f   : > { %3669 = vmatprep.mubr.msk.f32.mxu0 %vm574_vm0, %v546_v15 }
  0x92   : > { %3670 = vmatmul.mubr.msk.f32.gmra.mrb[12].mxu0 %vm574_vm0, %v547_v16 }
  0x93   : > { %3672 = vmatprep.mubr.msk.f32.mxu0 %vm574_vm0, %v548_v17 }
  0x96   : > { %3673 = vmatmul.mubr.msk.f32.gmra.mrb[14].mxu0 %vm574_vm0, %v549_v18 }
 0x14d   : > { %v3653_v27 = vpop.f32.mrb[0].mxu0 }
 0x14e   : > { %v695_v28 = vadd.f32 %v3653_v27, %v4535_v26  ;;  %v689_v29 = vpop.f32.mrb[1].mxu0 }
 0x14f   : > { %v690_v30 = vadd.f32 %v4535_v26, %v689_v29 }
 0x150   : > { %v785_v31 = vmul.f32 0.01, %v695_v28  ;;  %vm769_vm1 = vcmp.gt.f32.partialorder %v695_v28, 0.0 }
 0x151   : > { %v3656_v32 = vpop.f32.mrb[2].mxu0  ;;  %vm768_vm2 = vcmp.gt.f32.partialorder %v690_v30, 0.0  ;;  %v784_v33 = vmul.f32 0.01, %v690_v30 }
 0x152   : > { %v705_v34 = vadd.f32 %v3656_v32, %v4535_v26  ;;  %v699_v35 = vpop.f32.mrb[3].mxu0  ;;  %v801_v39 = vsel %vm769_vm1, %v695_v28, %v785_v31  ;;  %v3358_v28 = vld [vmem:[%s5288_s4 + $0x18] sm:$0xff] }
 0x153   : > { %v700_v36 = vadd.f32 %v4535_v26, %v699_v35  ;;  %v800_v37 = vsel %vm768_vm2, %v690_v30, %v784_v33  ;;  %v4578_v30 = vld [vmem:[%s5292_s8 + $0x1] ss:$0 sm:$0xff] }
 0x154   : > { %v787_v38 = vmul.f32 0.01, %v705_v34  ;;  %3683 = vmatprep.mubr.msk.f32.mxu1 %vm820_vm3, %v800_v37  ;;  %vm771_vm4 = vcmp.gt.f32.partialorder %v705_v34, 0.0 }
 0x155   : > { %vm770_vm5 = vcmp.gt.f32.partialorder %v700_v36, 0.0  ;;  %v786_v40 = vmul.f32 0.01, %v700_v36  ;;  %v3659_v41 = vpop.f32.mrb[4].mxu0  ;;  %3684 = vmatmul.mubr.msk.f32.vlgmr.msra.gmra.mrb[0].mxu1 %vm820_vm3, %v801_v39 }
 0x156   : > { %v715_v42 = vadd.f32 %v3659_v41, %v4535_v26  ;;  %v709_v43 = vpop.f32.mrb[5].mxu0  ;;  %v803_v47 = vsel %vm771_vm4, %v705_v34, %v787_v38 }
 0x157   : > { %v710_v44 = vadd.f32 %v4535_v26, %v709_v43  ;;  %v802_v45 = vsel %vm770_vm5, %v700_v36, %v786_v40  ;;  %vm1062_vm5 = vcmask 64512  }
 0x158   : > { %v789_v46 = vmul.f32 0.01, %v715_v42  ;;  %3686 = vmatprep.mubr.msk.f32.mxu1 %vm820_vm3, %v802_v45  ;;  %vm773_vm6 = vcmp.gt.f32.partialorder %v715_v42, 0.0 }
 0x159   : > { %vm772_vm7 = vcmp.gt.f32.partialorder %v710_v44, 0.0  ;;  %v788_v48 = vmul.f32 0.01, %v710_v44  ;;  %v3662_v49 = vpop.f32.mrb[6].mxu0  ;;  %3687 = vmatmul.mubr.msk.f32.gmra.mrb[2].mxu1 %vm820_vm3, %v803_v47 }
 0x15a   : > { %v725_v50 = vadd.f32 %v3662_v49, %v4535_v26  ;;  %v719_v51 = vpop.f32.mrb[7].mxu0  ;;  %v805_v55 = vsel %vm773_vm6, %v715_v42, %v789_v46 }
 0x15b   : > { %v720_v52 = vadd.f32 %v4535_v26, %v719_v51  ;;  %v804_v53 = vsel %vm772_vm7, %v710_v44, %v788_v48 }
 0x15c   : > { %v791_v54 = vmul.f32 0.01, %v725_v50  ;;  %3689 = vmatprep.mubr.msk.f32.mxu1 %vm820_vm3, %v804_v53  ;;  %vm775_vm8 = vcmp.gt.f32.partialorder %v725_v50, 0.0 }
 0x15d   : > { %vm774_vm9 = vcmp.gt.f32.partialorder %v720_v52, 0.0  ;;  %v790_v56 = vmul.f32 0.01, %v720_v52  ;;  %v3665_v57 = vpop.f32.mrb[8].mxu0  ;;  %3690 = vmatmul.mubr.msk.f32.gmra.mrb[4].mxu1 %vm820_vm3, %v805_v55 }
 0x15e   : > { %v735_v58 = vadd.f32 %v3665_v57, %v4535_v26  ;;  %v729_v59 = vpop.f32.mrb[9].mxu0  ;;  %v807_v63 = vsel %vm775_vm8, %v725_v50, %v791_v54 }
 0x15f   : > { %v730_v60 = vadd.f32 %v4535_v26, %v729_v59  ;;  %v806_v61 = vsel %vm774_vm9, %v720_v52, %v790_v56 }
 0x160   : > { %v793_v62 = vmul.f32 0.01, %v735_v58  ;;  %3692 = vmatprep.mubr.msk.f32.mxu1 %vm820_vm3, %v806_v61  ;;  %vm777_vm10 = vcmp.gt.f32.partialorder %v735_v58, 0.0 }
 0x161   : > { %vm776_vm11 = vcmp.gt.f32.partialorder %v730_v60, 0.0  ;;  %v792_v0 = vmul.f32 0.01, %v730_v60  ;;  %v3668_v1 = vpop.f32.mrb[10].mxu0  ;;  %3693 = vmatmul.mubr.msk.f32.gmra.mrb[6].mxu1 %vm820_vm3, %v807_v63 }
 0x162   : > { %v745_v2 = vadd.f32 %v3668_v1, %v4535_v26  ;;  %v739_v3 = vpop.f32.mrb[11].mxu0  ;;  %v809_v7 = vsel %vm777_vm10, %v735_v58, %v793_v62 }
 0x163   : > { %v740_v4 = vadd.f32 %v4535_v26, %v739_v3  ;;  %v808_v5 = vsel %vm776_vm11, %v730_v60, %v792_v0 }
 0x164   : > { %v795_v6 = vmul.f32 0.01, %v745_v2  ;;  %3695 = vmatprep.mubr.msk.f32.mxu1 %vm820_vm3, %v808_v5  ;;  %vm779_vm12 = vcmp.gt.f32.partialorder %v745_v2, 0.0 }
 0x165   : > { %vm778_vm13 = vcmp.gt.f32.partialorder %v740_v4, 0.0  ;;  %v794_v8 = vmul.f32 0.01, %v740_v4  ;;  %v3671_v9 = vpop.f32.mrb[12].mxu0  ;;  %3696 = vmatmul.mubr.msk.f32.gmra.mrb[8].mxu1 %vm820_vm3, %v809_v7 }
 0x166   : > { %v755_v10 = vadd.f32 %v3671_v9, %v4535_v26  ;;  %v749_v11 = vpop.f32.mrb[13].mxu0  ;;  %v811_v15 = vsel %vm779_vm12, %v745_v2, %v795_v6 }
 0x167   : > { %v750_v12 = vadd.f32 %v4535_v26, %v749_v11  ;;  %v810_v13 = vsel %vm778_vm13, %v740_v4, %v794_v8 }
 0x168   : > { %v797_v14 = vmul.f32 0.01, %v755_v10  ;;  %3698 = vmatprep.mubr.msk.f32.mxu1 %vm820_vm3, %v810_v13  ;;  %vm781_vm14 = vcmp.gt.f32.partialorder %v755_v10, 0.0 }
 0x169   : > { %vm780_vm15 = vcmp.gt.f32.partialorder %v750_v12, 0.0  ;;  %v796_v16 = vmul.f32 0.01, %v750_v12  ;;  %v3674_v17 = vpop.f32.mrb[14].mxu0  ;;  %3699 = vmatmul.mubr.msk.f32.gmra.mrb[10].mxu1 %vm820_vm3, %v811_v15 }
 0x16a   : > { %v765_v18 = vadd.f32 %v3674_v17, %v4535_v26  ;;  %v759_v19 = vpop.f32.mrb[15].mxu0  ;;  %v813_v23 = vsel %vm781_vm14, %v755_v10, %v797_v14 }
 0x16b   : > { %v760_v20 = vadd.f32 %v4535_v26, %v759_v19  ;;  %v812_v21 = vsel %vm780_vm15, %v750_v12, %v796_v16  ;;  %v3357_v26 = vld [vmem:[%s5288_s4 + $0x10] sm:$0xff] }
 0x16c   : > { %v799_v22 = vmul.f32 0.01, %v765_v18  ;;  %3701 = vmatprep.mubr.msk.f32.mxu1 %vm820_vm3, %v812_v21  ;;  %vm783_vm1 = vcmp.gt.f32.partialorder %v765_v18, 0.0  ;;  %v3901_v29 = vpack.c.bf16 %v3358_v28, %v3357_v26 }
 0x16d   : > { %vm782_vm2 = vcmp.gt.f32.partialorder %v760_v20, 0.0  ;;  %v798_v24 = vmul.f32 0.01, %v760_v20  ;;  %3702 = vmatmul.mubr.msk.f32.gmra.mrb[12].mxu1 %vm820_vm3, %v813_v23 }
 0x16e   : > { %v815_v27 = vsel %vm783_vm1, %v765_v18, %v799_v22  ;;  %3902 = vmatprep.subr.bf16.mxu0 %v3901_v29 }
 0x16f   : > { %v814_v25 = vsel %vm782_vm2, %v760_v20, %v798_v24 }
 0x170   : > { %3704 = vmatprep.mubr.msk.f32.mxu1 %vm820_vm3, %v814_v25 }
 0x171   : > { %3705 = vmatmul.mubr.msk.f32.gmra.mrb[14].mxu1 %vm820_vm3, %v815_v27 }
 0x228   : > { %v3685_v31 = vpop.f32.mrb[0].mxu1 }
 0x229   : > { %v941_v32 = vadd.f32 %v3685_v31, %v4578_v30  ;;  %v935_v33 = vpop.f32.mrb[1].mxu1 }
 0x22a   : > { %v936_v34 = vadd.f32 %v4578_v30, %v935_v33 }
 0x22b   : > { %vm1015_vm4 = vcmp.gt.f32.partialorder %v941_v32, 0.0  ;;  %v1031_v35 = vmul.f32 0.01, %v941_v32 }
 0x22c   : > { %vm1014_vm6 = vcmp.gt.f32.partialorder %v936_v34, 0.0  ;;  %v1030_v36 = vmul.f32 0.01, %v936_v34  ;;  %v3688_v37 = vpop.f32.mrb[2].mxu1 }
 0x22d   : > { %v4588_v38 = vsel %vm1015_vm4, %v941_v32, %v1031_v35  ;;  %v951_v39 = vadd.f32 %v3688_v37, %v4578_v30  ;;  %v945_v40 = vpop.f32.mrb[3].mxu1 }
 0x22e   : > { %1064 = vst.msk [vmem:[%s4586_s13 + $0x8] sm:$0xff] %vm1062_vm5, %v4588_v38  ;;  %v946_v41 = vadd.f32 %v4578_v30, %v945_v40  ;;  %v4595_v42 = vsel %vm1014_vm6, %v936_v34, %v1030_v36  ;;  %v2226_v43 = vmul.f32 %v4588_v38, %v4588_v38 }
 0x22f   : > { %vm1017_vm7 = vcmp.gt.f32.partialorder %v951_v39, 0.0  ;;  %v1033_v44 = vmul.f32 0.01, %v951_v39  ;;  %1063 = vst.msk [vmem:[%s4586_s13] sm:$0xff] %vm1062_vm5, %v4595_v42  ;;  %3709 = vmatprep.mubr.msk.f32.mxu0 %vm1062_vm5, %v4595_v42  ;;  %v2225_v45 = vmul.f32 %v4595_v42, %v4595_v42 }
 0x230   : > { %vm1016_vm8 = vcmp.gt.f32.partialorder %v946_v41, 0.0  ;;  %v1032_v46 = vmul.f32 0.01, %v946_v41  ;;  %v3691_v47 = vpop.f32.mrb[4].mxu1  ;;  %3710 = vmatmul.mubr.msk.f32.vlgmr.msra.gmra.mrb[16].mxu0 %vm1062_vm5, %v4588_v38  ;;  %v2244_v48 = vsel %vm1062_vm5, %v2226_v43, 0.0 }
 0x231   : > { %v961_v49 = vadd.f32 %v3691_v47, %v4578_v30  ;;  %3904 = vmatpush3.bf16.msra.mxu0 %v3901_v29  ;;  %2245 = vadd.xlane.f32.xlu0 %v2244_v48  ;;  %v955_v50 = vpop.f32.mrb[5].mxu1  ;;  %v4610_v51 = vsel %vm1017_vm7, %v951_v39, %v1033_v44  ;;  %v2241_v56 = vsel %vm1062_vm5, %v2225_v45, 0.0 }
 0x232   : > { %v956_v52 = vadd.f32 %v4578_v30, %v955_v50  ;;  %v4613_v53 = vsel %vm1016_vm8, %v946_v41, %v1032_v46  ;;  %1066 = vst.msk [vmem:[%s4586_s13 + $0x18] sm:$0xff] %vm1062_vm5, %v4610_v51  ;;  %v2228_v54 = vmul.f32 %v4610_v51, %v4610_v51  ;;  %vm4823_vm8 = vmpackc.low %vm1062_vm5, %vm1062_vm5 }
 0x233   : > { %vm1019_vm9 = vcmp.gt.f32.partialorder %v961_v49, 0.0  ;;  %v1035_v55 = vmul.f32 0.01, %v961_v49  ;;  %1065 = vst.msk [vmem:[%s4586_s13 + $0x10] sm:$0xff] %vm1062_vm5, %v4613_v53  ;;  %3712 = vmatprep.mubr.msk.f32.mxu0 %vm1062_vm5, %v4613_v53  ;;  %v2227_v60 = vmul.f32 %v4613_v53, %v4613_v53 }
 0x234   : > { %vm1018_vm10 = vcmp.gt.f32.partialorder %v956_v52, 0.0  ;;  %v1034_v57 = vmul.f32 0.01, %v956_v52  ;;  %v3694_v58 = vpop.f32.mrb[6].mxu1  ;;  %3713 = vmatmul.mubr.msk.f32.gmra.mrb[18].mxu0 %vm1062_vm5, %v4610_v51  ;;  %v2250_v59 = vsel %vm1062_vm5, %v2228_v54, 0.0 }
 0x235   : > { %v971_v61 = vadd.f32 %v3694_v58, %v4578_v30  ;;  %2251 = vadd.xlane.f32.xlu1 %v2250_v59  ;;  %v965_v62 = vpop.f32.mrb[7].mxu1  ;;  %2242 = vadd.xlane.f32.xlu0 %v2241_v56  ;;  %v4632_v63 = vsel %vm1019_vm9, %v961_v49, %v1035_v55  ;;  %v2247_v6 = vsel %vm1062_vm5, %v2227_v60, 0.0 }
 0x236   : > { %v966_v0 = vadd.f32 %v4578_v30, %v965_v62  ;;  %v4635_v1 = vsel %vm1018_vm10, %v956_v52, %v1034_v57  ;;  %1068 = vst.msk [vmem:[%s4586_s13 + $0x28] sm:$0xff] %vm1062_vm5, %v4632_v63  ;;  %v2230_v7 = vmul.f32 %v4632_v63, %v4632_v63  ;;  %v1638_v62 = vld [vmem:[%s4456_s22] sm:$0xff] }
 0x237   : > { %vm1021_vm11 = vcmp.gt.f32.partialorder %v971_v61, 0.0  ;;  %v1037_v2 = vmul.f32 0.01, %v971_v61  ;;  %1067 = vst.msk [vmem:[%s4586_s13 + $0x20] sm:$0xff] %vm1062_vm5, %v4635_v1  ;;  %3715 = vmatprep.mubr.msk.f32.mxu0 %vm1062_vm5, %v4635_v1  ;;  %v2229_v3 = vmul.f32 %v4635_v1, %v4635_v1 }
 0x238   : > { %vm1020_vm12 = vcmp.gt.f32.partialorder %v966_v0, 0.0  ;;  %v1036_v4 = vmul.f32 0.01, %v966_v0  ;;  %v3697_v5 = vpop.f32.mrb[8].mxu1  ;;  %3716 = vmatmul.mubr.msk.f32.gmra.mrb[20].mxu0 %vm1062_vm5, %v4632_v63  ;;  %v2256_v18 = vsel %vm1062_vm5, %v2230_v7, 0.0 }
 0x239   : > { %v981_v8 = vadd.f32 %v3697_v5, %v4578_v30  ;;  %v975_v9 = vpop.f32.mrb[9].mxu1  ;;  %2248 = vadd.xlane.f32.xlu1 %v2247_v6  ;;  %v2253_v10 = vsel %vm1062_vm5, %v2229_v3, 0.0  ;;  %v4654_v11 = vsel %vm1021_vm11, %v971_v61, %v1037_v2  ;;  %v1639_v5 = vld [vmem:[%s4456_s22 + $0x8] sm:$0xff]  ;;  %v1640_v6 = vld [vmem:[%s4456_s22 + $0x10] sm:$0xff] }
 0x23a   : > { %v976_v12 = vadd.f32 %v4578_v30, %v975_v9  ;;  %2254 = vadd.xlane.f32.xlu0 %v2253_v10  ;;  %v4657_v13 = vsel %vm1020_vm12, %v966_v0, %v1036_v4  ;;  %1070 = vst.msk [vmem:[%s4586_s13 + $0x38] sm:$0xff] %vm1062_vm5, %v4654_v11  ;;  %v2232_v19 = vmul.f32 %v4654_v11, %v4654_v11  ;;  %v1642_v9 = vld [vmem:[%s4456_s22 + $0x20] sm:$0xff]  ;;  %v1643_v10 = vld [vmem:[%s4456_s22 + $0x28] sm:$0xff] }
 0x23b   : > { %vm1023_vm13 = vcmp.gt.f32.partialorder %v981_v8, 0.0  ;;  %v1039_v14 = vmul.f32 0.01, %v981_v8  ;;  %1069 = vst.msk [vmem:[%s4586_s13 + $0x30] sm:$0xff] %vm1062_vm5, %v4657_v13  ;;  %3718 = vmatprep.mubr.msk.f32.mxu0 %vm1062_vm5, %v4657_v13  ;;  %v2231_v15 = vmul.f32 %v4657_v13, %v4657_v13 }
 0x23c   : > { %vm1022_vm14 = vcmp.gt.f32.partialorder %v976_v12, 0.0  ;;  %v1038_v16 = vmul.f32 0.01, %v976_v12  ;;  %v3700_v17 = vpop.f32.mrb[10].mxu1  ;;  %3719 = vmatmul.mubr.msk.f32.gmra.mrb[22].mxu0 %vm1062_vm5, %v4654_v11  ;;  %v2262_v31 = vsel %vm1062_vm5, %v2232_v19, 0.0  ;;  %v1650_v19 = vld [vmem:[%s4456_s22 + $0x60] sm:$0xff] }
 0x23d   : > { %v991_v20 = vadd.f32 %v3700_v17, %v4578_v30  ;;  %v985_v21 = vpop.f32.mrb[11].mxu1  ;;  %2257 = vadd.xlane.f32.xlu1 %v2256_v18  ;;  %v2259_v22 = vsel %vm1062_vm5, %v2231_v15, 0.0  ;;  %v4676_v23 = vsel %vm1023_vm13, %v981_v8, %v1039_v14  ;;  %v1641_v8 = vld [vmem:[%s4456_s22 + $0x18] sm:$0xff]  ;;  %v1646_v15 = vld [vmem:[%s4456_s22 + $0x40] sm:$0xff]  ;;  %v1648_v17 = vld [vmem:[%s4456_s22 + $0x50] sm:$0xff] }
 0x23e   : > { %v986_v24 = vadd.f32 %v4578_v30, %v985_v21  ;;  %2260 = vadd.xlane.f32.xlu0 %v2259_v22  ;;  %v4679_v25 = vsel %vm1022_vm14, %v976_v12, %v1038_v16  ;;  %1072 = vst.msk [vmem:[%s4586_s13 + $0x48] sm:$0xff] %vm1062_vm5, %v4676_v23  ;;  %v2234_v32 = vmul.f32 %v4676_v23, %v4676_v23  ;;  %v1644_v12 = vld [vmem:[%s4456_s22 + $0x30] sm:$0xff]  ;;  %v1645_v14 = vld [vmem:[%s4456_s22 + $0x38] sm:$0xff]  ;;  %v1647_v16 = vld [vmem:[%s4456_s22 + $0x48] sm:$0xff] }
 0x23f   : > { %vm1025_vm15 = vcmp.gt.f32.partialorder %v991_v20, 0.0  ;;  %v1041_v27 = vmul.f32 0.01, %v991_v20  ;;  %1071 = vst.msk [vmem:[%s4586_s13 + $0x40] sm:$0xff] %vm1062_vm5, %v4679_v25  ;;  %3721 = vmatprep.mubr.msk.f32.mxu0 %vm1062_vm5, %v4679_v25  ;;  %v2233_v26 = vmul.f32 %v4679_v25, %v4679_v25  ;;  %v1649_v18 = vld [vmem:[%s4456_s22 + $0x58] sm:$0xff]  ;;  %v1652_v21 = vld [vmem:[%s4456_s22 + $0x70] sm:$0xff] }
 0x240   : > { %vm1024_vm1 = vcmp.gt.f32.partialorder %v986_v24, 0.0  ;;  %v1040_v28 = vmul.f32 0.01, %v986_v24  ;;  %v3703_v29 = vpop.f32.mrb[12].mxu1  ;;  %3722 = vmatmul.mubr.msk.f32.gmra.mrb[24].mxu0 %vm1062_vm5, %v4676_v23  ;;  %v2268_v45 = vsel %vm1062_vm5, %v2234_v32, 0.0  ;;  %v1325_v22 = vld [vmem:[%s5323_s20] sm:$0xff] }
 0x241   : > { %v1001_v33 = vadd.f32 %v3703_v29, %v4578_v30  ;;  %v995_v34 = vpop.f32.mrb[13].mxu1  ;;  %2263 = vadd.xlane.f32.xlu1 %v2262_v31  ;;  %v2265_v35 = vsel %vm1062_vm5, %v2233_v26, 0.0  ;;  %v4698_v36 = vsel %vm1025_vm15, %v991_v20, %v1041_v27  ;;  %v1651_v20 = vld [vmem:[%s4456_s22 + $0x68] sm:$0xff]  ;;  %v1653_v26 = vld [vmem:[%s4456_s22 + $0x78] sm:$0xff]  ;;  %v3359_v32 = vld [vmem:[%s5289_s5 + $0x20] sm:$0xff]  ;;  %s5327_s22 = sld [smem:[#allocation14_spill]] }
 0x242   : > { %v996_v37 = vadd.f32 %v4578_v30, %v995_v34  ;;  %2266 = vadd.xlane.f32.xlu0 %v2265_v35  ;;  %v4701_v39 = vsel %vm1024_vm1, %v986_v24, %v1040_v28  ;;  %1074 = vst.msk [vmem:[%s4586_s13 + $0x58] sm:$0xff] %vm1062_vm5, %v4698_v36  ;;  %v2236_v46 = vmul.f32 %v4698_v36, %v4698_v36  ;;  %v1326_v24 = vld [vmem:[%s5324_s10 + $0x8] sm:$0xff]  ;;  %v1327_v28 = vld [vmem:[%s5324_s10 + $0x10] sm:$0xff]  ;;  %v1328_v29 = vld [vmem:[%s5324_s10 + $0x18] sm:$0xff]  ;;  %s5328_s20 = sld [smem:[#allocation13_spill]] }
 0x243   : > { %vm1027_vm2 = vcmp.gt.f32.partialorder %v1001_v33, 0.0  ;;  %v1043_v40 = vmul.f32 0.01, %v1001_v33  ;;  %1073 = vst.msk [vmem:[%s4586_s13 + $0x50] sm:$0xff] %vm1062_vm5, %v4701_v39  ;;  %3724 = vmatprep.mubr.msk.f32.mxu0 %vm1062_vm5, %v4701_v39  ;;  %v2235_v41 = vmul.f32 %v4701_v39, %v4701_v39  ;;  %v3893_v27 = vpack.c.bf16 %v1326_v24, %v1325_v22 }
 0x244   : > { %vm1026_vm4 = vcmp.gt.f32.partialorder %v996_v37, 0.0  ;;  %v1042_v43 = vmul.f32 0.01, %v996_v37  ;;  %v3706_v44 = vpop.f32.mrb[14].mxu1  ;;  %3725 = vmatmul.mubr.msk.f32.gmra.mrb[26].mxu0 %vm1062_vm5, %v4698_v36  ;;  %v2274_v57 = vsel %vm1062_vm5, %v2236_v46, 0.0  ;;  %v3897_v31 = vpack.c.bf16 %v1328_v29, %v1327_v28 }
 0x245   : > { %v1011_v47 = vadd.f32 %v3706_v44, %v4578_v30  ;;  %v1005_v48 = vpop.f32.mrb[15].mxu1  ;;  %2269 = vadd.xlane.f32.xlu1 %v2268_v45  ;;  %v2271_v49 = vsel %vm1062_vm5, %v2235_v41, 0.0  ;;  %v4720_v50 = vsel %vm1027_vm2, %v1001_v33, %v1043_v40  ;;  %3894 = vmatprep.subr.bf16.mxu1 %v3893_v27  ;;  %v3360_v33 = vld [vmem:[%s5289_s5 + $0x28] sm:$0xff] }
 0x246   : > { %v1006_v52 = vadd.f32 %v4578_v30, %v1005_v48  ;;  %2272 = vadd.xlane.f32.xlu0 %v2271_v49  ;;  %v4723_v54 = vsel %vm1026_vm4, %v996_v37, %v1042_v43  ;;  %1076 = vst.msk [vmem:[%s4586_s13 + $0x68] sm:$0xff] %vm1062_vm5, %v4720_v50  ;;  %v2238_v58 = vmul.f32 %v4720_v50, %v4720_v50 }
 0x247   : > { %vm1029_vm6 = vcmp.gt.f32.partialorder %v1011_v47, 0.0  ;;  %v1045_v55 = vmul.f32 0.01, %v1011_v47  ;;  %1075 = vst.msk [vmem:[%s4586_s13 + $0x60] sm:$0xff] %vm1062_vm5, %v4723_v54  ;;  %3727 = vmatprep.mubr.msk.f32.mxu0 %vm1062_vm5, %v4723_v54  ;;  %v2237_v30 = vmul.f32 %v4723_v54, %v4723_v54  ;;  %3896 = vmatpush3.bf16.msra.mxu1 %v3893_v27  ;;  %v4812_v34 = vpack.c.bf16 %v3360_v33, %v3359_v32  ;;  %s5043_s14 = scalar_lea.vmem %s5327_s22, %s4471_s9 }
 0x248   : > { %vm1028_vm7 = vcmp.gt.f32.partialorder %v1006_v52, 0.0  ;;  %v1044_v56 = vmul.f32 0.01, %v1006_v52  ;;  %3728 = vmatmul.mubr.msk.f32.gmra.mrb[28].mxu0 %vm1062_vm5, %v4720_v50  ;;  %v2280_v2 = vsel %vm1062_vm5, %v2238_v58, 0.0  ;;  %3898 = vmatprep.subr.bf16.mxu1 %v3897_v31 }
 0x249   : > { %2275 = vadd.xlane.f32.xlu1 %v2274_v57  ;;  %v2277_v59 = vsel %vm1062_vm5, %v2237_v30, 0.0  ;;  %v4741_v60 = vsel %vm1029_vm6, %v1011_v47, %v1045_v55 }
 0x24a   : > { %2278 = vadd.xlane.f32.xlu0 %v2277_v59  ;;  %v4743_v61 = vsel %vm1028_vm7, %v1006_v52, %v1044_v56  ;;  %1078 = vst.msk [vmem:[%s4586_s13 + $0x78] sm:$0xff] %vm1062_vm5, %v4741_v60  ;;  %v2240_v3 = vmul.f32 %v4741_v60, %v4741_v60 }
 0x24b   : > { %1077 = vst.msk [vmem:[%s4586_s13 + $0x70] sm:$0xff] %vm1062_vm5, %v4743_v61  ;;  %3730 = vmatprep.mubr.msk.f32.mxu0 %vm1062_vm5, %v4743_v61  ;;  %v2239_v0 = vmul.f32 %v4743_v61, %v4743_v61  ;;  %3900 = vmatpush3.bf16.msra.mxu1 %v3897_v31 }
 0x24c   : > { %3731 = vmatmul.mubr.msk.f32.gmra.mrb[30].mxu0 %vm1062_vm5, %v4741_v60  ;;  %v2286_v7 = vsel %vm1062_vm5, %v2240_v3, 0.0  ;;  %3906 = vmatprep.subr.bf16.mxu1 %v4812_v34 }
 0x24d   : > { %2281 = vadd.xlane.f32.xlu1 %v2280_v2  ;;  %v2283_v4 = vsel %vm1062_vm5, %v2239_v0, 0.0  ;;  %3769 = vmatprep.mubr.msk.f32.mxu0 %vm574_vm0, %v1638_v62 }
 0x24e   : > { %2284 = vadd.xlane.f32.xlu0 %v2283_v4 }
 0x250   : > { %3770 = vmatmul.mubr.msk.f32.vlgmr.msra.gmra.mrb[32].mxu0 %vm574_vm0, %v1639_v5 }
 0x251   : > { %2287 = vadd.xlane.f32.xlu1 %v2286_v7  ;;  %3772 = vmatprep.mubr.msk.f32.mxu0 %vm574_vm0, %v1640_v6 }
 0x254   : > { %3773 = vmatmul.mubr.msk.f32.gmra.mrb[34].mxu0 %vm574_vm0, %v1641_v8 }
 0x255   : > { %3775 = vmatprep.mubr.msk.f32.mxu0 %vm574_vm0, %v1642_v9 }
 0x258   : > { %3776 = vmatmul.mubr.msk.f32.gmra.mrb[36].mxu0 %vm574_vm0, %v1643_v10 }
 0x259   : > { %3778 = vmatprep.mubr.msk.f32.mxu0 %vm574_vm0, %v1644_v12 }
 0x25c   : > { %3779 = vmatmul.mubr.msk.f32.gmra.mrb[38].mxu0 %vm574_vm0, %v1645_v14 }
 0x25d   : > { %3781 = vmatprep.mubr.msk.f32.mxu0 %vm574_vm0, %v1646_v15 }
 0x260   : > { %3782 = vmatmul.mubr.msk.f32.gmra.mrb[40].mxu0 %vm574_vm0, %v1647_v16 }
 0x261   : > { %3784 = vmatprep.mubr.msk.f32.mxu0 %vm574_vm0, %v1648_v17 }
 0x264   : > { %3785 = vmatmul.mubr.msk.f32.gmra.mrb[42].mxu0 %vm574_vm0, %v1649_v18 }
 0x265   : > { %3787 = vmatprep.mubr.msk.f32.mxu0 %vm574_vm0, %v1650_v19 }
 0x268   : > { %3788 = vmatmul.mubr.msk.f32.gmra.mrb[44].mxu0 %vm574_vm0, %v1651_v20 }
 0x269   : > { %3790 = vmatprep.mubr.msk.f32.mxu0 %vm574_vm0, %v1652_v21 }
 0x26c   : > { %3791 = vmatmul.mubr.msk.f32.gmra.mrb[46].mxu0 %vm574_vm0, %v1653_v26 }
 0x2be   : > { %v2246_v35 = vpop.xlane.xlu0 %2245 }
 0x2bf   : > { %v2290_v37 = vmax.f32 %v2246_v35, 1e-24 }
 0x2c1   : > { %4029 = vrsqrt.f32 %v2290_v37 }
 0x2c2   : > { %v4815_v40 = vpop.xlane.xlu1 %2251  ;;  %v2243_v41 = vpop.xlane.xlu0 %2242 }
 0x2c3   : > { %v2289_v43 = vmax.f32 %v2243_v41, 1e-24  ;;  %v2292_v37 = vmax.f32 %v4815_v40, 1e-24  ;;  %v3362_v40 = vld [vmem:[%s5289_s5 + $0x38] sm:$0xff] }
 0x2c5   : > { %4031 = vrsqrt.f32 %v2289_v43 }
 0x2c6   : > { %v4817_v44 = vpop.xlane.xlu1 %2248 }
 0x2c7   : > { %v2255_v45 = vpop.xlane.xlu0 %2254 }
 0x2c8   : > { %v2293_v46 = vmax.f32 %v2255_v45, 1e-24 }
 0x2ca   : > { %v2258_v47 = vpop.xlane.xlu1 %2257  ;;  %4033 = vrsqrt.f32 %v2293_v46 }
 0x2cb   : > { %v2294_v48 = vmax.f32 %v2258_v47, 1e-24  ;;  %v2261_v49 = vpop.xlane.xlu0 %2260  ;;  %v4030_v55 = vpop.eup %4029 }
 0x2cc   : > { %v2295_v52 = vmax.f32 %v2261_v49, 1e-24  ;;  %v2322_v0 = vmul.f32 %v4030_v55, %v4588_v38 }
 0x2cd   : > { %4035 = vrsqrt.f32 %v2294_v48 }
 0x2ce   : > { %v2264_v30 = vpop.xlane.xlu1 %2263  ;;  %4037 = vrsqrt.f32 %v2295_v52 }
 0x2cf   : > { %v2296_v56 = vmax.f32 %v2264_v30, 1e-24  ;;  %v2267_v57 = vpop.xlane.xlu0 %2266  ;;  %v4032_v58 = vpop.eup %4031 }
 0x2d0   : > { %v2297_v59 = vmax.f32 %v2267_v57, 1e-24  ;;  %v2321_v62 = vmul.f32 %v4032_v58, %v4595_v42 }
 0x2d1   : > { %4039 = vrsqrt.f32 %v2296_v56 }
 0x2d2   : > { %v2270_v2 = vpop.xlane.xlu1 %2269  ;;  %4041 = vrsqrt.f32 %v2297_v59  ;;  %3829 = vmatprep.mubr.msk.f32.mxu0 %vm1062_vm5, %v2321_v62  ;;  %v3913_v6 = vpack.c.bf16 %v2322_v0, %v2321_v62 }
 0x2d3   : > { %v2298_v4 = vmax.f32 %v2270_v2, 1e-24  ;;  %v2273_v5 = vpop.xlane.xlu0 %2272 }
 0x2d4   : > { %v2299_v7 = vmax.f32 %v2273_v5, 1e-24  ;;  %v4034_v8 = vpop.eup %4033  ;;  %3915 = vmatprep.subr.msk.bf16.mxu0 %vm4823_vm8, %v3913_v6 }
 0x2d5   : > { %4043 = vrsqrt.f32 %v2298_v4  ;;  %3918 = vmatpush3.bf16.xpose.msk.msra.mxu0 %vm4823_vm8, %v3913_v6  ;;  %v2325_v14 = vmul.f32 %v4034_v8, %v4635_v1 }
 0x2d6   : > { %v2276_v38 = vpop.xlane.xlu1 %2275  ;;  %4045 = vrsqrt.f32 %v2299_v7 }
 0x2d7   : > { %v4036_v42 = vpop.eup %4035  ;;  %v2300_v9 = vmax.f32 %v2276_v38, 1e-24  ;;  %v2279_v10 = vpop.xlane.xlu0 %2278 }
 0x2d8   : > { %v2301_v12 = vmax.f32 %v2279_v10, 1e-24  ;;  %v2326_v15 = vmul.f32 %v4036_v42, %v4632_v63  ;;  %v4038_v16 = vpop.eup %4037 }
 0x2d9   : > { %4047 = vrsqrt.f32 %v2300_v9  ;;  %v4837_v21 = vmul.f32 %v4038_v16, %v4657_v13 }
 0x2da   : > { %v2282_v17 = vpop.xlane.xlu1 %2281  ;;  %v3925_v18 = vpack.c.bf16 %v2326_v15, %v2325_v14  ;;  %4049 = vrsqrt.f32 %v2301_v12 }
 0x2db   : > { %v4040_v19 = vpop.eup %4039  ;;  %v2302_v20 = vmax.f32 %v2282_v17, 1e-24 }
 0x2dc   : > { %3927 = vmatprep.subr.msk.bf16.mxu0 %vm4823_vm8, %v3925_v18  ;;  %v4840_v22 = vmul.f32 %v4040_v19, %v4654_v11  ;;  %v4042_v24 = vpop.eup %4041  ;;  %3830 = vmatmul.mubr.msk.f32.vlgmr.msra.gmra.mrb[48].mxu0 %vm1062_vm5, %v2322_v0 }
 0x2dd   : > { %4051 = vrsqrt.f32 %v2302_v20  ;;  %3930 = vmatpush3.bf16.xpose.msk.msra.mxu0 %vm4823_vm8, %v3925_v18  ;;  %3843 = vmatprep.mubr.msk.f32.mxu0 %vm1062_vm5, %v2325_v14  ;;  %v2329_v13 = vmul.f32 %v4042_v24, %v4679_v25 }
 0x2de   : > { %v4848_v63 = vpack.c.bf16 %v4840_v22, %v4837_v21 }
 0x2df   : > { %v4044_v1 = vpop.eup %4043 }
 0x2e0   : > { %v2330_v27 = vmul.f32 %v4044_v1, %v4676_v23  ;;  %v4046_v11 = vpop.eup %4045 }
 0x2e1   : > { %v4855_v29 = vmul.f32 %v4046_v11, %v4701_v39 }
 0x2e2   : > { %v3937_v26 = vpack.c.bf16 %v2330_v27, %v2329_v13 }
 0x2e3   : > { %v4048_v28 = vpop.eup %4047 }
 0x2e4   : > { %3939 = vmatprep.subr.msk.bf16.mxu0 %vm4823_vm8, %v3937_v26  ;;  %v4858_v31 = vmul.f32 %v4048_v28, %v4698_v36  ;;  %v4050_v32 = vpop.eup %4049  ;;  %3844 = vmatmul.mubr.msk.f32.vlgmr.msra.gmra.mrb[50].mxu0 %vm1062_vm5, %v2326_v15  ;;  %v2291_v36 = vmax.f32 %v4817_v44, 1e-24  ;;  %v3361_v44 = vld [vmem:[%s5289_s5 + $0x30] sm:$0xff] }
 0x2e5   : > { %3942 = vmatpush3.bf16.xpose.msk.msra.mxu0 %vm4823_vm8, %v3937_v26  ;;  %3857 = vmatprep.mubr.msk.f32.mxu0 %vm1062_vm5, %v2329_v13  ;;  %v2333_v33 = vmul.f32 %v4050_v32, %v4723_v54  ;;  %v3909_v57 = vpack.c.bf16 %v3362_v40, %v3361_v44 }
 0x2e6   : > { %v4866_v23 = vpack.c.bf16 %v4858_v31, %v4855_v29  ;;  %4053 = vrsqrt.f32 %v2291_v36 }
 0x2e7   : > { %v4052_v25 = vpop.eup %4051  ;;  %4055 = vrsqrt.f32 %v2292_v37 }
 0x2e8   : > { %v2334_v39 = vmul.f32 %v4052_v25, %v4720_v50  ;;  %v4882_v50 = vld [vmem:[%s5292_s8 + $0x4] ss:$0 sm:$0xff] }
 0x2ea   : > { %v3949_v35 = vpack.c.bf16 %v2334_v39, %v2333_v33 }
 0x2ec   : > { %3951 = vmatprep.subr.msk.bf16.mxu0 %vm4823_vm8, %v3949_v35  ;;  %3858 = vmatmul.mubr.msk.f32.vlgmr.msra.gmra.mrb[52].mxu0 %vm1062_vm5, %v2330_v27 }
 0x2ed   : > { %3954 = vmatpush3.bf16.xpose.msk.msra.mxu0 %vm4823_vm8, %v3949_v35  ;;  %3871 = vmatprep.mubr.msk.f32.mxu0 %vm1062_vm5, %v2333_v33 }
 0x2f0   : > { %v4054_v49 = vpop.eup %4053 }
 0x2f1   : > { %v4056_v58 = vpop.eup %4055  ;;  %v4897_v4 = vmul.f32 %v4054_v49, %v4613_v53 }
 0x2f2   : > { %v4903_v38 = vmul.f32 %v4056_v58, %v4610_v51 }
 0x2f4   : > { %3872 = vmatmul.mubr.msk.f32.vlgmr.msra.gmra.mrb[54].mxu0 %vm1062_vm5, %v2334_v39 }
 0x303   : > { %v3711_v54 = vpop.f32.mrb[16].mxu0 }
 0x304   : > { %v1204_v41 = vadd.f32 %v3711_v54, %v4882_v50  ;;  %v1198_v43 = vpop.f32.mrb[17].mxu0 }
 0x305   : > { %v1199_v45 = vadd.f32 %v4882_v50, %v1198_v43 }
 0x306   : > { %v1294_v46 = vmul.f32 0.01, %v1204_v41  ;;  %vm1278_vm9 = vcmp.gt.f32.partialorder %v1204_v41, 0.0 }
 0x307   : > { %vm1277_vm10 = vcmp.gt.f32.partialorder %v1199_v45, 0.0  ;;  %v1293_v47 = vmul.f32 0.01, %v1199_v45  ;;  %v3714_v48 = vpop.f32.mrb[18].mxu0 }
 0x308   : > { %v1214_v52 = vadd.f32 %v3714_v48, %v4882_v50  ;;  %v1208_v55 = vpop.f32.mrb[19].mxu0  ;;  %v1310_v59 = vsel %vm1278_vm9, %v1204_v41, %v1294_v46 }
 0x309   : > { %v1209_v30 = vadd.f32 %v4882_v50, %v1208_v55  ;;  %v1309_v56 = vsel %vm1277_vm10, %v1199_v45, %v1293_v47 }
 0x30a   : > { %v1296_v62 = vmul.f32 0.01, %v1214_v52  ;;  %3741 = vmatprep.mubr.msk.f32.mxu1 %vm820_vm3, %v1309_v56  ;;  %vm1280_vm11 = vcmp.gt.f32.partialorder %v1214_v52, 0.0  ;;  %v4935_v56 = vld [vmem:[%s5292_s8 + $0x2] ss:$0 sm:$0xff] }
 0x30b   : > { %vm1279_vm12 = vcmp.gt.f32.partialorder %v1209_v30, 0.0  ;;  %v1295_v0 = vmul.f32 0.01, %v1209_v30  ;;  %v3717_v2 = vpop.f32.mrb[20].mxu0  ;;  %3742 = vmatmul.mubr.msk.f32.vlgmr.msra.gmra.mrb[16].mxu1 %vm820_vm3, %v1310_v59 }
 0x30c   : > { %v1224_v5 = vadd.f32 %v3717_v2, %v4882_v50  ;;  %3908 = vmatpush3.bf16.msra.mxu1 %v4812_v34  ;;  %v1218_v6 = vpop.f32.mrb[21].mxu0  ;;  %v1312_v9 = vsel %vm1280_vm11, %v1214_v52, %v1296_v62  ;;  %v4909_v34 = vpack.c.bf16 %v4903_v38, %v4897_v4 }
 0x30d   : > { %v1219_v7 = vadd.f32 %v4882_v50, %v1218_v6  ;;  %v1311_v8 = vsel %vm1279_vm12, %v1209_v30, %v1295_v0  ;;  %3910 = vmatprep.subr.bf16.mxu1 %v3909_v57 }
 0x30e   : > { %v1298_v42 = vmul.f32 0.01, %v1224_v5  ;;  %3744 = vmatprep.mubr.msk.f32.mxu1 %vm820_vm3, %v1311_v8  ;;  %vm1282_vm13 = vcmp.gt.f32.partialorder %v1224_v5, 0.0 }
 0x30f   : > { %vm1281_vm14 = vcmp.gt.f32.partialorder %v1219_v7, 0.0  ;;  %v1297_v53 = vmul.f32 0.01, %v1219_v7  ;;  %v3720_v10 = vpop.f32.mrb[22].mxu0  ;;  %3745 = vmatmul.mubr.msk.f32.gmra.mrb[18].mxu1 %vm820_vm3, %v1312_v9 }
 0x310   : > { %v1234_v12 = vadd.f32 %v3720_v10, %v4882_v50  ;;  %3912 = vmatpush3.bf16.msra.mxu1 %v3909_v57  ;;  %v1228_v14 = vpop.f32.mrb[23].mxu0  ;;  %v1314_v17 = vsel %vm1282_vm13, %v1224_v5, %v1298_v42 }
 0x311   : > { %v1229_v51 = vadd.f32 %v4882_v50, %v1228_v14  ;;  %3921 = vmatprep.subr.msk.bf16.mxu1 %vm4823_vm8, %v4909_v34  ;;  %v1313_v15 = vsel %vm1281_vm14, %v1219_v7, %v1297_v53 }
 0x312   : > { %v1300_v16 = vmul.f32 0.01, %v1234_v12  ;;  %3747 = vmatprep.mubr.msk.f32.mxu1 %vm820_vm3, %v1313_v15  ;;  %vm1284_vm15 = vcmp.gt.f32.partialorder %v1234_v12, 0.0 }
 0x313   : > { %vm1283_vm1 = vcmp.gt.f32.partialorder %v1229_v51, 0.0  ;;  %v1299_v18 = vmul.f32 0.01, %v1229_v51  ;;  %v3723_v19 = vpop.f32.mrb[24].mxu0  ;;  %3748 = vmatmul.mubr.msk.f32.gmra.mrb[20].mxu1 %vm820_vm3, %v1314_v17 }
 0x314   : > { %v1244_v20 = vadd.f32 %v3723_v19, %v4882_v50  ;;  %v1238_v24 = vpop.f32.mrb[25].mxu0  ;;  %v1316_v11 = vsel %vm1284_vm15, %v1234_v12, %v1300_v16 }
 0x315   : > { %v1239_v1 = vadd.f32 %v4882_v50, %v1238_v24  ;;  %v1315_v13 = vsel %vm1283_vm1, %v1229_v51, %v1299_v18 }
 0x316   : > { %v1302_v27 = vmul.f32 0.01, %v1244_v20  ;;  %3750 = vmatprep.mubr.msk.f32.mxu1 %vm820_vm3, %v1315_v13  ;;  %vm1286_vm2 = vcmp.gt.f32.partialorder %v1244_v20, 0.0 }
 0x317   : > { %vm1285_vm4 = vcmp.gt.f32.partialorder %v1239_v1, 0.0  ;;  %v1301_v26 = vmul.f32 0.01, %v1239_v1  ;;  %v3726_v28 = vpop.f32.mrb[26].mxu0  ;;  %3751 = vmatmul.mubr.msk.f32.gmra.mrb[22].mxu1 %vm820_vm3, %v1316_v11 }
 0x318   : > { %v1254_v32 = vadd.f32 %v3726_v28, %v4882_v50  ;;  %v1248_v25 = vpop.f32.mrb[27].mxu0  ;;  %v1318_v36 = vsel %vm1286_vm2, %v1244_v20, %v1302_v27 }
 0x319   : > { %v1249_v33 = vadd.f32 %v4882_v50, %v1248_v25  ;;  %v1317_v39 = vsel %vm1285_vm4, %v1239_v1, %v1301_v26 }
 0x31a   : > { %v1304_v35 = vmul.f32 0.01, %v1254_v32  ;;  %3753 = vmatprep.mubr.msk.f32.mxu1 %vm820_vm3, %v1317_v39  ;;  %vm1288_vm6 = vcmp.gt.f32.partialorder %v1254_v32, 0.0 }
 0x31b   : > { %vm1287_vm7 = vcmp.gt.f32.partialorder %v1249_v33, 0.0  ;;  %v1303_v37 = vmul.f32 0.01, %v1249_v33  ;;  %v3729_v54 = vpop.f32.mrb[28].mxu0  ;;  %3754 = vmatmul.mubr.msk.f32.gmra.mrb[24].mxu1 %vm820_vm3, %v1318_v36 }
 0x31c   : > { %v1264_v41 = vadd.f32 %v3729_v54, %v4882_v50  ;;  %v1258_v43 = vpop.f32.mrb[29].mxu0  ;;  %v1320_v40 = vsel %vm1288_vm6, %v1254_v32, %v1304_v35 }
 0x31d   : > { %v1259_v45 = vadd.f32 %v4882_v50, %v1258_v43  ;;  %v1319_v46 = vsel %vm1287_vm7, %v1249_v33, %v1303_v37 }
 0x31e   : > { %v1306_v44 = vmul.f32 0.01, %v1264_v41  ;;  %3756 = vmatprep.mubr.msk.f32.mxu1 %vm820_vm3, %v1319_v46  ;;  %vm1290_vm9 = vcmp.gt.f32.partialorder %v1264_v41, 0.0 }
 0x31f   : > { %vm1289_vm10 = vcmp.gt.f32.partialorder %v1259_v45, 0.0  ;;  %v1305_v47 = vmul.f32 0.01, %v1259_v45  ;;  %v3732_v48 = vpop.f32.mrb[30].mxu0  ;;  %3757 = vmatmul.mubr.msk.f32.gmra.mrb[26].mxu1 %vm820_vm3, %v1320_v40 }
 0x320   : > { %v1274_v49 = vadd.f32 %v3732_v48, %v4882_v50  ;;  %v1268_v52 = vpop.f32.mrb[31].mxu0  ;;  %v1322_v58 = vsel %vm1290_vm9, %v1264_v41, %v1306_v44 }
 0x321   : > { %v1269_v55 = vadd.f32 %v4882_v50, %v1268_v52  ;;  %v1321_v30 = vsel %vm1289_vm10, %v1259_v45, %v1305_v47 }
 0x322   : > { %v1308_v57 = vmul.f32 0.01, %v1274_v49  ;;  %3759 = vmatprep.mubr.msk.f32.mxu1 %vm820_vm3, %v1321_v30  ;;  %vm1292_vm11 = vcmp.gt.f32.partialorder %v1274_v49, 0.0 }
 0x323   : > { %vm1291_vm12 = vcmp.gt.f32.partialorder %v1269_v55, 0.0  ;;  %v1307_v59 = vmul.f32 0.01, %v1269_v55  ;;  %3760 = vmatmul.mubr.msk.f32.gmra.mrb[28].mxu1 %vm820_vm3, %v1322_v58  ;;  %v3771_v62 = vpop.f32.mrb[32].mxu0 }
 0x324   : > { %v1778_v0 = vadd.f32 %v3771_v62, %v4935_v56  ;;  %v1772_v2 = vpop.f32.mrb[33].mxu0  ;;  %v1324_v7 = vsel %vm1292_vm11, %v1274_v49, %v1308_v57  ;;  %v2285_v62 = vpop.xlane.xlu0 %2284 }
 0x325   : > { %v1773_v50 = vadd.f32 %v4935_v56, %v1772_v2  ;;  %v1323_v5 = vsel %vm1291_vm12, %v1269_v55, %v1307_v59  ;;  %v2288_v55 = vpop.xlane.xlu1 %2287 }
 0x326   : > { %v1868_v6 = vmul.f32 0.01, %v1778_v0  ;;  %3762 = vmatprep.mubr.msk.f32.mxu1 %vm820_vm3, %v1323_v5  ;;  %vm1852_vm13 = vcmp.gt.f32.partialorder %v1778_v0, 0.0 }
 0x327   : > { %vm1851_vm14 = vcmp.gt.f32.partialorder %v1773_v50, 0.0  ;;  %v1867_v8 = vmul.f32 0.01, %v1773_v50  ;;  %3763 = vmatmul.mubr.msk.f32.gmra.mrb[30].mxu1 %vm820_vm3, %v1324_v7  ;;  %v3774_v42 = vpop.f32.mrb[34].mxu0 }
 0x328   : > { %v1788_v9 = vadd.f32 %v3774_v42, %v4935_v56  ;;  %v1782_v53 = vpop.f32.mrb[35].mxu0  ;;  %v1884_v14 = vsel %vm1852_vm13, %v1778_v0, %v1868_v6  ;;  %v2303_v42 = vmax.f32 %v2285_v62, 1e-24 }
 0x329   : > { %v1783_v10 = vadd.f32 %v4935_v56, %v1782_v53  ;;  %v1883_v12 = vsel %vm1851_vm14, %v1773_v50, %v1867_v8  ;;  %v2304_v50 = vmax.f32 %v2288_v55, 1e-24  ;;  %v2349_v55 = vld [vmem:[%s5009_s7 + $0x60] sm:$0xff] }
 0x32a   : > { %v1870_v51 = vmul.f32 0.01, %v1788_v9  ;;  %3801 = vmatprep.mubr.msk.f32.mxu1 %vm820_vm3, %v1883_v12  ;;  %vm1854_vm15 = vcmp.gt.f32.partialorder %v1788_v9, 0.0 }
 0x32b   : > { %vm1853_vm1 = vcmp.gt.f32.partialorder %v1783_v10, 0.0  ;;  %v1869_v15 = vmul.f32 0.01, %v1783_v10  ;;  %v3777_v16 = vpop.f32.mrb[36].mxu0  ;;  %3802 = vmatmul.mubr.msk.f32.vlgmr.msra.gmra.mrb[32].mxu1 %vm820_vm3, %v1884_v14  ;;  %4057 = vrsqrt.f32 %v2304_v50  ;;  %v5030_v50 = vld [vmem:[%s5292_s8 + $0x5] ss:$0 sm:$0xff] }
 0x32c   : > { %v1798_v17 = vadd.f32 %v3777_v16, %v4935_v56  ;;  %3924 = vmatpush3.bf16.xpose.msk.msra.mxu1 %vm4823_vm8, %v4909_v34  ;;  %v1792_v18 = vpop.f32.mrb[37].mxu0  ;;  %v1886_v1 = vsel %vm1854_vm15, %v1788_v9, %v1870_v51  ;;  %4059 = vrsqrt.f32 %v2303_v42 }
 0x32d   : > { %v1793_v19 = vadd.f32 %v4935_v56, %v1792_v18  ;;  %3933 = vmatprep.subr.msk.bf16.mxu1 %vm4823_vm8, %v4848_v63  ;;  %v1885_v20 = vsel %vm1853_vm1, %v1783_v10, %v1869_v15 }
 0x32e   : > { %v1872_v24 = vmul.f32 0.01, %v1798_v17  ;;  %3804 = vmatprep.mubr.msk.f32.mxu1 %vm820_vm3, %v1885_v20  ;;  %vm1856_vm2 = vcmp.gt.f32.partialorder %v1798_v17, 0.0 }
 0x32f   : > { %vm1855_vm4 = vcmp.gt.f32.partialorder %v1793_v19, 0.0  ;;  %v1871_v13 = vmul.f32 0.01, %v1793_v19  ;;  %v3780_v27 = vpop.f32.mrb[38].mxu0  ;;  %3805 = vmatmul.mubr.msk.f32.gmra.mrb[34].mxu1 %vm820_vm3, %v1886_v1  ;;  %v2342_v1 = vld [vmem:[%s5009_s7 + $0x28] sm:$0xff] }
 0x330   : > { %v1808_v34 = vadd.f32 %v3780_v27, %v4935_v56  ;;  %v1802_v11 = vpop.f32.mrb[39].mxu0  ;;  %v1888_v25 = vsel %vm1856_vm2, %v1798_v17, %v1872_v24 }
 0x331   : > { %v1803_v26 = vadd.f32 %v4935_v56, %v1802_v11  ;;  %v1887_v28 = vsel %vm1855_vm4, %v1793_v19, %v1871_v13 }
 0x332   : > { %v1874_v32 = vmul.f32 0.01, %v1808_v34  ;;  %3807 = vmatprep.mubr.msk.f32.mxu1 %vm820_vm3, %v1887_v28  ;;  %vm1858_vm6 = vcmp.gt.f32.partialorder %v1808_v34, 0.0 }
 0x333   : > { %vm1857_vm7 = vcmp.gt.f32.partialorder %v1803_v26, 0.0  ;;  %v1873_v33 = vmul.f32 0.01, %v1803_v26  ;;  %v3783_v39 = vpop.f32.mrb[40].mxu0  ;;  %3808 = vmatmul.mubr.msk.f32.gmra.mrb[36].mxu1 %vm820_vm3, %v1888_v25 }
 0x334   : > { %v1818_v35 = vadd.f32 %v3783_v39, %v4935_v56  ;;  %v1812_v36 = vpop.f32.mrb[41].mxu0  ;;  %v1890_v43 = vsel %vm1858_vm6, %v1808_v34, %v1874_v32  ;;  %v2341_v34 = vld [vmem:[%s5009_s7 + $0x20] sm:$0xff] }
 0x335   : > { %v1813_v37 = vadd.f32 %v4935_v56, %v1812_v36  ;;  %v1889_v54 = vsel %vm1857_vm7, %v1803_v26, %v1873_v33 }
 0x336   : > { %v1876_v41 = vmul.f32 0.01, %v1818_v35  ;;  %3810 = vmatprep.mubr.msk.f32.mxu1 %vm820_vm3, %v1889_v54  ;;  %vm1860_vm9 = vcmp.gt.f32.partialorder %v1818_v35, 0.0  ;;  %v2345_v54 = vld [vmem:[%s5009_s7 + $0x40] sm:$0xff] }
 0x337   : > { %vm1859_vm10 = vcmp.gt.f32.partialorder %v1813_v37, 0.0  ;;  %v1875_v45 = vmul.f32 0.01, %v1813_v37  ;;  %v3786_v46 = vpop.f32.mrb[42].mxu0  ;;  %3811 = vmatmul.mubr.msk.f32.gmra.mrb[38].mxu1 %vm820_vm3, %v1890_v43 }
 0x338   : > { %v1828_v44 = vadd.f32 %v3786_v46, %v4935_v56  ;;  %v1822_v40 = vpop.f32.mrb[43].mxu0  ;;  %v1892_v52 = vsel %vm1860_vm9, %v1818_v35, %v1876_v41  ;;  %v2346_v35 = vld [vmem:[%s5009_s7 + $0x48] sm:$0xff] }
 0x339   : > { %v1823_v47 = vadd.f32 %v4935_v56, %v1822_v40  ;;  %v1891_v48 = vsel %vm1859_vm10, %v1813_v37, %v1875_v45 }
 0x33a   : > { %v1878_v49 = vmul.f32 0.01, %v1828_v44  ;;  %3813 = vmatprep.mubr.msk.f32.mxu1 %vm820_vm3, %v1891_v48  ;;  %vm1862_vm11 = vcmp.gt.f32.partialorder %v1828_v44, 0.0  ;;  %v2350_v48 = vld [vmem:[%s5009_s7 + $0x68] sm:$0xff] }
 0x33b   : > { %vm1861_vm12 = vcmp.gt.f32.partialorder %v1823_v47, 0.0  ;;  %v1877_v30 = vmul.f32 0.01, %v1823_v47  ;;  %v3789_v57 = vpop.f32.mrb[44].mxu0  ;;  %3814 = vmatmul.mubr.msk.f32.gmra.mrb[40].mxu1 %vm820_vm3, %v1892_v52 }
 0x33c   : > { %v1838_v58 = vadd.f32 %v3789_v57, %v4935_v56  ;;  %v1832_v59 = vpop.f32.mrb[45].mxu0  ;;  %v1894_v6 = vsel %vm1862_vm11, %v1828_v44, %v1878_v49 }
 0x33d   : > { %v1833_v0 = vadd.f32 %v4935_v56, %v1832_v59  ;;  %v1893_v2 = vsel %vm1861_vm12, %v1823_v47, %v1877_v30 }
 0x33e   : > { %v1880_v5 = vmul.f32 0.01, %v1838_v58  ;;  %3816 = vmatprep.mubr.msk.f32.mxu1 %vm820_vm3, %v1893_v2  ;;  %vm1864_vm13 = vcmp.gt.f32.partialorder %v1838_v58, 0.0 }
 0x33f   : > { %vm1863_vm14 = vcmp.gt.f32.partialorder %v1833_v0, 0.0  ;;  %v1879_v7 = vmul.f32 0.01, %v1833_v0  ;;  %v3792_v8 = vpop.f32.mrb[46].mxu0  ;;  %3817 = vmatmul.mubr.msk.f32.gmra.mrb[42].mxu1 %vm820_vm3, %v1894_v6 }
 0x340   : > { %v1848_v9 = vadd.f32 %v3792_v8, %v4935_v56  ;;  %v1842_v53 = vpop.f32.mrb[47].mxu0  ;;  %v1896_v51 = vsel %vm1864_vm13, %v1838_v58, %v1880_v5 }
 0x341   : > { %v1843_v10 = vadd.f32 %v4935_v56, %v1842_v53  ;;  %v1895_v12 = vsel %vm1863_vm14, %v1833_v0, %v1879_v7  ;;  %v4058_v56 = vpop.eup %4057 }
 0x342   : > { %v1882_v14 = vmul.f32 0.01, %v1848_v9  ;;  %3819 = vmatprep.mubr.msk.f32.mxu1 %vm820_vm3, %v1895_v12  ;;  %vm1866_vm15 = vcmp.gt.f32.partialorder %v1848_v9, 0.0  ;;  %v4060_v18 = vpop.eup %4059  ;;  %v2336_v19 = vmul.f32 %v4058_v56, %v4741_v60  ;;  %v2338_v60 = vld [vmem:[%s5009_s7 + $0x8] sm:$0xff]  ;;  %v1590_v56 = vld [vmem:[%s4464_s16] sm:$0xff] }
 0x343   : > { %vm1865_vm1 = vcmp.gt.f32.partialorder %v1843_v10, 0.0  ;;  %v1881_v15 = vmul.f32 0.01, %v1843_v10  ;;  %3820 = vmatmul.mubr.msk.f32.gmra.mrb[44].mxu1 %vm820_vm3, %v1896_v51  ;;  %v1591_v12 = vld [vmem:[%s4464_s16 + $0x8] sm:$0xff] }
 0x344   : > { %v1898_v17 = vsel %vm1866_vm15, %v1848_v9, %v1882_v14 }
 0x345   : > { %v1897_v16 = vsel %vm1865_vm1, %v1843_v10, %v1881_v15  ;;  %v4061_v15 = vld [vmem:[%s4477_s29 + $0x8] sm:$0xff] }
 0x346   : > { %3822 = vmatprep.mubr.msk.f32.mxu1 %vm820_vm3, %v1897_v16 }
 0x347   : > { %3823 = vmatmul.mubr.msk.f32.gmra.mrb[46].mxu1 %vm820_vm3, %v1898_v17 }
 0x348   : > { %3836 = vmatprep.mubr.msk.f32.mxu1 %vm1062_vm5, %v4897_v4  ;;  %v2335_v4 = vmul.f32 %v4060_v18, %v4743_v61 }
 0x34b   : > { %3837 = vmatmul.mubr.msk.f32.vlgmr.msra.gmra.mrb[48].mxu1 %vm1062_vm5, %v4903_v38  ;;  %v3955_v38 = vpack.c.bf16 %v2336_v19, %v2335_v4 }
 0x34c   : > { %3936 = vmatpush3.bf16.xpose.msk.msra.mxu1 %vm4823_vm8, %v4848_v63  ;;  %3850 = vmatprep.mubr.msk.f32.mxu1 %vm1062_vm5, %v4837_v21 }
 0x34d   : > { %3945 = vmatprep.subr.msk.bf16.mxu1 %vm4823_vm8, %v4866_v23 }
 0x353   : > { %3851 = vmatmul.mubr.msk.f32.vlgmr.msra.gmra.mrb[50].mxu1 %vm1062_vm5, %v4840_v22  ;;  %v2337_v22 = vld [vmem:[%s5009_s7] sm:$0xff] }
 0x354   : > { %3948 = vmatpush3.bf16.xpose.msk.msra.mxu1 %vm4823_vm8, %v4866_v23  ;;  %3864 = vmatprep.mubr.msk.f32.mxu1 %vm1062_vm5, %v4855_v29 }
 0x355   : > { %3957 = vmatprep.subr.msk.bf16.mxu1 %vm4823_vm8, %v3955_v38 }
 0x35b   : > { %3865 = vmatmul.mubr.msk.f32.vlgmr.msra.gmra.mrb[52].mxu1 %vm1062_vm5, %v4858_v31 }
 0x35c   : > { %3960 = vmatpush3.bf16.xpose.msk.msra.mxu1 %vm4823_vm8, %v3955_v38  ;;  %3878 = vmatprep.mubr.msk.f32.mxu1 %vm1062_vm5, %v2335_v4 }
 0x363   : > { %3879 = vmatmul.mubr.msk.f32.vlgmr.msra.gmra.mrb[54].mxu1 %vm1062_vm5, %v2336_v19  ;;  %v4062_v19 = vld [vmem:[%s4477_s29] sm:$0xff] }
 0x3af   : > { %v3831_v61 = vpop.f32.mrb[48].mxu0 }
 0x3b0   : > { %v2435_v21 = vsub.f32 1.0, %v3831_v61  ;;  %v2425_v63 = vpop.f32.mrb[49].mxu0 }
 0x3b1   : > { %v2434_v29 = vsub.f32 1.0, %v2425_v63 }
 0x3b2   : > { %v2437_v31 = vmul.f32 %v2435_v21, %v2338_v60 }
 0x3b3   : > { %v2436_v23 = vmul.f32 %v2434_v29, %v2337_v22  ;;  %v1593_v29 = vld [vmem:[%s4464_s16 + $0x18] sm:$0xff] }
 0x3b4   : > { %v2439_v3 = vsel %vm574_vm0, %v2437_v31, 0.0 }
 0x3b5   : > { %v2438_v20 = vsel %vm574_vm0, %v2436_v23, 0.0 }
 0x3b6   : > { %v2440_v24 = vadd.f32 %v2439_v3, %v2438_v20  ;;  %v4063_v3 = vld [vmem:[%s4477_s29 + $0x18] sm:$0xff] }
 0x3b7   : > { %v3845_v13 = vpop.f32.mrb[50].mxu0 }
 0x3b8   : > { %v2634_v27 = vsub.f32 1.0, %v3845_v13  ;;  %v2624_v11 = vpop.f32.mrb[51].mxu0  ;;  %2441 = vadd.xlane.f32.xlu0 %v2440_v24 }
 0x3b9   : > { %v2633_v26 = vsub.f32 1.0, %v2624_v11 }
 0x3ba   : > { %v2636_v28 = vmul.f32 %v2634_v27, %v2342_v1  ;;  %v1592_v1 = vld [vmem:[%s4464_s16 + $0x10] sm:$0xff] }
 0x3bb   : > { %v2635_v32 = vmul.f32 %v2633_v26, %v2341_v34  ;;  %v4064_v27 = vld [vmem:[%s4477_s29 + $0x10] sm:$0xff] }
 0x3bc   : > { %v2638_v25 = vsel %vm574_vm0, %v2636_v28, 0.0 }
 0x3bd   : > { %v2637_v33 = vsel %vm574_vm0, %v2635_v32, 0.0 }
 0x3be   : > { %v2639_v39 = vadd.f32 %v2638_v25, %v2637_v33 }
 0x3bf   : > { %v3859_v36 = vpop.f32.mrb[52].mxu0 }
 0x3c0   : > { %v2832_v37 = vsub.f32 1.0, %v3859_v36  ;;  %v2822_v41 = vpop.f32.mrb[53].mxu0  ;;  %2640 = vadd.xlane.f32.xlu0 %v2639_v39  ;;  %v1595_v39 = vld [vmem:[%s4464_s16 + $0x28] sm:$0xff] }
 0x3c1   : > { %v2831_v43 = vsub.f32 1.0, %v2822_v41 }
 0x3c2   : > { %v2834_v45 = vmul.f32 %v2832_v37, %v2346_v35  ;;  %v4065_v37 = vld [vmem:[%s4477_s29 + $0x28] sm:$0xff] }
 0x3c3   : > { %v2833_v46 = vmul.f32 %v2831_v43, %v2345_v54  ;;  %v1594_v43 = vld [vmem:[%s4464_s16 + $0x20] sm:$0xff] }
 0x3c4   : > { %v2836_v44 = vsel %vm574_vm0, %v2834_v45, 0.0 }
 0x3c5   : > { %v2835_v40 = vsel %vm574_vm0, %v2833_v46, 0.0  ;;  %v4066_v46 = vld [vmem:[%s4477_s29 + $0x20] sm:$0xff] }
 0x3c6   : > { %v2837_v47 = vadd.f32 %v2836_v44, %v2835_v40 }
 0x3c7   : > { %v3873_v49 = vpop.f32.mrb[54].mxu0 }
 0x3c8   : > { %v3030_v52 = vsub.f32 1.0, %v3873_v49  ;;  %v3020_v30 = vpop.f32.mrb[55].mxu0  ;;  %2838 = vadd.xlane.f32.xlu0 %v2837_v47 }
 0x3c9   : > { %v3029_v57 = vsub.f32 1.0, %v3020_v30  ;;  %v1597_v30 = vld [vmem:[%s4464_s16 + $0x38] sm:$0xff] }
 0x3ca   : > { %v3032_v58 = vmul.f32 %v3030_v52, %v2350_v48 }
 0x3cb   : > { %v3031_v59 = vmul.f32 %v3029_v57, %v2349_v55 }
 0x3cc   : > { %v3034_v62 = vsel %vm574_vm0, %v3032_v58, 0.0 }
 0x3cd   : > { %v3033_v0 = vsel %vm574_vm0, %v3031_v59, 0.0  ;;  %v4067_v59 = vld [vmem:[%s4477_s29 + $0x38] sm:$0xff] }
 0x3ce   : > { %v3035_v2 = vadd.f32 %v3034_v62, %v3033_v0 }
 0x3d0   : > { %3036 = vadd.xlane.f32.xlu0 %v3035_v2  ;;  %v1596_v2 = vld [vmem:[%s4464_s16 + $0x30] sm:$0xff] }
 0x3de   : > { %v3743_v5 = vpop.f32.mrb[16].mxu1 }
 0x3df   : > { %v1453_v6 = vadd.f32 %v3743_v5, %v5030_v50  ;;  %v1447_v7 = vpop.f32.mrb[17].mxu1 }
 0x3e0   : > { %v1448_v8 = vadd.f32 %v5030_v50, %v1447_v7 }
 0x3e1   : > { %vm1527_vm3 = vcmp.gt.f32.partialorder %v1453_v6, 0.0  ;;  %v1543_v42 = vmul.f32 0.01, %v1453_v6 }
 0x3e2   : > { %vm1526_vm5 = vcmp.gt.f32.partialorder %v1448_v8, 0.0  ;;  %v1542_v9 = vmul.f32 0.01, %v1448_v8  ;;  %v3746_v53 = vpop.f32.mrb[18].mxu1 }
 0x3e3   : > { %v1559_v10 = vsel %vm1527_vm3, %v1453_v6, %v1543_v42  ;;  %v1463_v14 = vadd.f32 %v3746_v53, %v5030_v50  ;;  %v1457_v51 = vpop.f32.mrb[19].mxu1  ;;  %v4068_v6 = vld [vmem:[%s4477_s29 + $0x30] sm:$0xff] }
 0x3e4   : > { %v1575_v16 = vsub.f32 %v1559_v10, %v4061_v15  ;;  %v1558_v17 = vsel %vm1526_vm5, %v1448_v8, %v1542_v9  ;;  %v1458_v18 = vadd.f32 %v5030_v50, %v1457_v51 }
 0x3e5   : > { %v1574_v4 = vsub.f32 %v1558_v17, %v4062_v19  ;;  %vm1529_vm8 = vcmp.gt.f32.partialorder %v1463_v14, 0.0  ;;  %v1545_v38 = vmul.f32 0.01, %v1463_v14 }
 0x3e6   : > { %v1607_v60 = vmul.f32 %v1591_v12, %v1575_v16  ;;  %vm1528_vm2 = vcmp.gt.f32.partialorder %v1458_v18, 0.0  ;;  %v1544_v61 = vmul.f32 0.01, %v1458_v18  ;;  %v3749_v21 = vpop.f32.mrb[20].mxu1  ;;  %v4069_v16 = vld [vmem:[%s4477_s29 + $0x48] sm:$0xff] }
 0x3e7   : > { %v1606_v22 = vmul.f32 %v1590_v56, %v1574_v4  ;;  %v1561_v63 = vsel %vm1529_vm8, %v1463_v14, %v1545_v38  ;;  %v1473_v31 = vadd.f32 %v3749_v21, %v5030_v50  ;;  %v1467_v23 = vpop.f32.mrb[21].mxu1  ;;  %v1599_v14 = vld [vmem:[%s4464_s16 + $0x48] sm:$0xff]  ;;  %v4070_v4 = vld [vmem:[%s4477_s29 + $0x40] sm:$0xff] }
 0x3e8   : > { %1623 = vst.msk [vmem:[%s5043_s14 + $0x8] sm:$0xff] %vm574_vm0, %v1607_v60  ;;  %v1577_v20 = vsub.f32 %v1561_v63, %v4063_v3  ;;  %v1560_v24 = vsel %vm1528_vm2, %v1458_v18, %v1544_v61  ;;  %v1468_v13 = vadd.f32 %v5030_v50, %v1467_v23  ;;  %v1598_v18 = vld [vmem:[%s4464_s16 + $0x40] sm:$0xff] }
 0x3e9   : > { %1622 = vst.msk [vmem:[%s5043_s14] sm:$0xff] %vm574_vm0, %v1606_v22  ;;  %v1576_v34 = vsub.f32 %v1560_v24, %v4064_v27  ;;  %vm1531_vm4 = vcmp.gt.f32.partialorder %v1473_v31, 0.0  ;;  %v1547_v11 = vmul.f32 0.01, %v1473_v31 }
 0x3ea   : > { %v1609_v26 = vmul.f32 %v1593_v29, %v1577_v20  ;;  %vm1530_vm6 = vcmp.gt.f32.partialorder %v1468_v13, 0.0  ;;  %v1546_v28 = vmul.f32 0.01, %v1468_v13  ;;  %v3752_v32 = vpop.f32.mrb[22].mxu1  ;;  %v4071_v20 = vld [vmem:[%s4477_s29 + $0x58] sm:$0xff] }
 0x3eb   : > { %v1608_v25 = vmul.f32 %v1592_v1, %v1576_v34  ;;  %v1563_v33 = vsel %vm1531_vm4, %v1473_v31, %v1547_v11  ;;  %v1483_v35 = vadd.f32 %v3752_v32, %v5030_v50  ;;  %v1477_v36 = vpop.f32.mrb[23].mxu1  ;;  %v1601_v31 = vld [vmem:[%s4464_s16 + $0x58] sm:$0xff]  ;;  %v4072_v34 = vld [vmem:[%s4477_s29 + $0x50] sm:$0xff] }
 0x3ec   : > { %1625 = vst.msk [vmem:[%s5043_s14 + $0x18] sm:$0xff] %vm574_vm0, %v1609_v26  ;;  %v1579_v54 = vsub.f32 %v1563_v33, %v4065_v37  ;;  %v1562_v41 = vsel %vm1530_vm6, %v1468_v13, %v1546_v28  ;;  %v1478_v45 = vadd.f32 %v5030_v50, %v1477_v36  ;;  %v1600_v13 = vld [vmem:[%s4464_s16 + $0x50] sm:$0xff] }
 0x3ed   : > { %1624 = vst.msk [vmem:[%s5043_s14 + $0x10] sm:$0xff] %vm574_vm0, %v1608_v25  ;;  %v1578_v44 = vsub.f32 %v1562_v41, %v4066_v46  ;;  %vm1533_vm7 = vcmp.gt.f32.partialorder %v1483_v35, 0.0  ;;  %v1549_v40 = vmul.f32 0.01, %v1483_v35 }
 0x3ee   : > { %v1611_v47 = vmul.f32 %v1595_v39, %v1579_v54  ;;  %vm1532_vm9 = vcmp.gt.f32.partialorder %v1478_v45, 0.0  ;;  %v1548_v48 = vmul.f32 0.01, %v1478_v45  ;;  %v3755_v49 = vpop.f32.mrb[24].mxu1  ;;  %v4073_v54 = vld [vmem:[%s4477_s29 + $0x68] sm:$0xff] }
 0x3ef   : > { %v1610_v52 = vmul.f32 %v1594_v43, %v1578_v44  ;;  %v1565_v55 = vsel %vm1533_vm7, %v1483_v35, %v1549_v40  ;;  %v1493_v57 = vadd.f32 %v3755_v49, %v5030_v50  ;;  %v1487_v58 = vpop.f32.mrb[25].mxu1  ;;  %v1603_v35 = vld [vmem:[%s4464_s16 + $0x68] sm:$0xff]  ;;  %v5106_v44 = vld [vmem:[%s5292_s8 + $0x3] ss:$0 sm:$0xff] }
 0x3f0   : > { %1627 = vst.msk [vmem:[%s5043_s14 + $0x28] sm:$0xff] %vm574_vm0, %v1611_v47  ;;  %v1581_v62 = vsub.f32 %v1565_v55, %v4067_v59  ;;  %v1564_v0 = vsel %vm1532_vm9, %v1478_v45, %v1548_v48  ;;  %v1488_v5 = vadd.f32 %v5030_v50, %v1487_v58  ;;  %v1602_v45 = vld [vmem:[%s4464_s16 + $0x60] sm:$0xff] }
 0x3f1   : > { %1626 = vst.msk [vmem:[%s5043_s14 + $0x20] sm:$0xff] %vm574_vm0, %v1610_v52  ;;  %v1580_v7 = vsub.f32 %v1564_v0, %v4068_v6  ;;  %vm1535_vm10 = vcmp.gt.f32.partialorder %v1493_v57, 0.0  ;;  %v1551_v8 = vmul.f32 0.01, %v1493_v57  ;;  %v4074_v40 = vld [vmem:[%s4477_s29 + $0x60] sm:$0xff] }
 0x3f2   : > { %v1613_v42 = vmul.f32 %v1597_v30, %v1581_v62  ;;  %vm1534_vm11 = vcmp.gt.f32.partialorder %v1488_v5, 0.0  ;;  %v1550_v9 = vmul.f32 0.01, %v1488_v5  ;;  %v3758_v53 = vpop.f32.mrb[26].mxu1  ;;  %v4075_v62 = vld [vmem:[%s4477_s29 + $0x78] sm:$0xff] }
 0x3f3   : > { %v1612_v10 = vmul.f32 %v1596_v2, %v1580_v7  ;;  %v1567_v12 = vsel %vm1535_vm10, %v1493_v57, %v1551_v8  ;;  %v1503_v51 = vadd.f32 %v3758_v53, %v5030_v50  ;;  %v1497_v15 = vpop.f32.mrb[27].mxu1  ;;  %v1605_v57 = vld [vmem:[%s4464_s16 + $0x78] sm:$0xff]  ;;  %v4076_v7 = vld [vmem:[%s4477_s29 + $0x70] sm:$0xff]  ;;  %s3352_s29 = sshll.u32 %s5337_s21, 3 }
 0x3f4   : > { %1629 = vst.msk [vmem:[%s5043_s14 + $0x38] sm:$0xff] %vm574_vm0, %v1613_v42  ;;  %v1583_v17 = vsub.f32 %v1567_v12, %v4069_v16  ;;  %v1566_v56 = vsel %vm1534_vm11, %v1488_v5, %v1550_v9  ;;  %v1498_v19 = vadd.f32 %v5030_v50, %v1497_v15  ;;  %v1604_v5 = vld [vmem:[%s4464_s16 + $0x70] sm:$0xff]  ;;  %s4212_s16 = smov 8   ;;  %s5225_s12 = scalar_lea.vmem %s5328_s20, %s3352_s29 }
 0x3f5   : > { %1628 = vst.msk [vmem:[%s5043_s14 + $0x30] sm:$0xff] %vm574_vm0, %v1612_v10  ;;  %v1582_v38 = vsub.f32 %v1566_v56, %v4070_v4  ;;  %vm1537_vm12 = vcmp.gt.f32.partialorder %v1503_v51, 0.0  ;;  %v1553_v60 = vmul.f32 0.01, %v1503_v51 }
 0x3f6   : > { %v1615_v61 = vmul.f32 %v1599_v14, %v1583_v17  ;;  %vm1536_vm13 = vcmp.gt.f32.partialorder %v1498_v19, 0.0  ;;  %v1552_v21 = vmul.f32 0.01, %v1498_v19  ;;  %v3761_v22 = vpop.f32.mrb[28].mxu1 }
 0x3f7   : > { %v1614_v63 = vmul.f32 %v1598_v18, %v1582_v38  ;;  %v1569_v29 = vsel %vm1537_vm12, %v1503_v51, %v1553_v60  ;;  %v1513_v23 = vadd.f32 %v3761_v22, %v5030_v50  ;;  %v1507_v3 = vpop.f32.mrb[29].mxu1 }
 0x3f8   : > { %1631 = vst.msk [vmem:[%s5043_s14 + $0x48] sm:$0xff] %vm574_vm0, %v1615_v61  ;;  %v1585_v24 = vsub.f32 %v1569_v29, %v4071_v20  ;;  %v1568_v1 = vsel %vm1536_vm13, %v1498_v19, %v1552_v21  ;;  %v1508_v27 = vadd.f32 %v5030_v50, %v1507_v3 }
 0x3f9   : > { %1630 = vst.msk [vmem:[%s5043_s14 + $0x40] sm:$0xff] %vm574_vm0, %v1614_v63  ;;  %v1584_v11 = vsub.f32 %v1568_v1, %v4072_v34  ;;  %vm1539_vm14 = vcmp.gt.f32.partialorder %v1513_v23, 0.0  ;;  %v1555_v26 = vmul.f32 0.01, %v1513_v23 }
 0x3fa   : > { %v1617_v28 = vmul.f32 %v1601_v31, %v1585_v24  ;;  %vm1538_vm15 = vcmp.gt.f32.partialorder %v1508_v27, 0.0  ;;  %v1554_v32 = vmul.f32 0.01, %v1508_v27  ;;  %v3764_v25 = vpop.f32.mrb[30].mxu1 }
 0x3fb   : > { %v1616_v33 = vmul.f32 %v1600_v13, %v1584_v11  ;;  %v1571_v39 = vsel %vm1539_vm14, %v1513_v23, %v1555_v26  ;;  %v1523_v36 = vadd.f32 %v3764_v25, %v5030_v50  ;;  %v1517_v37 = vpop.f32.mrb[31].mxu1 }
 0x3fc   : > { %1633 = vst.msk [vmem:[%s5043_s14 + $0x58] sm:$0xff] %vm574_vm0, %v1617_v28  ;;  %v1587_v41 = vsub.f32 %v1571_v39, %v4073_v54  ;;  %v1570_v43 = vsel %vm1538_vm15, %v1508_v27, %v1554_v32  ;;  %v1518_v46 = vadd.f32 %v5030_v50, %v1517_v37 }
 0x3fd   : > { %1632 = vst.msk [vmem:[%s5043_s14 + $0x50] sm:$0xff] %vm574_vm0, %v1616_v33  ;;  %v1586_v47 = vsub.f32 %v1570_v43, %v4074_v40  ;;  %vm1541_vm1 = vcmp.gt.f32.partialorder %v1523_v36, 0.0  ;;  %v1557_v48 = vmul.f32 0.01, %v1523_v36 }
 0x3fe   : > { %v1619_v49 = vmul.f32 %v1603_v35, %v1587_v41  ;;  %vm1540_vm3 = vcmp.gt.f32.partialorder %v1518_v46, 0.0  ;;  %v1556_v52 = vmul.f32 0.01, %v1518_v46  ;;  %v3803_v50 = vpop.f32.mrb[32].mxu1 }
 0x3ff   : > { %v1618_v55 = vmul.f32 %v1602_v45, %v1586_v47  ;;  %v1573_v30 = vsel %vm1541_vm1, %v1523_v36, %v1557_v48  ;;  %v5113_v58 = vadd.f32 %v3803_v50, %v5106_v44  ;;  %v2017_v59 = vpop.f32.mrb[33].mxu1  ;;  %v2340_v45 = vld [vmem:[%s5009_s7 + $0x18] sm:$0xff]  ;;  %v2339_v47 = vld [vmem:[%s5009_s7 + $0x10] sm:$0xff] }
 0x400   : > { %1635 = vst.msk [vmem:[%s5043_s14 + $0x68] sm:$0xff] %vm574_vm0, %v1619_v49  ;;  %v1589_v0 = vsub.f32 %v1573_v30, %v4075_v62  ;;  %v1572_v2 = vsel %vm1540_vm3, %v1518_v46, %v1556_v52  ;;  %v2018_v6 = vadd.f32 %v5106_v44, %v2017_v59  ;;  %v2344_v59 = vld [vmem:[%s5009_s7 + $0x38] sm:$0xff] }
 0x401   : > { %1634 = vst.msk [vmem:[%s5043_s14 + $0x60] sm:$0xff] %vm574_vm0, %v1618_v55  ;;  %v1588_v8 = vsub.f32 %v1572_v2, %v4076_v7  ;;  %v2343_v2 = vld [vmem:[%s5009_s7 + $0x30] sm:$0xff]  ;;  %vm2097_vm10 = vcmp.gt.f32.partialorder %v5113_v58, 0.0 }
 0x402   : > { %v1621_v42 = vmul.f32 %v1605_v57, %v1589_v0  ;;  %v2112_v9 = vmul.f32 0.01, %v2018_v6  ;;  %v3806_v53 = vpop.f32.mrb[34].mxu1  ;;  %vm2096_vm5 = vcmp.gt.f32.partialorder %v2018_v6, 0.0 }
 0x403   : > { %v1620_v10 = vmul.f32 %v1604_v5, %v1588_v8  ;;  %v5124_v12 = vadd.f32 %v3806_v53, %v5106_v44  ;;  %v2027_v14 = vpop.f32.mrb[35].mxu1 }
 0x404   : > { %1637 = vst.msk [vmem:[%s5043_s14 + $0x78] sm:$0xff] %vm574_vm0, %v1621_v42  ;;  %v5129_v51 = vadd.f32 %v5106_v44, %v2027_v14  ;;  %v2128_v15 = vsel %vm2096_vm5, %v2018_v6, %v2112_v9  ;;  %vm2208_vm5 = vcmask 130112  }
 0x405   : > { %1636 = vst.msk [vmem:[%s5043_s14 + $0x70] sm:$0xff] %vm574_vm0, %v1620_v10  ;;  %2160 = vrot.lane.b32.xlu0 %v2128_v15, %s4212_s16  ;;  %v2348_v10 = vld [vmem:[%s5009_s7 + $0x58] sm:$0xff]  ;;  %vm2099_vm11 = vcmp.gt.f32.partialorder %v5124_v12, 0.0 }
 0x406   : > { %v3809_v16 = vpop.f32.mrb[36].mxu1 }
 0x407   : > { %v5135_v17 = vadd.f32 %v3809_v16, %v5106_v44  ;;  %v2037_v56 = vpop.f32.mrb[37].mxu1  ;;  %v2347_v16 = vld [vmem:[%s5009_s7 + $0x50] sm:$0xff] }
 0x408   : > { %v2038_v18 = vadd.f32 %v5106_v44, %v2037_v56 }
 0x409   : > { %vm2101_vm12 = vcmp.gt.f32.partialorder %v5135_v17, 0.0 }
 0x40a   : > { %v2116_v19 = vmul.f32 0.01, %v2038_v18  ;;  %v3812_v4 = vpop.f32.mrb[38].mxu1  ;;  %vm2100_vm8 = vcmp.gt.f32.partialorder %v2038_v18, 0.0 }
 0x40b   : > { %v5139_v38 = vadd.f32 %v3812_v4, %v5106_v44  ;;  %v2047_v60 = vpop.f32.mrb[39].mxu1 }
 0x40c   : > { %v2048_v61 = vadd.f32 %v5106_v44, %v2047_v60  ;;  %v2132_v21 = vsel %vm2100_vm8, %v2038_v18, %v2116_v19  ;;  %vm2451_vm8 = vcmask 0  }
 0x40d   : > { %2168 = vrot.lane.b32.xlu0 %v2132_v21, %s4212_s16  ;;  %vm2103_vm13 = vcmp.gt.f32.partialorder %v5139_v38, 0.0 }
 0x40e   : > { %v2118_v22 = vmul.f32 0.01, %v2048_v61  ;;  %v3815_v63 = vpop.f32.mrb[40].mxu1  ;;  %vm2102_vm2 = vcmp.gt.f32.partialorder %v2048_v61, 0.0 }
 0x40f   : > { %v5144_v29 = vadd.f32 %v3815_v63, %v5106_v44  ;;  %v2057_v31 = vpop.f32.mrb[41].mxu1 }
 0x410   : > { %v2058_v23 = vadd.f32 %v5106_v44, %v2057_v31  ;;  %v2134_v3 = vsel %vm2102_vm2, %v2048_v61, %v2118_v22  ;;  %v2352_v22 = vld [vmem:[%s5009_s7 + $0x78] sm:$0xff] }
 0x411   : > { %2172 = vrot.lane.b32.xlu0 %v2134_v3, %s4212_s16  ;;  %vm2105_vm14 = vcmp.gt.f32.partialorder %v5144_v29, 0.0 }
 0x412   : > { %v2120_v20 = vmul.f32 0.01, %v2058_v23  ;;  %v3818_v24 = vpop.f32.mrb[42].mxu1  ;;  %vm2104_vm4 = vcmp.gt.f32.partialorder %v2058_v23, 0.0 }
 0x413   : > { %v5149_v1 = vadd.f32 %v3818_v24, %v5106_v44  ;;  %v2067_v13 = vpop.f32.mrb[43].mxu1 }
 0x414   : > { %v2068_v27 = vadd.f32 %v5106_v44, %v2067_v13  ;;  %v2136_v34 = vsel %vm2104_vm4, %v2058_v23, %v2120_v20  ;;  %v2351_v23 = vld [vmem:[%s5009_s7 + $0x70] sm:$0xff] }
 0x415   : > { %2176 = vrot.lane.b32.xlu0 %v2136_v34, %s4212_s16  ;;  %vm2107_vm15 = vcmp.gt.f32.partialorder %v5149_v1, 0.0 }
 0x416   : > { %v2122_v11 = vmul.f32 0.01, %v2068_v27  ;;  %v3821_v26 = vpop.f32.mrb[44].mxu1  ;;  %vm2106_vm6 = vcmp.gt.f32.partialorder %v2068_v27, 0.0 }
 0x417   : > { %v5154_v28 = vadd.f32 %v3821_v26, %v5106_v44  ;;  %v2077_v32 = vpop.f32.mrb[45].mxu1 }
 0x418   : > { %v2078_v25 = vadd.f32 %v5106_v44, %v2077_v32  ;;  %v2138_v33 = vsel %vm2106_vm6, %v2068_v27, %v2122_v11 }
 0x419   : > { %2180 = vrot.lane.b32.xlu0 %v2138_v33, %s4212_s16  ;;  %v2113_v33 = vmul.f32 0.01, %v5113_v58  ;;  %vm2109_vm1 = vcmp.gt.f32.partialorder %v5154_v28, 0.0 }
 0x41a   : > { %v2124_v39 = vmul.f32 0.01, %v2078_v25  ;;  %v3824_v35 = vpop.f32.mrb[46].mxu1  ;;  %vm2108_vm7 = vcmp.gt.f32.partialorder %v2078_v25, 0.0 }
 0x41b   : > { %v5159_v36 = vadd.f32 %v3824_v35, %v5106_v44  ;;  %v2087_v37 = vpop.f32.mrb[47].mxu1 }
 0x41c   : > { %v2088_v54 = vadd.f32 %v5106_v44, %v2087_v37  ;;  %v2140_v41 = vsel %vm2108_vm7, %v2078_v25, %v2124_v39  ;;  %v2114_v37 = vmul.f32 0.01, %v5129_v51 }
 0x41d   : > { %2184 = vrot.lane.b32.xlu0 %v2140_v41, %s4212_s16  ;;  %vm2111_vm3 = vcmp.gt.f32.partialorder %v5159_v36, 0.0 }
 0x41e   : > { %v2126_v43 = vmul.f32 0.01, %v2088_v54  ;;  %v3838_v46 = vpop.f32.mrb[48].mxu1  ;;  %vm2110_vm9 = vcmp.gt.f32.partialorder %v2088_v54, 0.0 }
 0x41f   : > { %v2535_v40 = vsub.f32 1.0, %v3838_v46  ;;  %v2525_v48 = vpop.f32.mrb[49].mxu1 }
 0x420   : > { %v2534_v49 = vsub.f32 1.0, %v2525_v48  ;;  %v2142_v52 = vsel %vm2110_vm9, %v2088_v54, %v2126_v43  ;;  %v2129_v54 = vsel %vm2097_vm10, %v5113_v58, %v2113_v33  ;;  %v2119_v58 = vmul.f32 0.01, %v5139_v38 }
 0x421   : > { %v2537_v50 = vmul.f32 %v2535_v40, %v2340_v45  ;;  %2188 = vrot.lane.b32.xlu0 %v2142_v52, %s4212_s16  ;;  %v2115_v45 = vmul.f32 0.01, %v5124_v12  ;;  %v2117_v40 = vmul.f32 0.01, %v5135_v17 }
 0x422   : > { %v2536_v55 = vmul.f32 %v2534_v49, %v2339_v47  ;;  %v2135_v49 = vsel %vm2103_vm13, %v5139_v38, %v2119_v58  ;;  %v2127_v38 = vmul.f32 0.01, %v5159_v36 }
 0x423   : > { %v2539_v44 = vsel %vm574_vm0, %v2537_v50, 0.0  ;;  %v2131_v47 = vsel %vm2099_vm11, %v5124_v12, %v2115_v45  ;;  %v2133_v48 = vsel %vm2101_vm12, %v5135_v17, %v2117_v40  ;;  %v2123_v12 = vmul.f32 0.01, %v5149_v1 }
 0x424   : > { %v2538_v30 = vsel %vm574_vm0, %v2536_v55, 0.0  ;;  %v2125_v17 = vmul.f32 0.01, %v5154_v28 }
 0x425   : > { %v2540_v57 = vadd.f32 %v2539_v44, %v2538_v30  ;;  %v2139_v50 = vsel %vm2107_vm15, %v5149_v1, %v2123_v12  ;;  %v2143_v30 = vsel %vm2111_vm3, %v5159_v36, %v2127_v38 }
 0x426   : > { %v3852_v62 = vpop.f32.mrb[50].mxu1 }
 0x427   : > { %v2733_v0 = vsub.f32 1.0, %v3852_v62  ;;  %v2723_v5 = vpop.f32.mrb[51].mxu1  ;;  %2541 = vadd.xlane.f32.xlu1 %v2540_v57 }
 0x428   : > { %v2732_v6 = vsub.f32 1.0, %v2723_v5 }
 0x429   : > { %v2735_v7 = vmul.f32 %v2733_v0, %v2344_v59 }
 0x42a   : > { %v2734_v8 = vmul.f32 %v2732_v6, %v2343_v2 }
 0x42b   : > { %v2737_v42 = vsel %vm574_vm0, %v2735_v7, 0.0 }
 0x42c   : > { %v2736_v9 = vsel %vm574_vm0, %v2734_v8, 0.0 }
 0x42d   : > { %v2738_v53 = vadd.f32 %v2737_v42, %v2736_v9 }
 0x42e   : > { %v3866_v14 = vpop.f32.mrb[52].mxu1 }
 0x42f   : > { %v2931_v15 = vsub.f32 1.0, %v3866_v14  ;;  %v2921_v56 = vpop.f32.mrb[53].mxu1  ;;  %2739 = vadd.xlane.f32.xlu1 %v2738_v53 }
 0x430   : > { %v2930_v18 = vsub.f32 1.0, %v2921_v56 }
 0x431   : > { %v2933_v19 = vmul.f32 %v2931_v15, %v2348_v10 }
 0x432   : > { %v2932_v4 = vmul.f32 %v2930_v18, %v2347_v16 }
 0x433   : > { %v2935_v60 = vsel %vm574_vm0, %v2933_v19, 0.0 }
 0x434   : > { %v2934_v61 = vsel %vm574_vm0, %v2932_v4, 0.0 }
 0x435   : > { %v2936_v21 = vadd.f32 %v2935_v60, %v2934_v61 }
 0x436   : > { %v3880_v63 = vpop.f32.mrb[54].mxu1 }
 0x437   : > { %v3129_v31 = vsub.f32 1.0, %v3880_v63  ;;  %v3119_v3 = vpop.f32.mrb[55].mxu1  ;;  %2937 = vadd.xlane.f32.xlu1 %v2936_v21 }
 0x438   : > { %v3128_v20 = vsub.f32 1.0, %v3119_v3 }
 0x439   : > { %v3131_v24 = vmul.f32 %v3129_v31, %v2352_v22 }
 0x43a   : > { %v3130_v13 = vmul.f32 %v3128_v20, %v2351_v23 }
 0x43b   : > { %v3133_v27 = vsel %vm574_vm0, %v3131_v24, 0.0 }
 0x43c   : > { %v3132_v34 = vsel %vm574_vm0, %v3130_v13, 0.0  ;;  %vm2098_vm0 = vcmp.gt.f32.partialorder %v5129_v51, 0.0 }
 0x43d   : > { %v3134_v11 = vadd.f32 %v3133_v27, %v3132_v34  ;;  %v2130_v46 = vsel %vm2098_vm0, %v5129_v51, %v2114_v37  ;;  %v2121_v51 = vmul.f32 0.01, %v5144_v29 }
 0x43f   : > { %3135 = vadd.xlane.f32.xlu1 %v3134_v11  ;;  %v2137_v52 = vsel %vm2105_vm14, %v5144_v29, %v2121_v51  ;;  %v2141_v29 = vsel %vm2109_vm1, %v5154_v28, %v2125_v17 }
 0x445   : > { %v2442_v26 = vpop.xlane.xlu0 %2441 }
 0x446   : > { %v2443_v32 = vrot.slane %v2442_v26, 4 }
 0x448   : > { %v2444_v25 = vadd.f32 %v2443_v32, %v2442_v26 }
 0x44a   : > { %v2445_v39 = vrot.slane %v2444_v25, 2 }
 0x44c   : > { %v2446_v35 = vadd.f32 %v2445_v39, %v2444_v25 }
 0x44d   : > { %v2641_v55 = vpop.xlane.xlu0 %2640 }
 0x44e   : > { %v2447_v41 = vrot.slane %v2446_v35, 1  ;;  %v2642_v6 = vrot.slane %v2641_v55, 4 }
 0x450   : > { %2162 = vrot.lane.b32.xlu1 %v2129_v54, %s4212_s16  ;;  %v2448_v43 = vadd.f32 %v2447_v41, %v2446_v35  ;;  %v2643_v7 = vadd.f32 %v2642_v6, %v2641_v55 }
 0x452   : > { %3961 = vpush %v2448_v43  ;;  %v2644_v8 = vrot.slane %v2643_v7, 2 }
 0x454   : > { %2164 = vrot.lane.b32.xlu1 %v2130_v46, %s4212_s16  ;;  %v2645_v15 = vadd.f32 %v2644_v8, %v2643_v7 }
 0x455   : > { %v2839_v44 = vpop.xlane.xlu0 %2838 }
 0x456   : > { %v2840_v42 = vrot.slane %v2839_v44, 4  ;;  %v2646_v60 = vrot.slane %v2645_v15, 1 }
 0x458   : > { %2166 = vrot.lane.b32.xlu1 %v2131_v47, %s4212_s16  ;;  %v2841_v14 = vadd.f32 %v2840_v42, %v2839_v44  ;;  %v2647_v23 = vadd.f32 %v2646_v60, %v2645_v15 }
 0x45a   : > { %v2842_v18 = vrot.slane %v2841_v14, 2 }
 0x45c   : > { %2170 = vrot.lane.b32.xlu1 %v2133_v48, %s4212_s16  ;;  %v2843_v3 = vadd.f32 %v2842_v18, %v2841_v14 }
 0x45d   : > { %v3037_v1 = vpop.xlane.xlu0 %3036 }
 0x45e   : > { %v3038_v19 = vrot.slane %v3037_v1, 4  ;;  %v2844_v34 = vrot.slane %v2843_v3, 1 }
 0x460   : > { %2174 = vrot.lane.b32.xlu1 %v2135_v49, %s4212_s16  ;;  %v3039_v31 = vadd.f32 %v3038_v19, %v3037_v1  ;;  %v2845_v33 = vadd.f32 %v2844_v34, %v2843_v3 }
 0x462   : > { %v3040_v13 = vrot.slane %v3039_v31, 2 }
 0x464   : > { %2178 = vrot.lane.b32.xlu1 %v2137_v52, %s4212_s16  ;;  %v3041_v39 = vadd.f32 %v3040_v13, %v3039_v31 }
 0x466   : > { %v3042_v41 = vrot.slane %v3041_v39, 1 }
 0x468   : > { %2182 = vrot.lane.b32.xlu1 %v2139_v50, %s4212_s16  ;;  %v3043_v58 = vadd.f32 %v3042_v41, %v3041_v39 }
 0x46c   : > { %2186 = vrot.lane.b32.xlu1 %v2141_v29, %s4212_s16 }
 0x470   : > { %2190 = vrot.lane.b32.xlu1 %v2143_v30, %s4212_s16 }
 0x477   : > { %v2161_v57 = vpop.permute.xlu0 %2160 }
 0x478   : > { %2209 = vst.msk [vmem:[%s4586_s13] sm:$0xff] %vm2208_vm5, %v2161_v57 }
 0x47f   : > { %v2169_v28 = vpop.permute.xlu0 %2168 }
 0x480   : > { %2213 = vst.msk [vmem:[%s4586_s13 + $0x20] sm:$0xff] %vm2208_vm5, %v2169_v28 }
 0x483   : > { %v2173_v36 = vpop.permute.xlu0 %2172  ;;  %s3962_s25 = spop %3961 }
 0x484   : > { %2215 = vst.msk [vmem:[%s4586_s13 + $0x30] sm:$0xff] %vm2208_vm5, %v2173_v36  ;;  %v2450_v59 = vstv %s3962_s25 }
 0x485   : > { %2452 = vst.msk [vmem:[%s5225_s12] sm:$0x1] %vm2451_vm8, %v2450_v59 }
 0x487   : > { %v2177_v62 = vpop.permute.xlu0 %2176 }
 0x488   : > { %2217 = vst.msk [vmem:[%s4586_s13 + $0x40] sm:$0xff] %vm2208_vm5, %v2177_v62 }
 0x48b   : > { %v2181_v0 = vpop.permute.xlu0 %2180 }
 0x48c   : > { %2219 = vst.msk [vmem:[%s4586_s13 + $0x50] sm:$0xff] %vm2208_vm5, %v2181_v0 }
 0x48f   : > { %v2185_v2 = vpop.permute.xlu0 %2184 }
 0x490   : > { %2221 = vst.msk [vmem:[%s4586_s13 + $0x60] sm:$0xff] %vm2208_vm5, %v2185_v2 }
 0x493   : > { %v2189_v5 = vpop.permute.xlu0 %2188 }
 0x494   : > { %2223 = vst.msk [vmem:[%s4586_s13 + $0x70] sm:$0xff] %vm2208_vm5, %v2189_v5 }
 0x4b4   : > { %v2542_v9 = vpop.xlane.xlu1 %2541 }
 0x4b5   : > { %v2543_v53 = vrot.slane %v2542_v9, 4 }
 0x4b7   : > { %v2544_v10 = vadd.f32 %v2543_v53, %v2542_v9 }
 0x4b9   : > { %v2545_v16 = vrot.slane %v2544_v10, 2 }
 0x4bb   : > { %v2546_v56 = vadd.f32 %v2545_v16, %v2544_v10 }
 0x4bc   : > { %v2740_v4 = vpop.xlane.xlu1 %2739 }
 0x4bd   : > { %v2741_v61 = vrot.slane %v2740_v4, 4  ;;  %v2547_v21 = vrot.slane %v2546_v56, 1 }
 0x4bf   : > { %v2742_v22 = vadd.f32 %v2741_v61, %v2740_v4  ;;  %v2548_v63 = vadd.f32 %v2547_v21, %v2546_v56 }
 0x4c1   : > { %v2743_v20 = vrot.slane %v2742_v22, 2  ;;  %3963 = vpush %v2548_v63 }
 0x4c2   : > { %3965 = vpush %v2647_v23 }
 0x4c3   : > { %v2744_v24 = vadd.f32 %v2743_v20, %v2742_v22 }
 0x4c4   : > { %v2938_v27 = vpop.xlane.xlu1 %2937 }
 0x4c5   : > { %v2939_v11 = vrot.slane %v2938_v27, 4  ;;  %v2745_v26 = vrot.slane %v2744_v24, 1 }
 0x4c7   : > { %v2940_v32 = vadd.f32 %v2939_v11, %v2938_v27  ;;  %v2746_v25 = vadd.f32 %v2745_v26, %v2744_v24 }
 0x4c9   : > { %v2941_v35 = vrot.slane %v2940_v32, 2  ;;  %3967 = vpush %v2746_v25 }
 0x4ca   : > { %3969 = vpush %v2845_v33 }
 0x4cb   : > { %v2942_v37 = vadd.f32 %v2941_v35, %v2940_v32 }
 0x4cc   : > { %v3136_v54 = vpop.xlane.xlu1 %3135 }
 0x4cd   : > { %v3137_v43 = vrot.slane %v3136_v54, 4  ;;  %v2943_v45 = vrot.slane %v2942_v37, 1 }
 0x4cf   : > { %v3138_v46 = vadd.f32 %v3137_v43, %v3136_v54  ;;  %v2944_v40 = vadd.f32 %v2943_v45, %v2942_v37 }
 0x4d0   : > { %v2163_v47 = vpop.permute.xlu1 %2162 }
 0x4d1   : > { %v3139_v48 = vrot.slane %v3138_v46, 2  ;;  %2210 = vst.msk [vmem:[%s4586_s13 + $0x8] sm:$0xff] %vm2208_vm5, %v2163_v47 }
 0x4d2   : > { %3971 = vpush %v2944_v40 }
 0x4d3   : > { %3973 = vpush %v3043_v58  ;;  %v3140_v51 = vadd.f32 %v3139_v48, %v3138_v46 }
 0x4d4   : > { %v2165_v49 = vpop.permute.xlu1 %2164 }
 0x4d5   : > { %2211 = vst.msk [vmem:[%s4586_s13 + $0x10] sm:$0xff] %vm2208_vm5, %v2165_v49  ;;  %v3141_v12 = vrot.slane %v3140_v51, 1 }
 0x4d7   : > { %v3142_v52 = vadd.f32 %v3141_v12, %v3140_v51 }
 0x4d8   : > { %v2167_v17 = vpop.permute.xlu1 %2166 }
 0x4d9   : > { %2212 = vst.msk [vmem:[%s4586_s13 + $0x18] sm:$0xff] %vm2208_vm5, %v2167_v17 }
 0x4da   : > { %3975 = vpush %v3142_v52 }
 0x4dc   : > { %v2171_v50 = vpop.permute.xlu1 %2170 }
 0x4dd   : > { %2214 = vst.msk [vmem:[%s4586_s13 + $0x28] sm:$0xff] %vm2208_vm5, %v2171_v50 }
 0x4e0   : > { %v2175_v38 = vpop.permute.xlu1 %2174 }
 0x4e1   : > { %2216 = vst.msk [vmem:[%s4586_s13 + $0x38] sm:$0xff] %vm2208_vm5, %v2175_v38 }
 0x4e4   : > { %v2179_v55 = vpop.permute.xlu1 %2178 }
 0x4e5   : > { %2218 = vst.msk [vmem:[%s4586_s13 + $0x48] sm:$0xff] %vm2208_vm5, %v2179_v55 }
 0x4e8   : > { %v2183_v29 = vpop.permute.xlu1 %2182 }
 0x4e9   : > { %2220 = vst.msk [vmem:[%s4586_s13 + $0x58] sm:$0xff] %vm2208_vm5, %v2183_v29 }
 0x4ec   : > { %v2187_v44 = vpop.permute.xlu1 %2186 }
 0x4ed   : > { %2222 = vst.msk [vmem:[%s4586_s13 + $0x68] sm:$0xff] %vm2208_vm5, %v2187_v44 }
 0x4f0   : > { %v2191_v30 = vpop.permute.xlu1 %2190 }
 0x4f1   : > { %2224 = vst.msk [vmem:[%s4586_s13 + $0x78] sm:$0xff] %vm2208_vm5, %v2191_v30 }
 0x4f2   : > { %s3964_s21 = spop %3963 }
 0x4f3   : > { %v2550_v1 = vstv %s3964_s21  ;;  %s3966_s15 = spop %3965 }
 0x4f4   : > { %2551 = vst.msk [vmem:[%s5225_s12 + $0x1] sm:$0x1] %vm2451_vm8, %v2550_v1  ;;  %v2649_v57 = vstv %s3966_s15 }
 0x4f5   : > { %2650 = vst.msk [vmem:[%s5225_s12 + $0x2] sm:$0x1] %vm2451_vm8, %v2649_v57 }
 0x4fa   : > { %s3968_s26 = spop %3967 }
 0x4fb   : > { %v2748_v28 = vstv %s3968_s26  ;;  %s3970_s7 = spop %3969 }
 0x4fc   : > { %2749 = vst.msk [vmem:[%s5225_s12 + $0x3] sm:$0x1] %vm2451_vm8, %v2748_v28  ;;  %v2847_v36 = vstv %s3970_s7 }
 0x4fd   : > { %2848 = vst.msk [vmem:[%s5225_s12 + $0x4] sm:$0x1] %vm2451_vm8, %v2847_v36 }
 0x503   : > { %s3972_s13 = spop %3971 }
 0x504   : > { %v2946_v59 = vstv %s3972_s13  ;;  %s3974_s17 = spop %3973 }
 0x505   : > { %2947 = vst.msk [vmem:[%s5225_s12 + $0x5] sm:$0x1] %vm2451_vm8, %v2946_v59  ;;  %v3045_v62 = vstv %s3974_s17 }
 0x506   : > { %3046 = vst.msk [vmem:[%s5225_s12 + $0x6] sm:$0x1] %vm2451_vm8, %v3045_v62 }
 0x50b   : > { %s3976_s2 = spop %3975 }
 0x50c   : > { %v3144_v0 = vstv %s3976_s2 }
 0x50d   : > { %3145 = vst.msk [vmem:[%s5225_s12 + $0x7] sm:$0x1] %vm2451_vm8, %v3144_v0 }
 0x50e PF: > { %s5329_s20 = sld [smem:[#allocation9_spill]]  ;;  %s5330_s28 = sld [smem:[#allocation10_spill]] }
 0x50f   : > { %s5331_s17 = smov %s4197_s18  ;;  %s5332_s18 = smov %s4201_s19 }
 0x514   : > { %p25_p7 = scmp.ge.s32.totalorder %s5329_s20, 4   ;;  %s5333_s19 = smov %s5330_s28 }
 0x516   :  { %27 = sbr.rel (!%p25_p7) target bundleno = 10 (0xa), region = 149 }
 0x51d   :  { %3199 = vsyncpa [#allocation3], 1 }
 0x51e   :  { %3201 = vsyncpa [#allocation3 + $0x1], 1 }
 0x51f   :  { %3202 = vsyncpa [#allocation5], 1 }
 0x520   :  { %3204 = vsyncpa [#allocation5 + $0x1], 1 }

// kernel: custom-call.40
= control target key start
LH: loop header
LB: loop body
LE: loop exit
PB: predicated region body
PF: predicated region fallthrough
CT: control target
= control target key end

     0   :  { %s6_s0 = inlined_call_operand.hbm [shape: pred[16], index: 0, kind: output, shape index: {}]  }

// kernel: custom-call.45
= control target key start
LH: loop header
LB: loop body
LE: loop exit
PB: predicated region body
PF: predicated region fallthrough
CT: control target
= control target key end

     0   :  { %s870_s6 = smov 0   ;;  %s872_s7 = smov 0   ;;  %s1029_s0 = inlined_call_operand.vmem [shape: f32[16,16,16], index: 0, kind: input, shape index: {}]   ;;  %s1030_s1 = inlined_call_operand.vmem [shape: f32[16,16,16], index: 1, kind: output, shape index: {}]  }
   0x1   :  { %s874_s8 = smov 0  }
   0x2 LB: > { %s683_s9 = sadd.s32 4294967295, %s857_s8   ;;  %s26_s10 = sadd.s32 1, %s853_s7  ;;  %s857_s8 = sphi %s874_s8, %s7_s8   ;;  %s853_s7 = sphi %s872_s7, %s1032_s7   ;;  %s849_s6 = sphi %s870_s6, %s1031_s6  }
   0x3   : > { %p28_p0 = scmp.ge.s32.totalorder %s26_s10, 16  ;;  %p685_p1 = scmp.ge.s32.totalorder %s857_s8, 16 }
   0x4   : > { %s42_s11 = sand.u32 (!%p685_p1), 1, %s857_s8   ;;  %s776_s12 = sshll.u32 (!%p685_p1), %s853_s7, 4 }
   0x5   : > { %s1034_s10 = smov (%p28_p0, %s26_s10), 0  ;;  %40 = sbr.rel (%p685_p1) target bundleno = 12 (0xc), region = 16 }
   0x6   : > { %s686_s13 = sshll.u32 (!%p685_p1), %s42_s11, 4  ;;  %s49_s16 = scalar_lea.vmem (!%p685_p1), %s1029_s0, %s776_s12 }
   0x7   : > { %v79_v0 = vld [vmem:[%s49_s16] sm:$0xff] (!%p685_p1)  ;;  %v81_v1 = vld [vmem:[%s49_s16 + $0x8] sm:$0xff] (!%p685_p1)  ;;  %s44_s17 = scalar_lea.vmem (!%p685_p1), [#allocation0], %s686_s13 }
   0x8   : > { %80 = vst [vmem:[%s44_s17] sm:$0xff] (!%p685_p1), %v79_v0  ;;  %82 = vst [vmem:[%s44_s17 + $0x8] sm:$0xff] (!%p685_p1), %v81_v1 }
   0xc PF: > { %p689_p2 = scmp.ge.s32.totalorder %s857_s8, 1  ;;  %p87_p3 = scmp.lt.s32.totalorder %s857_s8, 17 }
   0xe   : > { %p88_p4 = pnand %p689_p2, %p87_p3 }
   0xf   : > { %s94_s18 = sand.u32 (!%p88_p4), 1, %s683_s9   ;;  %v859_v2 = vmov (!%p88_p4), 0.0   ;;  %vm108_vm0 = vcmask (!%p88_p4), 7168   ;;  %vm139_vm1 = vcmask (!%p88_p4), 15368   ;;  %vm156_vm2 = vcmask (!%p88_p4), 1047553   ;;  %s777_s22 = sshll.u32 (!%p88_p4), %s849_s6, 4 }
  0x10   : > { %91 = sbr.rel (%p88_p4) target bundleno = 2737 (0xab1), region = 54  ;;  %s690_s19 = sshll.u32 (!%p88_p4), %s94_s18, 4  ;;  %vm157_vm3 = vmand (!%p88_p4), %vm139_vm1, %vm156_vm2  ;;  %vm174_vm4 = vcmask (!%p88_p4), 23568   ;;  %vm191_vm5 = vcmask (!%p88_p4), 1047554   ;;  %vm209_vm7 = vcmask (!%p88_p4), 31768   ;;  %vm226_vm8 = vcmask (!%p88_p4), 1047555  }
  0x11   : > { %s897_s20 = scalar_lea.vmem (!%p88_p4), [#allocation1], %s690_s19  ;;  %s901_s21 = scalar_lea.vmem (!%p88_p4), [#allocation0], %s690_s19  ;;  %vm192_vm6 = vmand (!%p88_p4), %vm174_vm4, %vm191_vm5  ;;  %vm244_vm10 = vcmask (!%p88_p4), 39968   ;;  %vm261_vm11 = vcmask (!%p88_p4), 1047556   ;;  %vm279_vm13 = vcmask (!%p88_p4), 48168   ;;  %vm296_vm14 = vcmask (!%p88_p4), 1047557  }
  0x12   : > { %105 = vst [vmem:[%s897_s20] sm:$0xff] (!%p88_p4), %v859_v2  ;;  %v110_v6 = vld [vmem:[%s901_s21] ss:$0 sm:$0xff] (!%p88_p4)  ;;  %v909_v15 = vld [vmem:[%s901_s21 + $0x8] sm:$0xff] (!%p88_p4)  ;;  %v697_v24 = vld [vmem:[%s901_s21 + $0x1] ss:$0 sm:$0xff] (!%p88_p4)  ;;  %s1006_s25 = scalar_lea.vmem (!%p88_p4), %s1030_s1, %s777_s22 }
  0x13   : > { %v905_v10 = vld [vmem:[%s901_s21] sm:$0xff] (!%p88_p4)  ;;  %vm227_vm9 = vmand (!%p88_p4), %vm209_vm7, %vm226_vm8 }
  0x14   : > { %v702_v42 = vld [vmem:[%s901_s21 + $0x2] ss:$0 sm:$0xff] (!%p88_p4)  ;;  %v707_v60 = vld [vmem:[%s901_s21 + $0x3] ss:$0 sm:$0xff] (!%p88_p4)  ;;  %vm262_vm12 = vmand (!%p88_p4), %vm244_vm10, %vm261_vm11 }
  0x15   : > { %vm297_vm15 = vmand (!%p88_p4), %vm279_vm13, %vm296_vm14 }
  0x19   : > { %v109_v3 = vld [vmem:[%s897_s20] ss:$0 sm:$0xff] }
  0x1a   : > { %v111_v4 = vmul.f32 %v109_v3, %v109_v3  ;;  %v130_v5 = vmul.f32 0.0, %v109_v3 }
  0x1c   : > { %112 = vadd.xlane.f32.xlu0 %v111_v4  ;;  %131 = vadd.xlane.f32.xlu1 %v130_v5 }
  0x20   : > { %119 = vadd.xlane.f32.xlu0 %v130_v5 }
  0xa9   : > { %v113_v7 = vpop.xlane.xlu0 %112  ;;  %v132_v14 = vpop.xlane.xlu1 %131 }
  0xaa   : > { %v114_v8 = vsub.f32 %v110_v6, %v113_v7  ;;  %v133_v17 = vsub.f32 %v909_v15, %v132_v14 }
  0xac   : > { %803 = vrsqrt.f32 %v114_v8 }
  0xad   : > { %v120_v9 = vpop.xlane.xlu0 %119 }
  0xae   : > { %v121_v11 = vsub.f32 %v905_v10, %v120_v9 }
  0xb6   : > { %v804_v12 = vpop.eup %803 }
  0xb7   : > { %v122_v13 = vmul.f32 %v804_v12, %v121_v11  ;;  %v134_v18 = vmul.f32 %v804_v12, %v133_v17 }
  0xb9   : > { %v123_v16 = vsel %vm108_vm0, %v122_v13, 0.0  ;;  %v135_v19 = vsel %vm108_vm0, %v134_v18, 0.0  ;;  %vm314_vm0 = vcmask 56368  }
  0xba   : > { %125 = vst [vmem:[%s897_s20] sm:$0xff] %v123_v16 }
  0xc1   : > { %v696_v20 = vld [vmem:[%s897_s20 + $0x1] ss:$0 sm:$0xff] }
  0xc2   : > { %v151_v21 = vmul.f32 %v696_v20, %v123_v16  ;;  %v144_v22 = vmul.f32 %v696_v20, %v696_v20  ;;  %v165_v23 = vmul.f32 %v696_v20, %v135_v19 }
  0xc4   : > { %152 = vadd.xlane.f32.xlu0 %v151_v21  ;;  %145 = vadd.xlane.f32.xlu1 %v144_v22 }
  0xc8   : > { %166 = vadd.xlane.f32.xlu1 %v165_v23 }
 0x151   : > { %v146_v25 = vpop.xlane.xlu1 %145  ;;  %v153_v27 = vpop.xlane.xlu0 %152 }
 0x152   : > { %v147_v26 = vsub.f32 %v697_v24, %v146_v25  ;;  %v154_v28 = vsub.f32 %v905_v10, %v153_v27 }
 0x154   : > { %805 = vrsqrt.f32 %v147_v26 }
 0x155   : > { %v167_v33 = vpop.xlane.xlu1 %166 }
 0x156   : > { %v168_v34 = vsub.f32 %v909_v15, %v167_v33 }
 0x15e   : > { %v806_v29 = vpop.eup %805 }
 0x15f   : > { %v155_v30 = vmul.f32 %v806_v29, %v154_v28  ;;  %v169_v35 = vmul.f32 %v806_v29, %v168_v34  ;;  %v717_v34 = vld [vmem:[%s901_s21 + $0x5] ss:$0 sm:$0xff] }
 0x161   : > { %v158_v31 = vsel %vm157_vm3, %v155_v30, 0.0  ;;  %v170_v36 = vsel %vm139_vm1, %v169_v35, 0.0  ;;  %vm331_vm1 = vcmask 1047558  }
 0x162   : > { %v159_v32 = vadd.f32 %v158_v31, %v123_v16  ;;  %v171_v40 = vadd.f32 %v170_v36, %v135_v19  ;;  %v712_v16 = vld [vmem:[%s901_s21 + $0x4] ss:$0 sm:$0xff]  ;;  %vm332_vm3 = vmand %vm314_vm0, %vm331_vm1 }
 0x164   : > { %160 = vst [vmem:[%s897_s20] sm:$0xff] %v159_v32 }
 0x16b   : > { %v701_v37 = vld [vmem:[%s897_s20 + $0x2] ss:$0 sm:$0xff] }
 0x16c   : > { %v186_v38 = vmul.f32 %v701_v37, %v159_v32  ;;  %v179_v39 = vmul.f32 %v701_v37, %v701_v37  ;;  %v200_v41 = vmul.f32 %v701_v37, %v171_v40 }
 0x16e   : > { %187 = vadd.xlane.f32.xlu1 %v186_v38  ;;  %180 = vadd.xlane.f32.xlu0 %v179_v39 }
 0x172   : > { %201 = vadd.xlane.f32.xlu0 %v200_v41 }
 0x1fb   : > { %v181_v43 = vpop.xlane.xlu0 %180  ;;  %v188_v45 = vpop.xlane.xlu1 %187 }
 0x1fc   : > { %v182_v44 = vsub.f32 %v702_v42, %v181_v43  ;;  %v189_v46 = vsub.f32 %v905_v10, %v188_v45 }
 0x1fe   : > { %807 = vrsqrt.f32 %v182_v44 }
 0x1ff   : > { %v202_v51 = vpop.xlane.xlu0 %201 }
 0x200   : > { %v203_v52 = vsub.f32 %v909_v15, %v202_v51 }
 0x208   : > { %v808_v47 = vpop.eup %807 }
 0x209   : > { %v190_v48 = vmul.f32 %v808_v47, %v189_v46  ;;  %v204_v53 = vmul.f32 %v808_v47, %v203_v52  ;;  %v722_v52 = vld [vmem:[%s901_s21 + $0x6] ss:$0 sm:$0xff] }
 0x20b   : > { %v193_v49 = vsel %vm192_vm6, %v190_v48, 0.0  ;;  %v205_v54 = vsel %vm174_vm4, %v204_v53, 0.0  ;;  %vm349_vm4 = vcmask 64568   ;;  %vm384_vm6 = vcmask 72768  }
 0x20c   : > { %v194_v50 = vadd.f32 %v193_v49, %v159_v32  ;;  %v206_v58 = vadd.f32 %v205_v54, %v171_v40 }
 0x20e   : > { %195 = vst [vmem:[%s897_s20] sm:$0xff] %v194_v50 }
 0x215   : > { %v706_v55 = vld [vmem:[%s897_s20 + $0x3] ss:$0 sm:$0xff] }
 0x216   : > { %v221_v56 = vmul.f32 %v706_v55, %v194_v50  ;;  %v214_v57 = vmul.f32 %v706_v55, %v706_v55  ;;  %v235_v59 = vmul.f32 %v706_v55, %v206_v58 }
 0x218   : > { %222 = vadd.xlane.f32.xlu0 %v221_v56  ;;  %215 = vadd.xlane.f32.xlu1 %v214_v57 }
 0x21c   : > { %236 = vadd.xlane.f32.xlu1 %v235_v59 }
 0x2a5   : > { %v216_v61 = vpop.xlane.xlu1 %215  ;;  %v223_v63 = vpop.xlane.xlu0 %222 }
 0x2a6   : > { %v217_v62 = vsub.f32 %v707_v60, %v216_v61  ;;  %v224_v0 = vsub.f32 %v905_v10, %v223_v63 }
 0x2a8   : > { %809 = vrsqrt.f32 %v217_v62 }
 0x2a9   : > { %v237_v5 = vpop.xlane.xlu1 %236 }
 0x2aa   : > { %v238_v6 = vsub.f32 %v909_v15, %v237_v5  ;;  %v727_v5 = vld [vmem:[%s901_s21 + $0x7] ss:$0 sm:$0xff] }
 0x2b2   : > { %v810_v1 = vpop.eup %809 }
 0x2b3   : > { %v225_v2 = vmul.f32 %v810_v1, %v224_v0  ;;  %v239_v7 = vmul.f32 %v810_v1, %v238_v6 }
 0x2b5   : > { %v228_v3 = vsel %vm227_vm9, %v225_v2, 0.0  ;;  %v240_v8 = vsel %vm209_vm7, %v239_v7, 0.0  ;;  %vm407_vm7 = vcmask 80968  }
 0x2b6   : > { %v229_v4 = vadd.f32 %v228_v3, %v194_v50  ;;  %v241_v13 = vadd.f32 %v240_v8, %v206_v58  ;;  %vm427_vm9 = vmand %vm407_vm7, %vm156_vm2 }
 0x2b8   : > { %230 = vst [vmem:[%s897_s20] sm:$0xff] %v229_v4 }
 0x2bf   : > { %v711_v9 = vld [vmem:[%s897_s20 + $0x4] ss:$0 sm:$0xff] }
 0x2c0   : > { %v256_v11 = vmul.f32 %v711_v9, %v229_v4  ;;  %v249_v12 = vmul.f32 %v711_v9, %v711_v9  ;;  %v270_v14 = vmul.f32 %v711_v9, %v241_v13 }
 0x2c2   : > { %257 = vadd.xlane.f32.xlu1 %v256_v11  ;;  %250 = vadd.xlane.f32.xlu0 %v249_v12 }
 0x2c6   : > { %271 = vadd.xlane.f32.xlu0 %v270_v14 }
 0x34f   : > { %v251_v17 = vpop.xlane.xlu0 %250  ;;  %v258_v19 = vpop.xlane.xlu1 %257 }
 0x350   : > { %v252_v18 = vsub.f32 %v712_v16, %v251_v17  ;;  %v259_v20 = vsub.f32 %v905_v10, %v258_v19  ;;  %v732_v19 = vld [vmem:[%s901_s21 + $0x8] ss:$0 sm:$0xff] }
 0x352   : > { %811 = vrsqrt.f32 %v252_v18 }
 0x353   : > { %v272_v25 = vpop.xlane.xlu0 %271 }
 0x354   : > { %v273_v26 = vsub.f32 %v909_v15, %v272_v25 }
 0x35c   : > { %v812_v21 = vpop.eup %811 }
 0x35d   : > { %v260_v22 = vmul.f32 %v812_v21, %v259_v20  ;;  %v274_v27 = vmul.f32 %v812_v21, %v273_v26 }
 0x35f   : > { %v263_v23 = vsel %vm262_vm12, %v260_v22, 0.0  ;;  %v275_v28 = vsel %vm244_vm10, %v274_v27, 0.0  ;;  %vm432_vm10 = vcmask 89168   ;;  %vm457_vm12 = vcmask 97368  }
 0x360   : > { %v264_v24 = vadd.f32 %v263_v23, %v229_v4  ;;  %v276_v32 = vadd.f32 %v275_v28, %v241_v13  ;;  %vm452_vm2 = vmand %vm432_vm10, %vm191_vm5 }
 0x361   : > { %vm477_vm5 = vmand %vm457_vm12, %vm226_vm8 }
 0x362   : > { %265 = vst [vmem:[%s897_s20] sm:$0xff] %v264_v24 }
 0x369   : > { %v716_v29 = vld [vmem:[%s897_s20 + $0x5] ss:$0 sm:$0xff] }
 0x36a   : > { %v291_v30 = vmul.f32 %v716_v29, %v264_v24  ;;  %v284_v31 = vmul.f32 %v716_v29, %v716_v29  ;;  %v305_v33 = vmul.f32 %v716_v29, %v276_v32 }
 0x36c   : > { %292 = vadd.xlane.f32.xlu0 %v291_v30  ;;  %285 = vadd.xlane.f32.xlu1 %v284_v31  ;;  %v737_v31 = vld [vmem:[%s901_s21 + $0x9] ss:$0 sm:$0xff] }
 0x370   : > { %306 = vadd.xlane.f32.xlu1 %v305_v33 }
 0x3f9   : > { %v286_v35 = vpop.xlane.xlu1 %285  ;;  %v293_v37 = vpop.xlane.xlu0 %292 }
 0x3fa   : > { %v287_v36 = vsub.f32 %v717_v34, %v286_v35  ;;  %v294_v38 = vsub.f32 %v905_v10, %v293_v37 }
 0x3fc   : > { %813 = vrsqrt.f32 %v287_v36 }
 0x3fd   : > { %v307_v43 = vpop.xlane.xlu1 %306 }
 0x3fe   : > { %v308_v44 = vsub.f32 %v909_v15, %v307_v43  ;;  %v742_v43 = vld [vmem:[%s901_s21 + $0xa] ss:$0 sm:$0xff] }
 0x406   : > { %v814_v39 = vpop.eup %813 }
 0x407   : > { %v295_v40 = vmul.f32 %v814_v39, %v294_v38  ;;  %v309_v45 = vmul.f32 %v814_v39, %v308_v44 }
 0x409   : > { %v298_v41 = vsel %vm297_vm15, %v295_v40, 0.0  ;;  %v310_v46 = vsel %vm279_vm13, %v309_v45, 0.0  ;;  %vm482_vm13 = vcmask 105568   ;;  %vm507_vm15 = vcmask 113768  }
 0x40a   : > { %v299_v42 = vadd.f32 %v298_v41, %v264_v24  ;;  %v311_v50 = vadd.f32 %v310_v46, %v276_v32  ;;  %vm502_vm8 = vmand %vm482_vm13, %vm261_vm11 }
 0x40b   : > { %vm527_vm11 = vmand %vm507_vm15, %vm296_vm14  ;;  %vm366_vm14 = vcmask 1047559  }
 0x40c   : > { %300 = vst [vmem:[%s897_s20] sm:$0xff] %v299_v42 }
 0x413   : > { %v721_v47 = vld [vmem:[%s897_s20 + $0x6] ss:$0 sm:$0xff] }
 0x414   : > { %v326_v48 = vmul.f32 %v721_v47, %v299_v42  ;;  %v319_v49 = vmul.f32 %v721_v47, %v721_v47  ;;  %v340_v51 = vmul.f32 %v721_v47, %v311_v50 }
 0x416   : > { %327 = vadd.xlane.f32.xlu1 %v326_v48  ;;  %320 = vadd.xlane.f32.xlu0 %v319_v49 }
 0x41a   : > { %341 = vadd.xlane.f32.xlu0 %v340_v51 }
 0x4a3   : > { %v321_v53 = vpop.xlane.xlu0 %320  ;;  %v328_v55 = vpop.xlane.xlu1 %327 }
 0x4a4   : > { %v322_v54 = vsub.f32 %v722_v52, %v321_v53  ;;  %v329_v56 = vsub.f32 %v905_v10, %v328_v55  ;;  %v747_v55 = vld [vmem:[%s901_s21 + $0xb] ss:$0 sm:$0xff] }
 0x4a6   : > { %815 = vrsqrt.f32 %v322_v54 }
 0x4a7   : > { %v342_v58 = vpop.xlane.xlu0 %341 }
 0x4a8   : > { %v343_v61 = vsub.f32 %v909_v15, %v342_v58 }
 0x4b0   : > { %v816_v57 = vpop.eup %815 }
 0x4b1   : > { %v330_v59 = vmul.f32 %v816_v57, %v329_v56  ;;  %v344_v63 = vmul.f32 %v816_v57, %v343_v61 }
 0x4b3   : > { %v333_v60 = vsel %vm332_vm3, %v330_v59, 0.0  ;;  %v345_v0 = vsel %vm314_vm0, %v344_v63, 0.0  ;;  %vm367_vm0 = vmand %vm349_vm4, %vm366_vm14  ;;  %vm532_vm3 = vcmask 121968  }
 0x4b4   : > { %v948_v62 = vadd.f32 %v333_v60, %v299_v42  ;;  %v346_v1 = vadd.f32 %v345_v0, %v311_v50 }
 0x4b6   : > { %335 = vst [vmem:[%s897_s20] sm:$0xff] %v948_v62 }
 0x4bd   : > { %v953_v2 = vld [vmem:[%s897_s20 + $0x7] ss:$0 sm:$0xff] }
 0x4be   : > { %v375_v3 = vmul.f32 %v953_v2, %v346_v1  ;;  %v354_v4 = vmul.f32 %v953_v2, %v953_v2 }
 0x4c0   : > { %376 = vadd.xlane.f32.xlu0 %v375_v3  ;;  %355 = vadd.xlane.f32.xlu1 %v354_v4 }
 0x54d   : > { %v356_v6 = vpop.xlane.xlu1 %355  ;;  %v377_v8 = vpop.xlane.xlu0 %376 }
 0x54e   : > { %v357_v7 = vsub.f32 %v727_v5, %v356_v6  ;;  %v378_v9 = vsub.f32 %v909_v15, %v377_v8  ;;  %v752_v5 = vld [vmem:[%s901_s21 + $0xc] ss:$0 sm:$0xff] }
 0x550   : > { %817 = vrsqrt.f32 %v357_v7 }
 0x55a   : > { %v960_v11 = vpop.eup %817 }
 0x55b   : > { %v379_v12 = vmul.f32 %v960_v11, %v378_v9 }
 0x55d   : > { %v380_v13 = vsel %vm349_vm4, %v379_v12, 0.0  ;;  %vm552_vm4 = vmand %vm532_vm3, %vm331_vm1 }
 0x55e   : > { %v381_v14 = vadd.f32 %v380_v13, %v346_v1 }
 0x560   : > { %730 = vst [vmem:[%s897_s20 + $0x8] sm:$0xff] %v381_v14 }
 0x567   : > { %v731_v16 = vld [vmem:[%s897_s20 + $0x8] ss:$0 sm:$0xff] }
 0x568   : > { %v398_v17 = vmul.f32 %v731_v16, %v381_v14  ;;  %v389_v18 = vmul.f32 %v731_v16, %v731_v16 }
 0x56a   : > { %399 = vadd.xlane.f32.xlu0 %v398_v17  ;;  %390 = vadd.xlane.f32.xlu1 %v389_v18 }
 0x5f7   : > { %v391_v20 = vpop.xlane.xlu1 %390  ;;  %v400_v22 = vpop.xlane.xlu0 %399 }
 0x5f8   : > { %v392_v21 = vsub.f32 %v732_v19, %v391_v20  ;;  %v401_v23 = vsub.f32 %v909_v15, %v400_v22  ;;  %v757_v20 = vld [vmem:[%s901_s21 + $0xd] ss:$0 sm:$0xff] }
 0x5fa   : > { %819 = vrsqrt.f32 %v392_v21 }
 0x604   : > { %v820_v24 = vpop.eup %819 }
 0x605   : > { %v402_v25 = vmul.f32 %v820_v24, %v401_v23 }
 0x607   : > { %v403_v26 = vsel %vm384_vm6, %v402_v25, 0.0  ;;  %vm557_vm6 = vcmask 130168  }
 0x608   : > { %v404_v27 = vadd.f32 %v403_v26, %v381_v14  ;;  %vm577_vm1 = vmand %vm557_vm6, %vm366_vm14 }
 0x60a   : > { %735 = vst [vmem:[%s897_s20 + $0x8] sm:$0xff] %v404_v27 }
 0x611   : > { %v736_v28 = vld [vmem:[%s897_s20 + $0x9] ss:$0 sm:$0xff] }
 0x612   : > { %v421_v29 = vmul.f32 %v736_v28, %v404_v27  ;;  %v412_v30 = vmul.f32 %v736_v28, %v736_v28 }
 0x614   : > { %422 = vadd.xlane.f32.xlu0 %v421_v29  ;;  %413 = vadd.xlane.f32.xlu1 %v412_v30 }
 0x6a1   : > { %v414_v32 = vpop.xlane.xlu1 %413  ;;  %v423_v34 = vpop.xlane.xlu0 %422 }
 0x6a2   : > { %v415_v33 = vsub.f32 %v737_v31, %v414_v32  ;;  %v424_v35 = vsub.f32 %v909_v15, %v423_v34  ;;  %v361_v32 = vmul.f32 %v953_v2, %v948_v62 }
 0x6a4   : > { %821 = vrsqrt.f32 %v415_v33  ;;  %v762_v33 = vld [vmem:[%s901_s21 + $0xe] ss:$0 sm:$0xff] }
 0x6ae   : > { %v822_v36 = vpop.eup %821 }
 0x6af   : > { %v425_v37 = vmul.f32 %v822_v36, %v424_v35 }
 0x6b1   : > { %v428_v38 = vsel %vm427_vm9, %v425_v37, 0.0 }
 0x6b2   : > { %v429_v39 = vadd.f32 %v428_v38, %v404_v27 }
 0x6b4   : > { %740 = vst [vmem:[%s897_s20 + $0x8] sm:$0xff] %v429_v39 }
 0x6bb   : > { %v741_v40 = vld [vmem:[%s897_s20 + $0xa] ss:$0 sm:$0xff] }
 0x6bc   : > { %v446_v41 = vmul.f32 %v741_v40, %v429_v39  ;;  %v437_v42 = vmul.f32 %v741_v40, %v741_v40 }
 0x6be   : > { %447 = vadd.xlane.f32.xlu0 %v446_v41  ;;  %438 = vadd.xlane.f32.xlu1 %v437_v42 }
 0x74b   : > { %v439_v44 = vpop.xlane.xlu1 %438  ;;  %v448_v46 = vpop.xlane.xlu0 %447 }
 0x74c   : > { %v440_v45 = vsub.f32 %v742_v43, %v439_v44  ;;  %v449_v47 = vsub.f32 %v909_v15, %v448_v46 }
 0x74e   : > { %823 = vrsqrt.f32 %v440_v45 }
 0x758   : > { %v824_v48 = vpop.eup %823 }
 0x759   : > { %v450_v49 = vmul.f32 %v824_v48, %v449_v47  ;;  %v767_v47 = vld [vmem:[%s901_s21 + $0xf] ss:$0 sm:$0xff] }
 0x75b   : > { %v453_v50 = vsel %vm452_vm2, %v450_v49, 0.0 }
 0x75c   : > { %v454_v51 = vadd.f32 %v453_v50, %v429_v39 }
 0x75e   : > { %745 = vst [vmem:[%s897_s20 + $0x8] sm:$0xff] %v454_v51 }
 0x765   : > { %v746_v52 = vld [vmem:[%s897_s20 + $0xb] ss:$0 sm:$0xff] }
 0x766   : > { %v471_v53 = vmul.f32 %v746_v52, %v454_v51  ;;  %v462_v54 = vmul.f32 %v746_v52, %v746_v52 }
 0x768   : > { %472 = vadd.xlane.f32.xlu0 %v471_v53  ;;  %463 = vadd.xlane.f32.xlu1 %v462_v54 }
 0x7f5   : > { %v464_v56 = vpop.xlane.xlu1 %463  ;;  %v473_v58 = vpop.xlane.xlu0 %472 }
 0x7f6   : > { %v465_v57 = vsub.f32 %v747_v55, %v464_v56  ;;  %v474_v59 = vsub.f32 %v909_v15, %v473_v58 }
 0x7f8   : > { %825 = vrsqrt.f32 %v465_v57 }
 0x802   : > { %v826_v60 = vpop.eup %825 }
 0x803   : > { %v475_v61 = vmul.f32 %v826_v60, %v474_v59 }
 0x805   : > { %v478_v63 = vsel %vm477_vm5, %v475_v61, 0.0 }
 0x806   : > { %v479_v0 = vadd.f32 %v478_v63, %v454_v51 }
 0x808   : > { %750 = vst [vmem:[%s897_s20 + $0x8] sm:$0xff] %v479_v0 }
 0x80f   : > { %v751_v1 = vld [vmem:[%s897_s20 + $0xc] ss:$0 sm:$0xff] }
 0x810   : > { %v496_v3 = vmul.f32 %v751_v1, %v479_v0  ;;  %v487_v4 = vmul.f32 %v751_v1, %v751_v1 }
 0x812   : > { %497 = vadd.xlane.f32.xlu0 %v496_v3  ;;  %488 = vadd.xlane.f32.xlu1 %v487_v4 }
 0x89f   : > { %v489_v6 = vpop.xlane.xlu1 %488  ;;  %v498_v8 = vpop.xlane.xlu0 %497 }
 0x8a0   : > { %v490_v7 = vsub.f32 %v752_v5, %v489_v6  ;;  %v499_v9 = vsub.f32 %v909_v15, %v498_v8 }
 0x8a2   : > { %827 = vrsqrt.f32 %v490_v7 }
 0x8ac   : > { %v828_v12 = vpop.eup %827 }
 0x8ad   : > { %v500_v13 = vmul.f32 %v828_v12, %v499_v9 }
 0x8af   : > { %v503_v14 = vsel %vm502_vm8, %v500_v13, 0.0 }
 0x8b0   : > { %v504_v16 = vadd.f32 %v503_v14, %v479_v0 }
 0x8b2   : > { %755 = vst [vmem:[%s897_s20 + $0x8] sm:$0xff] %v504_v16 }
 0x8b9   : > { %v756_v17 = vld [vmem:[%s897_s20 + $0xd] ss:$0 sm:$0xff] }
 0x8ba   : > { %v521_v18 = vmul.f32 %v756_v17, %v504_v16  ;;  %v512_v19 = vmul.f32 %v756_v17, %v756_v17 }
 0x8bc   : > { %522 = vadd.xlane.f32.xlu0 %v521_v18  ;;  %513 = vadd.xlane.f32.xlu1 %v512_v19 }
 0x949   : > { %v514_v21 = vpop.xlane.xlu1 %513  ;;  %v523_v23 = vpop.xlane.xlu0 %522 }
 0x94a   : > { %v515_v22 = vsub.f32 %v757_v20, %v514_v21  ;;  %v524_v24 = vsub.f32 %v909_v15, %v523_v23 }
 0x94c   : > { %829 = vrsqrt.f32 %v515_v22 }
 0x956   : > { %v830_v25 = vpop.eup %829 }
 0x957   : > { %v525_v26 = vmul.f32 %v830_v25, %v524_v24 }
 0x959   : > { %v528_v27 = vsel %vm527_vm11, %v525_v26, 0.0 }
 0x95a   : > { %v529_v28 = vadd.f32 %v528_v27, %v504_v16 }
 0x95c   : > { %760 = vst [vmem:[%s897_s20 + $0x8] sm:$0xff] %v529_v28 }
 0x963   : > { %v761_v29 = vld [vmem:[%s897_s20 + $0xe] ss:$0 sm:$0xff] }
 0x964   : > { %v546_v30 = vmul.f32 %v761_v29, %v529_v28  ;;  %v537_v31 = vmul.f32 %v761_v29, %v761_v29 }
 0x966   : > { %547 = vadd.xlane.f32.xlu0 %v546_v30  ;;  %538 = vadd.xlane.f32.xlu1 %v537_v31 }
 0x96a   : > { %362 = vadd.xlane.f32.xlu0 %v361_v32 }
 0x9f3   : > { %v548_v34 = vpop.xlane.xlu0 %547  ;;  %v539_v35 = vpop.xlane.xlu1 %538 }
 0x9f4   : > { %v540_v36 = vsub.f32 %v762_v33, %v539_v35 }
 0x9f6   : > { %831 = vrsqrt.f32 %v540_v36 }
 0x9f7   : > { %v363_v37 = vpop.xlane.xlu0 %362 }
 0x9f8   : > { %v364_v38 = vsub.f32 %v905_v10, %v363_v37  ;;  %v549_v10 = vsub.f32 %v909_v15, %v548_v34 }
 0x9fa   : > { %v365_v39 = vmul.f32 %v960_v11, %v364_v38 }
 0x9fc   : > { %v368_v2 = vsel %vm367_vm0, %v365_v39, 0.0 }
 0x9fd   : > { %v369_v40 = vadd.f32 %v368_v2, %v948_v62 }
 0x9ff   : > { %370 = vst [vmem:[%s897_s20] sm:$0xff] %v369_v40  ;;  %621 = vst [vmem:[%s1006_s25] sm:$0xff] %v369_v40 }
 0xa00   : > { %v832_v41 = vpop.eup %831 }
 0xa01   : > { %v550_v42 = vmul.f32 %v832_v41, %v549_v10 }
 0xa03   : > { %v553_v11 = vsel %vm552_vm4, %v550_v42, 0.0 }
 0xa04   : > { %v554_v43 = vadd.f32 %v553_v11, %v529_v28 }
 0xa06   : > { %765 = vst [vmem:[%s897_s20 + $0x8] sm:$0xff] %v554_v43 }
 0xa0d   : > { %v766_v44 = vld [vmem:[%s897_s20 + $0xf] ss:$0 sm:$0xff] }
 0xa0e   : > { %v562_v45 = vmul.f32 %v766_v44, %v766_v44  ;;  %v571_v46 = vmul.f32 %v766_v44, %v554_v43 }
 0xa10   : > { %563 = vadd.xlane.f32.xlu1 %v562_v45 }
 0xa14   : > { %572 = vadd.xlane.f32.xlu1 %v571_v46 }
 0xa9d   : > { %v564_v62 = vpop.xlane.xlu1 %563 }
 0xa9e   : > { %v565_v48 = vsub.f32 %v767_v47, %v564_v62 }
 0xaa0   : > { %833 = vrsqrt.f32 %v565_v48 }
 0xaa1   : > { %v573_v49 = vpop.xlane.xlu1 %572 }
 0xaa2   : > { %v574_v50 = vsub.f32 %v909_v15, %v573_v49 }
 0xaaa   : > { %v834_v51 = vpop.eup %833 }
 0xaab   : > { %v575_v52 = vmul.f32 %v834_v51, %v574_v50 }
 0xaad   : > { %v578_v53 = vsel %vm577_vm1, %v575_v52, 0.0 }
 0xaae   : > { %v579_v54 = vadd.f32 %v578_v53, %v554_v43 }
 0xab0   : > { %770 = vst [vmem:[%s897_s20 + $0x8] sm:$0xff] %v579_v54  ;;  %623 = vst [vmem:[%s1006_s25 + $0x8] sm:$0xff] %v579_v54 }
 0xab1 PF: > { %s7_s8 = sadd.s32 1, %s857_s8   ;;  %s1031_s6 = smov %s853_s7 }
 0xab2   : > { %p4_p5 = scmp.ge.s32.totalorder %s7_s8, 18   ;;  %s1032_s7 = smov %s1034_s10 }
 0xab4   :  { %6 = sbr.rel (!%p4_p5) target bundleno = 2 (0x2), region = 197 }

// kernel: custom-call.46
= control target key start
LH: loop header
LB: loop body
LE: loop exit
PB: predicated region body
PF: predicated region fallthrough
CT: control target
= control target key end

     0   :  { %s552_s6 = smov 0   ;;  %s554_s7 = smov 0   ;;  %s641_s0 = inlined_call_operand.vmem [shape: f32[16,1,16,16], index: 0, kind: input, shape index: {}]   ;;  %s642_s1 = inlined_call_operand.vmem [shape: f32[16,1,16,16], index: 1, kind: output, shape index: {}]  }
   0x1   :  { %s556_s8 = smov 0  }
   0x2 LB: > { %s468_s9 = sadd.s32 4294967295, %s538_s8   ;;  %s33_s10 = sadd.s32 1, %s534_s7  ;;  %s538_s8 = sphi %s556_s8, %s7_s8   ;;  %s534_s7 = sphi %s554_s7, %s644_s7   ;;  %s530_s6 = sphi %s552_s6, %s643_s6  }
   0x3   : > { %p35_p0 = scmp.ge.s32.totalorder %s33_s10, 16  ;;  %p470_p1 = scmp.ge.s32.totalorder %s538_s8, 16 }
   0x4   : > { %s49_s11 = sand.u32 (!%p470_p1), 1, %s538_s8   ;;  %s484_s12 = sshll.u32 (!%p470_p1), %s534_s7, 4 }
   0x5   : > { %s646_s10 = smov (%p35_p0, %s33_s10), 0  ;;  %47 = sbr.rel (%p470_p1) target bundleno = 12 (0xc), region = 16 }
   0x6   : > { %s471_s13 = sshll.u32 (!%p470_p1), %s49_s11, 4  ;;  %s58_s16 = scalar_lea.vmem (!%p470_p1), %s641_s0, %s484_s12 }
   0x7   : > { %v88_v0 = vld [vmem:[%s58_s16] sm:$0xff] (!%p470_p1)  ;;  %v90_v1 = vld [vmem:[%s58_s16 + $0x8] sm:$0xff] (!%p470_p1)  ;;  %s51_s17 = scalar_lea.vmem (!%p470_p1), [#allocation0], %s471_s13 }
   0x8   : > { %89 = vst [vmem:[%s51_s17] sm:$0xff] (!%p470_p1), %v88_v0  ;;  %91 = vst [vmem:[%s51_s17 + $0x8] sm:$0xff] (!%p470_p1), %v90_v1 }
   0xc PF: > { %p474_p2 = scmp.ge.s32.totalorder %s538_s8, 1  ;;  %p96_p3 = scmp.lt.s32.totalorder %s538_s8, 17 }
   0xe   : > { %p97_p4 = pnand %p474_p2, %p96_p3 }
  0x10   : > { %100 = sbr.rel (%p97_p4) target bundleno = 2373 (0x945), region = 54 }
  0x17   : > { %s103_s18 = sand.u32 1, %s468_s9   ;;  %v114_v2 = vlaneseq  ;;  %v540_v11 = vmov -1.0   ;;  %v541_v55 = vmov 0.0   ;;  %s485_s21 = sshll.u32 %s530_s6, 4 }
  0x18   : > { %s475_s19 = sshll.u32 %s103_s18, 4  ;;  %s368_s24 = scalar_lea.vmem %s642_s1, %s485_s21 }
  0x19   : > { %v579_v3 = vand.u32 127, %v114_v2  ;;  %v118_v4 = vshrl.u32 %v114_v2, 7  ;;  %s581_s20 = scalar_lea.vmem [#allocation0], %s475_s19 }
  0x1a   : > { %v121_v5 = vld [vmem:[%s581_s20] sm:$0xff]  ;;  %v477_v38 = vld [vmem:[%s581_s20 + $0x8] sm:$0xff] }
  0x1b   : > { %vm120_vm0 = vcmp.eq.s32.totalorder %v118_v4, %v579_v3  ;;  %vm116_vm1 = vcmp.lt.s32.totalorder %v579_v3, 16  ;;  %vm125_vm2 = vcmp.ge.s32.totalorder %v118_v4, %v579_v3  ;;  %vm155_vm4 = vcmp.eq.s32.totalorder %v579_v3, 0 }
  0x1c   : > { %v122_v6 = vsel %vm120_vm0, %v121_v5, 0.0  ;;  %vm126_vm3 = vmand %vm125_vm2, %vm116_vm1  ;;  %vm152_vm5 = vcmp.eq.s32.totalorder %v579_v3, %v118_v4  ;;  %v156_v12 = vsel %vm155_vm4, 1.0, %v540_v11  ;;  %vm170_vm6 = vcmp.eq.s32.totalorder %v579_v3, 1 }
  0x1d   : > { %123 = vadd.xlane.f32.xlu0 %v122_v6  ;;  %v127_v8 = vsel %vm126_vm3, %v121_v5, 0.0  ;;  %v157_v13 = vsel %vm152_vm5, %v156_v12, 0.0  ;;  %vm180_vm7 = vcmp.eq.s32.totalorder %v579_v3, 2  ;;  %vm190_vm8 = vcmp.eq.s32.totalorder %v579_v3, 3 }
  0x1e   : > { %vm200_vm9 = vcmp.eq.s32.totalorder %v579_v3, 4  ;;  %v135_v33 = vadd.s32 8, %v118_v4  ;;  %vm210_vm11 = vcmp.eq.s32.totalorder %v579_v3, 5  ;;  %vm220_vm14 = vcmp.eq.s32.totalorder %v579_v3, 6 }
  0x1f   : > { %vm230_vm0 = vcmp.eq.s32.totalorder %v579_v3, 7  ;;  %vm254_vm2 = vcmp.eq.s32.totalorder %v579_v3, 9  ;;  %vm268_vm3 = vcmp.eq.s32.totalorder %v579_v3, 10  ;;  %vm282_vm4 = vcmp.eq.s32.totalorder %v579_v3, 11 }
  0x20   : > { %vm136_vm10 = vcmp.eq.s32.totalorder %v135_v33, %v579_v3  ;;  %vm141_vm12 = vcmp.ge.s32.totalorder %v135_v33, %v579_v3  ;;  %vm163_vm15 = vcmp.eq.s32.totalorder %v579_v3, %v135_v33  ;;  %vm296_vm5 = vcmp.eq.s32.totalorder %v579_v3, 12 }
  0x21   : > { %v138_v39 = vsel %vm136_vm10, %v477_v38, 0.0  ;;  %vm142_vm13 = vmand %vm141_vm12, %vm116_vm1  ;;  %v164_v56 = vsel %vm163_vm15, -1.0, %v541_v55  ;;  %vm240_vm1 = vcmp.eq.s32.totalorder %v579_v3, 8 }
  0x22   : > { %v143_v46 = vsel %vm142_vm13, %v477_v38, 0.0 }
  0xaa   : > { %v585_v7 = vpop.xlane.xlu0 %123 }
  0xab   : > { %512 = vrcp.f32 %v585_v7  ;;  %vm349_vm10 = vweird.f32 %v585_v7 }
  0xb5   : > { %v592_v9 = vpop.eup %512 }
  0xb6   : > { %v129_v10 = vmul.f32 %v592_v9, %v127_v8 }
  0xb8   : > { %130 = vst [vmem:[#allocation2] sm:$0xff] %v129_v10 }
  0xbf   : > { %v166_v14 = vld [vmem:[#allocation2 + $0x1] ss:$0 sm:$0xff]  ;;  %v176_v17 = vld [vmem:[#allocation2 + $0x2] ss:$0 sm:$0xff]  ;;  %v186_v22 = vld [vmem:[#allocation2 + $0x3] ss:$0 sm:$0xff] }
  0xc0   : > { %v167_v15 = vxor.u32 2147483648, %v166_v14  ;;  %v177_v19 = vxor.u32 2147483648, %v176_v17  ;;  %v187_v24 = vxor.u32 2147483648, %v186_v22  ;;  %v196_v27 = vld [vmem:[#allocation2 + $0x4] ss:$0 sm:$0xff] }
  0xc1   : > { %v197_v29 = vxor.u32 2147483648, %v196_v27  ;;  %v206_v32 = vld [vmem:[#allocation2 + $0x5] ss:$0 sm:$0xff]  ;;  %v216_v40 = vld [vmem:[#allocation2 + $0x6] ss:$0 sm:$0xff] }
  0xc2   : > { %v171_v16 = vmul.f32 %v167_v15, %v157_v13  ;;  %v207_v35 = vxor.u32 2147483648, %v206_v32  ;;  %v217_v42 = vxor.u32 2147483648, %v216_v40  ;;  %v226_v49 = vld [vmem:[#allocation2 + $0x7] ss:$0 sm:$0xff] }
  0xc3   : > { %v227_v52 = vxor.u32 2147483648, %v226_v49 }
  0xc4   : > { %172 = vadd.xlane.f32.xlu0 %v171_v16 }
 0x151   : > { %v173_v18 = vpop.xlane.xlu0 %172 }
 0x152   : > { %v174_v20 = vsel %vm170_vm6, %v173_v18, %v157_v13  ;;  %vm310_vm6 = vcmp.eq.s32.totalorder %v579_v3, 13 }
 0x153   : > { %v181_v21 = vmul.f32 %v177_v19, %v174_v20 }
 0x155   : > { %182 = vadd.xlane.f32.xlu1 %v181_v21 }
 0x1e2   : > { %v183_v23 = vpop.xlane.xlu1 %182 }
 0x1e3   : > { %v184_v25 = vsel %vm180_vm7, %v183_v23, %v174_v20  ;;  %vm324_vm7 = vcmp.eq.s32.totalorder %v579_v3, 14 }
 0x1e4   : > { %v191_v26 = vmul.f32 %v187_v24, %v184_v25 }
 0x1e6   : > { %192 = vadd.xlane.f32.xlu1 %v191_v26 }
 0x273   : > { %v193_v28 = vpop.xlane.xlu1 %192 }
 0x274   : > { %v194_v30 = vsel %vm190_vm8, %v193_v28, %v184_v25  ;;  %vm338_vm8 = vcmp.eq.s32.totalorder %v579_v3, 15 }
 0x275   : > { %v201_v31 = vmul.f32 %v197_v29, %v194_v30 }
 0x277   : > { %202 = vadd.xlane.f32.xlu0 %v201_v31 }
 0x304   : > { %v203_v34 = vpop.xlane.xlu0 %202 }
 0x305   : > { %v204_v36 = vsel %vm200_vm9, %v203_v34, %v194_v30 }
 0x306   : > { %v211_v37 = vmul.f32 %v207_v35, %v204_v36 }
 0x308   : > { %212 = vadd.xlane.f32.xlu1 %v211_v37 }
 0x30c   : > { %139 = vadd.xlane.f32.xlu1 %v138_v39 }
 0x395   : > { %v213_v41 = vpop.xlane.xlu1 %212 }
 0x396   : > { %v214_v43 = vsel %vm210_vm11, %v213_v41, %v204_v36 }
 0x397   : > { %v221_v44 = vmul.f32 %v217_v42, %v214_v43 }
 0x399   : > { %222 = vadd.xlane.f32.xlu0 %v221_v44  ;;  %v604_v45 = vpop.xlane.xlu1 %139 }
 0x39a   : > { %514 = vrcp.f32 %v604_v45  ;;  %vm354_vm9 = vweird.f32 %v604_v45 }
 0x3a4   : > { %v610_v47 = vpop.eup %514 }
 0x3a5   : > { %v145_v48 = vmul.f32 %v610_v47, %v143_v46 }
 0x3a7   : > { %146 = vst [vmem:[#allocation2 + $0x8] sm:$0xff] %v145_v48 }
 0x3ae   : > { %v236_v50 = vld [vmem:[#allocation2 + $0x8] ss:$0 sm:$0xff]  ;;  %v250_v61 = vld [vmem:[#allocation2 + $0x9] ss:$0 sm:$0xff]  ;;  %v264_v6 = vld [vmem:[#allocation2 + $0xa] ss:$0 sm:$0xff] }
 0x3af   : > { %v237_v53 = vxor.u32 2147483648, %v236_v50  ;;  %v251_v0 = vxor.u32 2147483648, %v250_v61  ;;  %v265_v11 = vxor.u32 2147483648, %v264_v6  ;;  %v278_v16 = vld [vmem:[#allocation2 + $0xb] ss:$0 sm:$0xff] }
 0x3b0   : > { %v279_v19 = vxor.u32 2147483648, %v278_v16  ;;  %v292_v24 = vld [vmem:[#allocation2 + $0xc] ss:$0 sm:$0xff]  ;;  %v306_v32 = vld [vmem:[#allocation2 + $0xd] ss:$0 sm:$0xff] }
 0x3b1   : > { %v245_v58 = vmul.f32 %v237_v53, %v164_v56  ;;  %v293_v27 = vxor.u32 2147483648, %v292_v24  ;;  %v307_v35 = vxor.u32 2147483648, %v306_v32  ;;  %v320_v40 = vld [vmem:[#allocation2 + $0xe] ss:$0 sm:$0xff]  ;;  %v334_v50 = vld [vmem:[#allocation2 + $0xf] ss:$0 sm:$0xff] }
 0x426   : > { %v223_v51 = vpop.xlane.xlu0 %222 }
 0x427   : > { %v224_v54 = vsel %vm220_vm14, %v223_v51, %v214_v43  ;;  %v321_v43 = vxor.u32 2147483648, %v320_v40 }
 0x428   : > { %v231_v57 = vmul.f32 %v227_v52, %v224_v54 }
 0x42a   : > { %232 = vadd.xlane.f32.xlu0 %v231_v57 }
 0x42e   : > { %246 = vadd.xlane.f32.xlu0 %v245_v58 }
 0x4b7   : > { %v233_v59 = vpop.xlane.xlu0 %232 }
 0x4b8   : > { %v234_v60 = vsel %vm230_vm0, %v233_v59, %v224_v54 }
 0x4b9   : > { %v241_v62 = vmul.f32 %v237_v53, %v234_v60  ;;  %v335_v53 = vxor.u32 2147483648, %v334_v50 }
 0x4bb   : > { %v247_v63 = vpop.xlane.xlu0 %246  ;;  %242 = vadd.xlane.f32.xlu1 %v241_v62 }
 0x4bc   : > { %v248_v1 = vsel %vm240_vm1, %v247_v63, %v164_v56 }
 0x4bd   : > { %v259_v2 = vmul.f32 %v251_v0, %v248_v1 }
 0x4bf   : > { %260 = vadd.xlane.f32.xlu0 %v259_v2 }
 0x548   : > { %v243_v4 = vpop.xlane.xlu1 %242 }
 0x549   : > { %v244_v5 = vsel %vm240_vm1, %v243_v4, %v234_v60 }
 0x54a   : > { %v255_v8 = vmul.f32 %v251_v0, %v244_v5 }
 0x54c   : > { %v261_v10 = vpop.xlane.xlu0 %260  ;;  %256 = vadd.xlane.f32.xlu1 %v255_v8 }
 0x54d   : > { %v262_v12 = vsel %vm254_vm2, %v261_v10, %v248_v1 }
 0x54e   : > { %v273_v13 = vmul.f32 %v265_v11, %v262_v12 }
 0x550   : > { %274 = vadd.xlane.f32.xlu0 %v273_v13 }
 0x5d9   : > { %v257_v14 = vpop.xlane.xlu1 %256 }
 0x5da   : > { %v258_v15 = vsel %vm254_vm2, %v257_v14, %v244_v5 }
 0x5db   : > { %v269_v17 = vmul.f32 %v265_v11, %v258_v15 }
 0x5dd   : > { %v275_v18 = vpop.xlane.xlu0 %274  ;;  %270 = vadd.xlane.f32.xlu1 %v269_v17 }
 0x5de   : > { %v276_v20 = vsel %vm268_vm3, %v275_v18, %v262_v12 }
 0x5df   : > { %v287_v21 = vmul.f32 %v279_v19, %v276_v20 }
 0x5e1   : > { %288 = vadd.xlane.f32.xlu0 %v287_v21 }
 0x66a   : > { %v271_v22 = vpop.xlane.xlu1 %270 }
 0x66b   : > { %v272_v23 = vsel %vm268_vm3, %v271_v22, %v258_v15 }
 0x66c   : > { %v283_v25 = vmul.f32 %v279_v19, %v272_v23 }
 0x66e   : > { %v289_v26 = vpop.xlane.xlu0 %288  ;;  %284 = vadd.xlane.f32.xlu1 %v283_v25 }
 0x66f   : > { %v290_v28 = vsel %vm282_vm4, %v289_v26, %v276_v20 }
 0x670   : > { %v301_v29 = vmul.f32 %v293_v27, %v290_v28 }
 0x672   : > { %302 = vadd.xlane.f32.xlu0 %v301_v29 }
 0x6fb   : > { %v285_v30 = vpop.xlane.xlu1 %284 }
 0x6fc   : > { %v286_v31 = vsel %vm282_vm4, %v285_v30, %v272_v23 }
 0x6fd   : > { %v297_v33 = vmul.f32 %v293_v27, %v286_v31 }
 0x6ff   : > { %v303_v34 = vpop.xlane.xlu0 %302  ;;  %298 = vadd.xlane.f32.xlu1 %v297_v33 }
 0x700   : > { %v304_v36 = vsel %vm296_vm5, %v303_v34, %v290_v28 }
 0x701   : > { %v315_v37 = vmul.f32 %v307_v35, %v304_v36 }
 0x703   : > { %316 = vadd.xlane.f32.xlu0 %v315_v37 }
 0x78c   : > { %v299_v38 = vpop.xlane.xlu1 %298 }
 0x78d   : > { %v300_v39 = vsel %vm296_vm5, %v299_v38, %v286_v31 }
 0x78e   : > { %v311_v41 = vmul.f32 %v307_v35, %v300_v39 }
 0x790   : > { %v317_v42 = vpop.xlane.xlu0 %316  ;;  %312 = vadd.xlane.f32.xlu1 %v311_v41 }
 0x791   : > { %v318_v44 = vsel %vm310_vm6, %v317_v42, %v304_v36 }
 0x792   : > { %v329_v46 = vmul.f32 %v321_v43, %v318_v44 }
 0x794   : > { %330 = vadd.xlane.f32.xlu0 %v329_v46 }
 0x81d   : > { %v313_v48 = vpop.xlane.xlu1 %312 }
 0x81e   : > { %v314_v49 = vsel %vm310_vm6, %v313_v48, %v300_v39 }
 0x81f   : > { %v325_v51 = vmul.f32 %v321_v43, %v314_v49 }
 0x821   : > { %v331_v52 = vpop.xlane.xlu0 %330  ;;  %326 = vadd.xlane.f32.xlu1 %v325_v51 }
 0x822   : > { %v332_v54 = vsel %vm324_vm7, %v331_v52, %v318_v44 }
 0x823   : > { %v343_v55 = vmul.f32 %v335_v53, %v332_v54 }
 0x825   : > { %344 = vadd.xlane.f32.xlu0 %v343_v55 }
 0x8ae   : > { %v327_v56 = vpop.xlane.xlu1 %326 }
 0x8af   : > { %v328_v57 = vsel %vm324_vm7, %v327_v56, %v314_v49 }
 0x8b0   : > { %v339_v58 = vmul.f32 %v335_v53, %v328_v57 }
 0x8b2   : > { %v345_v59 = vpop.xlane.xlu0 %344  ;;  %340 = vadd.xlane.f32.xlu1 %v339_v58 }
 0x8b3   : > { %v346_v60 = vsel %vm338_vm8, %v345_v59, %v332_v54 }
 0x8b4   : > { %v353_v61 = vmul.f32 %v610_v47, %v346_v60 }
 0x8b6   : > { %v355_v62 = vsel %vm354_vm9, %v346_v60, %v353_v61 }
 0x8b7   : > { %401 = vst [vmem:[%s368_s24 + $0x8] sm:$0xff] %v355_v62 }
 0x93f   : > { %v341_v63 = vpop.xlane.xlu1 %340 }
 0x940   : > { %v342_v0 = vsel %vm338_vm8, %v341_v63, %v328_v57 }
 0x941   : > { %v348_v1 = vmul.f32 %v592_v9, %v342_v0 }
 0x943   : > { %v350_v3 = vsel %vm349_vm10, %v342_v0, %v348_v1 }
 0x944   : > { %399 = vst [vmem:[%s368_s24] sm:$0xff] %v350_v3 }
 0x945 PF: > { %s7_s8 = sadd.s32 1, %s538_s8   ;;  %s643_s6 = smov %s534_s7 }
 0x946   : > { %p4_p5 = scmp.ge.s32.totalorder %s7_s8, 18   ;;  %s644_s7 = smov %s646_s10 }
 0x948   :  { %6 = sbr.rel (!%p4_p5) target bundleno = 2 (0x2), region = 136 }

// kernel: custom-call.16
= control target key start
LH: loop header
LB: loop body
LE: loop exit
PB: predicated region body
PF: predicated region fallthrough
CT: control target
= control target key end

     0   :  { %s2084_s0 = inlined_call_operand.vmem [shape: f32[16,8,8], index: 0, kind: input, shape index: {}]   ;;  %s2085_s1 = inlined_call_operand.vmem [shape: f32[16,8,8], index: 1, kind: input, shape index: {}]   ;;  %s2086_s2 = inlined_call_operand.vmem [shape: f32[16,8,8], index: 2, kind: input, shape index: {}]   ;;  %s2087_s3 = inlined_call_operand.vmem [shape: f32[16,8,8], index: 3, kind: input, shape index: {}]   ;;  %s2088_s4 = inlined_call_operand.vmem [shape: f32[16,8], index: 4, kind: output, shape index: {0}]   ;;  %s2089_s5 = inlined_call_operand.vmem [shape: f32[16,8], index: 5, kind: output, shape index: {1}]   ;;  %s2090_s6 = inlined_call_operand.hbm [shape: f32[16,8,8], index: 6, kind: output, shape index: {2}]   ;;  %s2091_s7 = inlined_call_operand.hbm [shape: f32[16,8,8], index: 7, kind: output, shape index: {3}]   ;;  %s2092_s8 = inlined_call_operand.hbm [shape: f32[16,8,8], index: 8, kind: output, shape index: {4}]   ;;  %s2093_s9 = inlined_call_operand.hbm [shape: f32[16,8,8], index: 9, kind: output, shape index: {5}]  }
   0x1   :  { %2094 = sst [smem:[#allocation30_spill]] %s2084_s0 }
   0x2   :  { %11 = vsyncpa [#allocation7], 0 }
   0x3   :  { %13 = vsyncpa [#allocation7 + $0x1], 0 }
   0x4   :  { %14 = vsyncpa [#allocation9], 0 }
   0x5   :  { %16 = vsyncpa [#allocation9 + $0x1], 0 }
   0x6   :  { %17 = vsyncpa [#allocation12], 0 }
   0x7   :  { %19 = vsyncpa [#allocation12 + $0x1], 0  ;;  %s1713_s30 = smov 0   ;;  %s1715_s10 = smov 0  }
   0x8   :  { %s1717_s11 = smov 0  }
   0x9 LB: > { %s1729_s12 = sadd.s32 4294967295, %s1646_s11   ;;  %s1733_s14 = sadd.s32 1, %s1646_s11   ;;  %s1646_s11 = sphi %s1717_s11, %s2111_s11   ;;  %s1642_s10 = sphi %s1715_s10, %s2110_s10   ;;  %s1638_s30 = sphi %s1713_s30, %s2109_s30  }
   0xa   : > { %s29_s15 = sshrl.u32 %s1646_s11, 3  ;;  %s30_s16 = sshrl.u32 %s1733_s14, 3 }
   0xb   : > { %s34_s17 = sadd.s32 1, %s1642_s10  ;;  %s31_s18 = ssub.s32 %s29_s15, %s30_s16 }
   0xc   : > { %p44_p0 = scmp.ne.s32.totalorder %s1642_s10, %s1638_s30  ;;  %p32_p1 = scmp.eq.s32.totalorder %s31_s18, 0 }
   0xd   : > { %p45_p2 = scmp.eq.s32.totalorder %s1729_s12, 15  ;;  %p1394_p4 = scmp.ge.s32.totalorder %s1646_s11, 16 }
   0xe   : > { %s1742_s19 = scalar_select %p32_p1, %s1642_s10, %s34_s17  }
   0xf   : > { %p1744_p3 = por %p45_p2, %p44_p0  ;;  %95 = sbr.rel (%p1394_p4) target bundleno = 27 (0x1b), region = 16 }
  0x10   : > { %2095 = sst [smem:[#allocation29_spill]] %s1742_s19  ;;  %s97_s21 = sand.u32 (!%p1394_p4), 1, %s1646_s11  }
  0x11   : > { %s1396_s22 = sshll.u32 (!%p1394_p4), %s1646_s11, 3  ;;  %s1395_s23 = sshll.u32 (!%p1394_p4), %s97_s21, 3 }
  0x12   : > { %s2097_s0 = sld [smem:[#allocation30_spill]] (!%p1394_p4)  ;;  %s99_s27 = scalar_lea.vmem (!%p1394_p4), [#allocation0], %s1395_s23 }
  0x13   : > { %s139_s15 = scalar_lea.vmem (!%p1394_p4), %s2085_s1, %s1396_s22  ;;  %s177_s18 = scalar_lea.vmem (!%p1394_p4), %s2086_s2, %s1396_s22 }
  0x14   : > { %v167_v1 = vld [vmem:[%s139_s15] sm:$0xff] (!%p1394_p4)  ;;  %s137_s13 = scalar_lea.vmem (!%p1394_p4), [#allocation1], %s1395_s23  ;;  %s215_s24 = scalar_lea.vmem (!%p1394_p4), %s2087_s3, %s1396_s22 }
  0x15   : > { %168 = vst [vmem:[%s137_s13] sm:$0xff] (!%p1394_p4), %v167_v1  ;;  %v205_v2 = vld [vmem:[%s177_s18] sm:$0xff] (!%p1394_p4)  ;;  %s175_s25 = scalar_lea.vmem (!%p1394_p4), [#allocation2], %s1395_s23 }
  0x16   : > { %206 = vst [vmem:[%s175_s25] sm:$0xff] %v205_v2  ;;  %v243_v3 = vld [vmem:[%s215_s24] sm:$0xff] }
  0x18   : > { %s101_s26 = scalar_lea.vmem %s2097_s0, %s1396_s22 }
  0x19   : > { %v129_v0 = vld [vmem:[%s101_s26] sm:$0xff]  ;;  %s213_s26 = scalar_lea.vmem [#allocation3], %s1395_s23 }
  0x1a   : > { %130 = vst [vmem:[%s99_s27] sm:$0xff] %v129_v0  ;;  %244 = vst [vmem:[%s213_s26] sm:$0xff] %v243_v3 }
  0x1b PF: > { %p1403_p5 = scmp.ge.s32.totalorder %s1646_s11, 1  ;;  %p249_p6 = scmp.lt.s32.totalorder %s1646_s11, 17 }
  0x1d   : > { %p250_p7 = pnand %p1403_p5, %p249_p6 }
  0x1f   : > { %253 = sbr.rel (%p250_p7) target bundleno = 1086 (0x43e), region = 156 }
  0x26   : > { %s1766_s13 = sand.u32 1, %s1729_s12   ;;  %s290_s27 = sand.u32 1, %s1638_s30   ;;  %v338_v4 = vlaneseq  ;;  %v1656_v11 = vmov 0.0  }
  0x27   : > { %s1404_s19 = sshll.u32 %s1766_s13, 3  ;;  %s1770_s22 = sshll.u32 %s290_s27, 3 }
  0x28   : > { %v1772_v5 = vand.u32 127, %v338_v4  ;;  %v1774_v6 = vshrl.u32 %v338_v4, 7  ;;  %s258_s23 = scalar_lea.vmem [#allocation0], %s1404_s19  ;;  %s262_s28 = scalar_lea.vmem [#allocation1], %s1404_s19 }
  0x29   : > { %v322_v7 = vld [vmem:[%s258_s23] sm:$0xff]  ;;  %v325_v8 = vld [vmem:[%s262_s28] sm:$0xff]  ;;  %s266_s29 = scalar_lea.vmem [#allocation2], %s1404_s19  ;;  %s270_s15 = scalar_lea.vmem [#allocation3], %s1404_s19 }
  0x2a   : > { %v328_v9 = vld [vmem:[%s266_s29] sm:$0xff]  ;;  %v331_v10 = vld [vmem:[%s270_s15] sm:$0xff]  ;;  %s1776_s16 = scalar_lea.vmem [#allocation6], %s1404_s19  ;;  %s1779_s30 = scalar_lea.vmem [#allocation8], %s1404_s19  ;;  %v340_v5 = vmov %v1772_v5  ;;  %v343_v6 = vmov %v1774_v6  ;;  %vm1283_vm2 = vcmp.lt.s32.totalorder %v1772_v5, 8 }
  0x2b   : > { %333 = vst [vmem:[%s1776_s16] sm:$0xff] %v1656_v11  ;;  %334 = vst [vmem:[%s1779_s30] sm:$0xff] %v1656_v11  ;;  %s321_s17 = smov [#allocation13]  ;;  %s324_s18 = smov [#allocation14]  ;;  %v353_v5 = vmov %v1772_v5  ;;  %v356_v6 = vmov %v1774_v6  ;;  %vm347_vm0 = vcmp.eq.s32.totalorder %v343_v6, %v340_v5 }
  0x2c   : > { %s1782_s21 = scalar_lea.vmem [#allocation10], %s1404_s19  ;;  %s1785_s24 = scalar_lea.vmem [#allocation11], %s1404_s19  ;;  %323 = vst [vmem:[%s321_s17] sm:$0xff] %v322_v7  ;;  %326 = vst [vmem:[%s324_s18] sm:$0xff] %v325_v8  ;;  %vm360_vm1 = vcmp.eq.s32.totalorder %v356_v6, %v353_v5  ;;  %v1275_v5 = vmov %v1772_v5  ;;  %v1278_v6 = vmov %v1774_v6 }
  0x2d   : > { %335 = vst [vmem:[%s1782_s21] sm:$0xff] %v1656_v11  ;;  %336 = vst [vmem:[%s1785_s24] sm:$0xff] %v1656_v11  ;;  %s327_s25 = smov [#allocation15]  ;;  %s330_s26 = smov [#allocation16]  ;;  %vm1288_vm3 = vcmp.eq.s32.totalorder %v1278_v6, %v1275_v5  ;;  %v1326_v5 = vmov %v1772_v5  ;;  %v1295_v6 = vmov %v1774_v6 }
  0x2e   : > { %329 = vst [vmem:[%s327_s25] sm:$0xff] %v328_v9  ;;  %332 = vst [vmem:[%s330_s26] sm:$0xff] %v331_v10  ;;  %s337_s16 = smov %s1776_s16  ;;  %s350_s24 = smov %s1785_s24  ;;  %v1292_v5 = vmov %v1772_v5  ;;  %v1329_v6 = vmov %v1774_v6 }
  0x2f   : > { %s1279_s23 = smov [#allocation13]  ;;  %s1296_s28 = smov [#allocation14]  ;;  %v1309_v5 = vmov %v1772_v5  ;;  %v1312_v6 = vmov %v1774_v6  ;;  %vm1339_vm4 = vcmp.eq.s32.totalorder %v1329_v6, %v1326_v5 }
  0x30   : > { %s1313_s29 = smov [#allocation15]  ;;  %s1330_s15 = smov [#allocation16] }
  0x32   : > { %v344_v12 = vld [vmem:[%s337_s16] sm:$0xff] }
  0x33   : > { %v348_v13 = vsel %vm347_vm0, 1.0, %v344_v12  ;;  %v1285_v16 = vld [vmem:[%s1279_s23] sm:$0xff] }
  0x34   : > { %v357_v14 = vld [vmem:[%s350_s24] sm:$0xff]  ;;  %349 = vst [vmem:[%s337_s16] sm:$0xff] %v348_v13  ;;  %v1286_v18 = vsel %vm1283_vm2, %v1285_v16, 0.0 }
  0x35   : > { %v361_v15 = vsel %vm360_vm1, 1.0, %v357_v14  ;;  %v1302_v17 = vld [vmem:[%s1296_s28] sm:$0xff]  ;;  %v1287_v22 = vmul.f32 %v1286_v18, %v1286_v18 }
  0x36   : > { %362 = vst [vmem:[%s350_s24] sm:$0xff] %v361_v15  ;;  %v1303_v19 = vsel %vm1283_vm2, %v1302_v17, 0.0  ;;  %v1319_v20 = vld [vmem:[%s1313_s29] sm:$0xff] }
  0x37   : > { %v1336_v21 = vld [vmem:[%s1330_s15] sm:$0xff]  ;;  %v1304_v23 = vmul.f32 %v1303_v19, %v1303_v19  ;;  %v1320_v24 = vsel %vm1283_vm2, %v1319_v20, 0.0  ;;  %v1289_v29 = vsel %vm1288_vm3, 0.0, %v1287_v22 }
  0x38   : > { %v1337_v25 = vsel %vm1283_vm2, %v1336_v21, 0.0  ;;  %v1321_v26 = vmul.f32 %v1320_v24, %v1320_v24 }
  0x39   : > { %v1306_v27 = vadd.f32 %v1304_v23, %v1287_v22  ;;  %v1338_v28 = vmul.f32 %v1337_v25, %v1337_v25  ;;  %v1305_v30 = vadd.f32 %v1304_v23, %v1289_v29 }
  0x3b   : > { %v1323_v31 = vadd.f32 %v1321_v26, %v1306_v27  ;;  %v1322_v32 = vadd.f32 %v1321_v26, %v1305_v30  ;;  %v1340_v33 = vsel %vm1339_vm4, 0.0, %v1338_v28 }
  0x3d   : > { %v1342_v34 = vadd.f32 %v1338_v28, %v1323_v31  ;;  %v1341_v35 = vadd.f32 %v1340_v33, %v1322_v32 }
  0x3f   : > { %1343 = vadd.xlane.f32.xlu0 %v1342_v34 }
  0x43   : > { %1351 = vadd.xlane.f32.xlu0 %v1341_v35 }
  0xcc   : > { %v1344_v36 = vpop.xlane.xlu0 %1343 }
  0xcd   : > { %v1345_v37 = vrot.slane %v1344_v36, 4 }
  0xcf   : > { %v1346_v38 = vadd.f32 %v1345_v37, %v1344_v36 }
  0xd0   : > { %v1352_v39 = vpop.xlane.xlu0 %1351 }
  0xd1   : > { %v1347_v40 = vrot.slane %v1346_v38, 2  ;;  %v1353_v41 = vrot.slane %v1352_v39, 4 }
  0xd3   : > { %v1354_v42 = vadd.f32 %v1353_v41, %v1352_v39  ;;  %v1348_v43 = vadd.f32 %v1347_v40, %v1346_v38 }
  0xd5   : > { %v1355_v44 = vrot.slane %v1354_v42, 2  ;;  %v1349_v46 = vrot.slane %v1348_v43, 1 }
  0xd7   : > { %v1356_v45 = vadd.f32 %v1355_v44, %v1354_v42  ;;  %v1350_v49 = vadd.f32 %v1349_v46, %v1348_v43 }
  0xd9   : > { %v1357_v47 = vrot.slane %v1356_v45, 1 }
  0xdb   : > { %v1358_v48 = vadd.f32 %v1357_v47, %v1356_v45 }
  0xdd   : > { %1444 = vpush %v1358_v48 }
  0xde   : > { %1446 = vpush %v1350_v49 }
 0x10e   : > { %s1445_s17 = spop %1444 }
 0x10f   : > { %s1447_s18 = spop %1446 }
 0x110   : > { %s1361_s25 = smul.f32 1e-10, %s1447_s18 }
 0x112   : > { %p1362_p8 = scmp.le.f32.partialorder %s1445_s17, %s1361_s25 }
 0x113   : > { %s1814_s26 = smov (!%p1362_p8), 0  }
 0x114   : > { %1365 = sbr.rel (%p1362_p8) target bundleno = 958 (0x3be), region = 373 }
 0x11b LB: >> { %s1819_s23 = smov 0   ;;  %s1650_s26 = sphi %s1814_s26, %s2098_s26  }
 0x11c LB: >>> { %s467_s28 = smov [#allocation13]  ;;  %v471_v5 = vmov %v1772_v5  ;;  %v474_v6 = vmov %v1774_v6  ;;  %s487_s29 = smov [#allocation14]  ;;  %vm790_vm14 = vcmp.eq.s32.totalorder %v1774_v6, 0  ;;  %vm802_vm15 = vcmp.eq.s32.totalorder %v1774_v6, 7  ;;  %s1654_s23 = sphi %s1819_s23, %s466_s23  }
 0x11d   : >>> { %v491_v5 = vmov %v1772_v5  ;;  %v494_v6 = vmov %v1774_v6  ;;  %v475_v50 = vld [vmem:[%s467_s28] sm:$0xff]  ;;  %vm478_vm5 = vcmp.eq.s32.totalorder %v474_v6, %v471_v5  ;;  %s507_s15 = smov [#allocation16]  ;;  %s468_s17 = smov [#allocation17] }
 0x11e   : >>> { %vm498_vm6 = vcmp.eq.s32.totalorder %v494_v6, %v491_v5  ;;  %v511_v5 = vmov %v1772_v5  ;;  %v514_v6 = vmov %v1774_v6  ;;  %v479_v51 = vsel %vm478_vm5, %v475_v50, 0.0  ;;  %v495_v52 = vld [vmem:[%s487_s29] sm:$0xff]  ;;  %s488_s18 = smov [#allocation18]  ;;  %s508_s25 = smov [#allocation19] }
 0x11f   : >>> { %vm518_vm7 = vcmp.eq.s32.totalorder %v514_v6, %v511_v5  ;;  %v480_v53 = vrot.slane %v479_v51, 4  ;;  %v499_v54 = vsel %vm498_vm6, %v495_v52, 0.0  ;;  %v515_v55 = vld [vmem:[%s507_s15] sm:$0xff]  ;;  %s531_s28 = smov [#allocation18]  ;;  %s529_s29 = smov [#allocation17]  ;;  %v580_v5 = vmov %v1772_v5 }
 0x120   : >>> { %v500_v56 = vrot.slane %v499_v54, 4  ;;  %v519_v57 = vsel %vm518_vm7, %v515_v55, 0.0  ;;  %s533_s15 = smov [#allocation19]  ;;  %v583_v6 = vmov %v1774_v6  ;;  %v595_v5 = vmov %v1772_v5  ;;  %s1836_s19 = smov [#allocation14] }
 0x121   : >>> { %v481_v58 = vadd.f32 %v480_v53, %v479_v51  ;;  %v520_v59 = vrot.slane %v519_v57, 4  ;;  %v598_v6 = vmov %v1774_v6  ;;  %vm585_vm12 = vcmp.eq.s32.totalorder %v583_v6, %v580_v5  ;;  %s830_s27 = smov [#allocation24]  ;;  %s1841_s16 = smov %s1776_s16  ;;  %v615_v50 = vld [vmem:[%s1836_s19] sm:$0xff] }
 0x122   : >>> { %v501_v60 = vadd.f32 %v500_v56, %v499_v54  ;;  %vm600_vm13 = vcmp.eq.s32.totalorder %v598_v6, %v595_v5  ;;  %s1844_s30 = smov %s1779_s30  ;;  %s1847_s21 = smov %s1782_s21  ;;  %v838_v52 = vld [vmem:[%s1841_s16] sm:$0xff]  ;;  %v693_v5 = vmov %v1772_v5  ;;  %v696_v6 = vmov %v1774_v6 }
 0x123   : >>> { %v482_v61 = vrot.slane %v481_v58, 2  ;;  %v521_v62 = vadd.f32 %v520_v59, %v519_v57  ;;  %s1851_s24 = smov %s1785_s24  ;;  %v839_v53 = vld [vmem:[%s1844_s30] sm:$0xff]  ;;  %s832_s0 = smov [#allocation25]  ;;  %v666_v5 = vmov %v1772_v5  ;;  %v669_v6 = vmov %v1774_v6 }
 0x124   : >>> { %v502_v63 = vrot.slane %v501_v60, 2  ;;  %v840_v56 = vld [vmem:[%s1847_s21] sm:$0xff]  ;;  %v707_v5 = vmov %v1772_v5  ;;  %v710_v6 = vmov %v1774_v6  ;;  %vm700_vm0 = vcmp.eq.s32.totalorder %v696_v6, %v693_v5  ;;  %s466_s23 = sadd.s32 1, %s1654_s23  }
 0x125   : >>> { %v483_v0 = vadd.f32 %v482_v61, %v481_v58  ;;  %v522_v1 = vrot.slane %v521_v62, 2  ;;  %v841_v57 = vld [vmem:[%s1851_s24] sm:$0xff]  ;;  %v680_v5 = vmov %v1772_v5  ;;  %v683_v6 = vmov %v1774_v6  ;;  %p463_p9 = scmp.ge.s32.totalorder %s466_s23, 15  }
 0x126   : >>> { %v503_v2 = vadd.f32 %v502_v63, %v501_v60  ;;  %vm674_vm1 = vcmp.eq.s32.totalorder %v669_v6, %v666_v5  ;;  %vm715_vm3 = vcmp.eq.s32.totalorder %v710_v6, %v707_v5  ;;  %vm687_vm4 = vcmp.eq.s32.totalorder %v683_v6, %v680_v5 }
 0x127   : >>> { %v484_v3 = vrot.slane %v483_v0, 1  ;;  %v523_v4 = vadd.f32 %v522_v1, %v521_v62  ;;  %vm729_vm5 = vcmp.eq.s32.totalorder %v1772_v5, 0  ;;  %vm733_vm6 = vcmp.eq.s32.totalorder %v1772_v5, 1 }
 0x128   : >>> { %v504_v7 = vrot.slane %v503_v2, 1  ;;  %vm746_vm7 = vcmp.eq.s32.totalorder %v1772_v5, 7  ;;  %v367_v5 = vmov (%p463_p9), %v1772_v5  ;;  %v370_v6 = vmov (%p463_p9), %v1774_v6 }
 0x129   : >>> { %v485_v8 = vadd.f32 %v484_v3, %v483_v0  ;;  %v524_v9 = vrot.slane %v523_v4, 1  ;;  %v420_v5 = vmov (%p463_p9), %v1772_v5 }
 0x12a   : >>> { %v505_v10 = vadd.f32 %v504_v7, %v503_v2 }
 0x12b   : >>> { %486 = vst [vmem:[%s468_s17] sm:$0x1] %v485_v8  ;;  %v525_v11 = vadd.f32 %v524_v9, %v523_v4  ;;  %s568_s17 = smov [#allocation20] }
 0x12c   : >>> { %506 = vst [vmem:[%s488_s18] sm:$0x1] %v505_v10  ;;  %s570_s18 = smov [#allocation21] }
 0x12d   : >>> { %526 = vst [vmem:[%s508_s25] sm:$0x1] %v525_v11  ;;  %s527_s25 = smov [#allocation22] }
 0x12e   : >>> { %s572_s25 = smov %s527_s25 }
 0x132   : >>> { %v530_v14 = vld [vmem:[%s529_s29] sm:$0xff]  ;;  %s576_s29 = smov [#allocation22] }
 0x133   : >>> { %v532_v12 = vld [vmem:[%s531_s28] sm:$0xff]  ;;  %v553_v27 = vand.u32 2147483647, %v530_v14  ;;  %s528_s28 = smov [#allocation23] }
 0x134   : >>> { %v536_v13 = vmul.f32 2.0, %v532_v12  ;;  %v534_v15 = vld [vmem:[%s533_s15] sm:$0xff]  ;;  %v554_v32 = vand.u32 2147483647, %v532_v12  ;;  %s574_s28 = smov %s528_s28  ;;  %s591_s15 = smov [#allocation23] }
 0x135   : >>> { %v535_v16 = vsub.f32 %v534_v15, %v530_v14  ;;  %v555_v28 = vand.u32 2147483647, %v534_v15 }
 0x136   : >>> { %1500 = vrcp.f32 %v536_v13 }
 0x137   : >>> { %v556_v31 = vmin.f32 %v553_v27, %v555_v28 }
 0x139   : >>> { %v557_v33 = vmul.f32 1.1920929e-08, %v556_v31 }
 0x13b   : >>> { %vm558_vm11 = vcmp.le.f32.partialorder %v554_v32, %v557_v33 }
 0x140   : >>> { %v1501_v17 = vpop.eup %1500 }
 0x141   : >>> { %v538_v18 = vmul.f32 %v1501_v17, %v535_v16 }
 0x143   : >>> { %v540_v19 = vmul.f32 %v538_v18, %v538_v18  ;;  %vm539_vm10 = vcmp.ge.f32.partialorder %v538_v18, 0.0 }
 0x145   : >>> { %v541_v20 = vadd.f32 1.0, %v540_v19 }
 0x147   : >>> { %1502 = vrsqrt.f32 %v541_v20  ;;  %vm544_vm8 = vcmp.eq.f32.partialorder %v541_v20, inf  ;;  %v547_v22 = vand.u32 2147483648, %v541_v20  ;;  %vm546_vm9 = vcmp.eq.f32.partialorder %v541_v20, 0.0 }
 0x151   : >>> { %v1503_v21 = vpop.eup %1502 }
 0x152   : >>> { %v543_v23 = vmul.f32 %v1503_v21, %v541_v20 }
 0x154   : >>> { %v545_v24 = vsel %vm544_vm8, %v541_v20, %v543_v23  ;;  %vm382_vm8 = vcmp.eq.s32.totalorder (%p463_p9), %v370_v6, %v367_v5  ;;  %v423_v6 = vmov (%p463_p9), %v1774_v6  ;;  %v386_v5 = vmov (%p463_p9), %v1772_v5 }
 0x155   : >>> { %v548_v25 = vsel %vm546_vm9, %v547_v22, %v545_v24  ;;  %v389_v6 = vmov (%p463_p9), %v1774_v6  ;;  %v403_v5 = vmov (%p463_p9), %v1772_v5  ;;  %vm435_vm9 = vcmp.eq.s32.totalorder (%p463_p9), %v423_v6, %v420_v5 }
 0x156   : >>> { %v549_v26 = vxor.u32 2147483648, %v548_v25  ;;  %v406_v6 = vmov (%p463_p9), %v1774_v6 }
 0x158   : >>> { %v550_v29 = vsel %vm539_vm10, %v548_v25, %v549_v26 }
 0x159   : >>> { %v551_v30 = vadd.f32 %v550_v29, %v538_v18 }
 0x15b   : >>> { %1504 = vrcp.f32 %v551_v30 }
 0x165   : >>> { %v1505_v34 = vpop.eup %1504 }
 0x166   : >>> { %v559_v35 = vsel %vm558_vm11, 0.0, %v1505_v34 }
 0x167   : >>> { %v560_v36 = vmul.f32 %v559_v35, %v559_v35  ;;  %v564_v37 = vmul.f32 %v559_v35, %v532_v12 }
 0x169   : >>> { %v561_v38 = vadd.f32 1.0, %v560_v36  ;;  %v565_v39 = vsub.f32 %v530_v14, %v564_v37  ;;  %v567_v40 = vadd.f32 %v564_v37, %v534_v15 }
 0x16b   : >>> { %1506 = vrsqrt.f32 %v561_v38  ;;  %569 = vst [vmem:[%s568_s17] sm:$0xff] %v565_v39  ;;  %571 = vst [vmem:[%s570_s18] sm:$0xff] %v567_v40  ;;  %s589_s17 = smov [#allocation24]  ;;  %s606_s18 = smov [#allocation24] }
 0x175   : >>> { %v1507_v41 = vpop.eup %1506 }
 0x176   : >>> { %573 = vst [vmem:[%s572_s25] sm:$0xff] %v1507_v41  ;;  %v563_v42 = vmul.f32 %v1507_v41, %v559_v35  ;;  %s1834_s25 = smov [#allocation13] }
 0x177   : >>> { %v614_v49 = vld [vmem:[%s1834_s25] sm:$0xff] }
 0x178   : >>> { %575 = vst [vmem:[%s574_s28] sm:$0xff] %v563_v42  ;;  %s604_s28 = smov [#allocation25] }
 0x17d   : >>> { %v577_v43 = vld [vmem:[%s576_s29] ss:$0 sm:$0xff]  ;;  %s1838_s29 = smov [#allocation16] }
 0x17e   : >>> { %v586_v44 = vsel %vm585_vm12, %v577_v43, 0.0  ;;  %v617_v51 = vld [vmem:[%s1838_s29] sm:$0xff] }
 0x17f   : >>> { %587 = vadd.xlane.f32.xlu0 %v586_v44  ;;  %v592_v45 = vld [vmem:[%s591_s15] ss:$0 sm:$0xff]  ;;  %s1853_s15 = smov [#allocation15] }
 0x180   : >>> { %v601_v46 = vsel %vm600_vm13, %v592_v45, 0.0  ;;  %v616_v58 = vld [vmem:[%s1853_s15] sm:$0xff] }
 0x183   : >>> { %602 = vadd.xlane.f32.xlu0 %v601_v46 }
 0x20c   : >>> { %v588_v47 = vpop.xlane.xlu0 %587 }
 0x20d   : >>> { %590 = vst [vmem:[%s589_s17] sm:$0xff] %v588_v47  ;;  %s608_s17 = smov [#allocation25] }
 0x210   : >>> { %v603_v48 = vpop.xlane.xlu0 %602 }
 0x211   : >>> { %605 = vst [vmem:[%s604_s28] sm:$0xff] %v603_v48  ;;  %s1886_s28 = smov [#allocation14] }
 0x214   : >>> { %v607_v54 = vld [vmem:[%s606_s18] sm:$0xff]  ;;  %s1882_s18 = smov [#allocation16] }
 0x215   : >>> { %v831_v55 = vld [vmem:[%s830_s27] sm:$0xff]  ;;  %v618_v59 = vmul.f32 %v614_v49, %v607_v54  ;;  %v621_v60 = vmul.f32 %v615_v50, %v607_v54  ;;  %v628_v61 = vmul.f32 %v617_v51, %v607_v54  ;;  %v625_v4 = vmul.f32 %v616_v58, %v607_v54  ;;  %s636_s27 = smov [#allocation23] }
 0x216   : >>> { %v842_v62 = vmul.f32 %v838_v52, %v831_v55  ;;  %v845_v63 = vmul.f32 %v839_v53, %v831_v55  ;;  %v849_v0 = vmul.f32 %v840_v56, %v831_v55  ;;  %v852_v1 = vmul.f32 %v841_v57, %v831_v55  ;;  %v637_v24 = vld [vmem:[%s636_s27] ss:$0 sm:$0xff]  ;;  %s703_s27 = smov [#allocation16] }
 0x218   : >>> { %v609_v2 = vld [vmem:[%s608_s17] sm:$0xff]  ;;  %s690_s17 = smov [#allocation15] }
 0x219   : >>> { %v833_v3 = vld [vmem:[%s832_s0] sm:$0xff]  ;;  %v622_v7 = vmul.f32 %v617_v51, %v609_v2  ;;  %v624_v8 = vmul.f32 %v614_v49, %v609_v2  ;;  %v627_v9 = vmul.f32 %v615_v50, %v609_v2  ;;  %v619_v14 = vmul.f32 %v616_v58, %v609_v2  ;;  %s634_s0 = smov [#allocation22] }
 0x21a   : >>> { %v843_v10 = vmul.f32 %v840_v56, %v833_v3  ;;  %v846_v11 = vmul.f32 %v841_v57, %v833_v3  ;;  %v848_v12 = vmul.f32 %v838_v52, %v833_v3  ;;  %v851_v13 = vmul.f32 %v839_v53, %v833_v3  ;;  %v635_v23 = vld [vmem:[%s634_s0] ss:$0 sm:$0xff]  ;;  %s662_s0 = smov [#allocation13] }
 0x21b   : >>> { %v623_v15 = vsub.f32 %v621_v60, %v622_v7  ;;  %v629_v16 = vadd.f32 %v628_v61, %v627_v9  ;;  %v626_v18 = vadd.f32 %v625_v4, %v624_v8  ;;  %v620_v22 = vsub.f32 %v618_v59, %v619_v14 }
 0x21c   : >>> { %v844_v17 = vsub.f32 %v842_v62, %v843_v10  ;;  %v847_v19 = vsub.f32 %v845_v63, %v846_v11  ;;  %v850_v20 = vadd.f32 %v849_v0, %v848_v12  ;;  %v853_v21 = vadd.f32 %v852_v1, %v851_v13 }
 0x21d   : >>> { %631 = vst [vmem:[%s1836_s19] sm:$0xff] %v623_v15  ;;  %633 = vst [vmem:[%s1838_s29] sm:$0xff] %v629_v16  ;;  %s1880_s19 = smov [#allocation15]  ;;  %s663_s29 = smov [#allocation20] }
 0x21e   : >>> { %854 = vst [vmem:[%s1841_s16] sm:$0xff] %v844_v17  ;;  %632 = vst [vmem:[%s1853_s15] sm:$0xff] %v626_v18  ;;  %s858_s16 = smov %s1776_s16  ;;  %s704_s15 = smov [#allocation21]  ;;  %v670_v55 = vld [vmem:[%s663_s29] ss:$0 sm:$0xff] }
 0x21f   : >>> { %855 = vst [vmem:[%s1844_s30] sm:$0xff] %v847_v19  ;;  %856 = vst [vmem:[%s1847_s21] sm:$0xff] %v850_v20  ;;  %s859_s21 = smov %s1782_s21  ;;  %s1873_s30 = smov %s1779_s30  ;;  %v711_v56 = vld [vmem:[%s704_s15] ss:$0 sm:$0xff] }
 0x220   : >>> { %857 = vst [vmem:[%s1851_s24] sm:$0xff] %v853_v21  ;;  %630 = vst [vmem:[%s1834_s25] sm:$0xff] %v620_v22  ;;  %s1876_s24 = smov %s1785_s24  ;;  %s1884_s25 = smov [#allocation13] }
 0x221   : >>> { %s719_s29 = smov [#allocation14]  ;;  %s1658_s15 = smov 127  }
 0x224   : >>> { %v645_v39 = vld [vmem:[%s1882_s18] sm:$0xff] }
 0x225   : >>> { %v860_v25 = vld [vmem:[%s858_s16] ss:$0 sm:$0xff]  ;;  %v1423_v27 = vld [vmem:[%s858_s16 + $0x7] ss:$0 sm:$0xff]  ;;  %v653_v42 = vmul.f32 %v645_v39, %v637_v24  ;;  %v656_v46 = vmul.f32 %v645_v39, %v635_v23 }
 0x226   : >>> { %v1422_v26 = vld [vmem:[%s858_s16 - $0x1] sm:$0xfe]  ;;  %v1427_v34 = vld [vmem:[%s1873_s30 + $0x7] ss:$0 sm:$0xff] }
 0x227   : >>> { %v867_v28 = vsel %vm790_vm14, %v860_v25, %v1422_v26  ;;  %v871_v29 = vld [vmem:[%s859_s21] ss:$0 sm:$0xff]  ;;  %v1425_v30 = vld [vmem:[%s859_s21 + $0x1] sm:$0x7f] }
 0x228   : >>> { %v884_v31 = vld [vmem:[%s1873_s30] ss:$0 sm:$0xff]  ;;  %870 = vst [vmem:[%s858_s16] sm:$0xff] %v867_v28  ;;  %v879_v32 = vsel %vm802_vm15, %v1423_v27, %v1425_v30  ;;  %v1429_v37 = vld [vmem:[%s1876_s24 + $0x1] sm:$0x7f] }
 0x229   : >>> { %v1426_v33 = vld [vmem:[%s1873_s30 - $0x1] sm:$0xfe]  ;;  %1424 = vst [vmem:[%s858_s16 + $0x1] sm:$0x1] %v871_v29  ;;  %881 = vst [vmem:[%s859_s21] sm:$0xff] %v879_v32  ;;  %v903_v40 = vsel %vm802_vm15, %v1427_v34, %v1429_v37 }
 0x22a   : >>> { %v895_v35 = vld [vmem:[%s1876_s24] ss:$0 sm:$0xff]  ;;  %v891_v36 = vsel %vm790_vm14, %v884_v31, %v1426_v33 }
 0x22b   : >>> { %v644_v38 = vld [vmem:[%s1880_s19] sm:$0xff]  ;;  %894 = vst [vmem:[%s1873_s30] sm:$0xff] %v891_v36  ;;  %905 = vst [vmem:[%s1876_s24] sm:$0xff] %v903_v40 }
 0x22c   : >>> { %v652_v41 = vmul.f32 %v644_v38, %v635_v23  ;;  %v655_v43 = vmul.f32 %v644_v38, %v637_v24  ;;  %v642_v44 = vld [vmem:[%s1884_s25] sm:$0xff]  ;;  %1428 = vst [vmem:[%s1873_s30 + $0x1] sm:$0x1] %v895_v35 }
 0x22d   : >>> { %v643_v45 = vld [vmem:[%s1886_s28] sm:$0xff]  ;;  %v646_v47 = vmul.f32 %v642_v44, %v635_v23  ;;  %v649_v49 = vmul.f32 %v642_v44, %v637_v24 }
 0x22e   : >>> { %v647_v48 = vmul.f32 %v643_v45, %v637_v24  ;;  %v654_v50 = vsub.f32 %v652_v41, %v653_v42  ;;  %v650_v51 = vmul.f32 %v643_v45, %v635_v23  ;;  %v657_v52 = vadd.f32 %v656_v46, %v655_v43 }
 0x230   : >>> { %v648_v53 = vsub.f32 %v646_v47, %v647_v48  ;;  %660 = vst [vmem:[%s1880_s19] sm:$0xff] %v654_v50  ;;  %v651_v54 = vadd.f32 %v650_v51, %v649_v49  ;;  %661 = vst [vmem:[%s1882_s18] sm:$0xff] %v657_v52  ;;  %s677_s19 = smov [#allocation14]  ;;  %s1920_s18 = smov [#allocation15] }
 0x232   : >>> { %658 = vst [vmem:[%s1884_s25] sm:$0xff] %v648_v53  ;;  %659 = vst [vmem:[%s1886_s28] sm:$0xff] %v651_v54  ;;  %s718_s25 = smov [#allocation13]  ;;  %s1657_s28 = smov 1  }
 0x237   : >>> { %v697_v57 = vld [vmem:[%s690_s17] sm:$0xff] }
 0x238   : >>> { %v701_v58 = vsel %vm700_vm0, 0.0, %v697_v57  ;;  %v712_v60 = vld [vmem:[%s703_s27] sm:$0xff] }
 0x239   : >>> { %v671_v59 = vld [vmem:[%s662_s0] sm:$0xff]  ;;  %702 = vst [vmem:[%s690_s17] sm:$0xff] %v701_v58  ;;  %v716_v63 = vsel %vm715_vm3, %v711_v56, %v712_v60  ;;  %s1923_s17 = smov [#allocation16] }
 0x23a   : >>> { %v675_v61 = vsel %vm674_vm1, %v670_v55, %v671_v59  ;;  %v684_v62 = vld [vmem:[%s677_s19] sm:$0xff]  ;;  %717 = vst [vmem:[%s703_s27] sm:$0xff] %v716_v63  ;;  %s806_s27 = smov [#allocation14] }
 0x23b   : >>> { %676 = vst [vmem:[%s662_s0] sm:$0xff] %v675_v61  ;;  %v688_v0 = vsel %vm687_vm4, 0.0, %v684_v62  ;;  %s782_s0 = smov [#allocation13] }
 0x23c   : >>> { %689 = vst [vmem:[%s677_s19] sm:$0xff] %v688_v0  ;;  %s783_s19 = smov [#allocation15] }
 0x240   : >>> { %v756_v1 = vld [vmem:[%s1920_s18] sm:$0xff] }
 0x241   : >>> { %757 = vrot.lane.b32.xlu0 %v756_v1, %s1657_s28  ;;  %v752_v4 = vld [vmem:[%s1923_s17] sm:$0xff] }
 0x242   : >>> { %v724_v2 = vld [vmem:[%s718_s25] sm:$0xff] }
 0x243   : >>> { %725 = vrot.lane.b32.xlu1 %v724_v2, %s1657_s28  ;;  %v720_v3 = vld [vmem:[%s719_s29] sm:$0xff] }
 0x247   : >>> { %721 = vrot.lane.b32.xlu1 %v720_v3, %s1657_s28 }
 0x24b   : >>> { %742 = vrot.lane.b32.xlu1 %v720_v3, %s1658_s15 }
 0x24f   : >>> { %753 = vrot.lane.b32.xlu1 %v752_v4, %s1657_s28  ;;  %s371_s28 = smov (%p463_p9), [#allocation13] }
 0x253   : >>> { %774 = vrot.lane.b32.xlu1 %v752_v4, %s1658_s15  ;;  %s407_s15 = smov (%p463_p9), [#allocation15] }
 0x2b3   : >>> { %v758_v13 = vpop.permute.xlu0 %757 }
 0x2b4   : >>> { %v762_v15 = vsel %vm729_vm5, %v756_v1, %v758_v13 }
 0x2b5   : >>> { %v726_v7 = vpop.permute.xlu1 %725 }
 0x2b6   : >>> { %v730_v8 = vsel %vm729_vm5, %v724_v2, %v726_v7 }
 0x2b9   : >>> { %v722_v9 = vpop.permute.xlu1 %721 }
 0x2ba   : >>> { %v734_v10 = vsel %vm733_vm6, %v722_v9, %v730_v8 }
 0x2bb   : >>> { %v740_v11 = vsel %vm1283_vm2, %v734_v10, 0.0 }
 0x2bc   : >>> { %748 = vst [vmem:[%s718_s25] sm:$0xff] %v740_v11  ;;  %s807_s25 = smov [#allocation16] }
 0x2bd   : >>> { %v743_v12 = vpop.permute.xlu1 %742 }
 0x2be   : >>> { %v747_v14 = vsel %vm746_vm7, %v724_v2, %v743_v12 }
 0x2bf   : >>> { %749 = vst [vmem:[%s719_s29] sm:$0xff] %v747_v14  ;;  %s390_s29 = smov (%p463_p9), [#allocation14] }
 0x2c1   : >>> { %v754_v16 = vpop.permute.xlu1 %753 }
 0x2c2   : >>> { %v766_v17 = vsel %vm733_vm6, %v754_v16, %v762_v15 }
 0x2c3   : >>> { %v784_v18 = vld [vmem:[%s782_s0] ss:$0 sm:$0xff]  ;;  %v1415_v20 = vld [vmem:[%s782_s0 + $0x7] ss:$0 sm:$0xff]  ;;  %v772_v22 = vsel %vm1283_vm2, %v766_v17, 0.0 }
 0x2c4   : >>> { %v1414_v19 = vld [vmem:[%s782_s0 - $0x1] sm:$0xfe]  ;;  %780 = vst [vmem:[%s1920_s18] sm:$0xff] %v772_v22  ;;  %s906_s18 = sadd.s32 (%p463_p9), 1, %s1650_s26  }
 0x2c5   : >>> { %v791_v21 = vsel %vm790_vm14, %v784_v18, %v1414_v19  ;;  %v775_v23 = vpop.permute.xlu1 %774  ;;  %p459_p10 = scmp.ge.s32.totalorder (%p463_p9), %s906_s18, 15  ;;  %s2098_s26 = smov (%p463_p9), %s906_s18 }
 0x2c6   : >>> { %794 = vst [vmem:[%s782_s0] sm:$0xff] %v791_v21  ;;  %v808_v24 = vld [vmem:[%s806_s27] ss:$0 sm:$0xff]  ;;  %v1419_v26 = vld [vmem:[%s806_s27 + $0x7] ss:$0 sm:$0xff]  ;;  %v779_v27 = vsel %vm746_vm7, %v756_v1, %v775_v23 }
 0x2c7   : >>> { %v1418_v25 = vld [vmem:[%s806_s27 - $0x1] sm:$0xfe]  ;;  %781 = vst [vmem:[%s1923_s17] sm:$0xff] %v779_v27  ;;  %s424_s17 = smov (%p463_p9), [#allocation16] }
 0x2c8   : >>> { %v815_v28 = vsel %vm790_vm14, %v808_v24, %v1418_v25 }
 0x2c9   : >>> { %818 = vst [vmem:[%s806_s27] sm:$0xff] %v815_v28 }
 0x2cb   : >>> { %v795_v29 = vld [vmem:[%s783_s19] ss:$0 sm:$0xff]  ;;  %v1417_v30 = vld [vmem:[%s783_s19 + $0x1] sm:$0x7f] }
 0x2cc   : >>> { %1416 = vst [vmem:[%s782_s0 + $0x1] sm:$0x1] %v795_v29  ;;  %v803_v31 = vsel %vm802_vm15, %v1415_v20, %v1417_v30  ;;  %465 = sbr.rel (!%p463_p9) target bundleno = 284 (0x11c), region = 368 }
 0x2cd   : >>> { %805 = vst [vmem:[%s783_s19] sm:$0xff] %v803_v31 }
 0x2ce   : >>> { %v819_v32 = vld [vmem:[%s807_s25] ss:$0 sm:$0xff]  ;;  %v1421_v33 = vld [vmem:[%s807_s25 + $0x1] sm:$0x7f] }
 0x2cf   : >>> { %1420 = vst [vmem:[%s806_s27 + $0x1] sm:$0x1] %v819_v32  ;;  %v827_v34 = vsel %vm802_vm15, %v1419_v26, %v1421_v33 }
 0x2d0   : >>> { %829 = vst [vmem:[%s807_s25] sm:$0xff] %v827_v34 }
 0x2d3   : >> { %v377_v35 = vld [vmem:[%s371_s28] sm:$0xff] }
 0x2d4   : >> { %v378_v37 = vsel %vm1283_vm2, %v377_v35, 0.0  ;;  %v413_v39 = vld [vmem:[%s407_s15] sm:$0xff] }
 0x2d5   : >> { %v379_v41 = vmul.f32 %v378_v37, %v378_v37  ;;  %v414_v43 = vsel %vm1283_vm2, %v413_v39, 0.0 }
 0x2d6   : >> { %v396_v36 = vld [vmem:[%s390_s29] sm:$0xff]  ;;  %v415_v45 = vmul.f32 %v414_v43, %v414_v43 }
 0x2d7   : >> { %v397_v38 = vsel %vm1283_vm2, %v396_v36, 0.0  ;;  %v430_v40 = vld [vmem:[%s424_s17] sm:$0xff]  ;;  %v383_v48 = vsel %vm382_vm8, 0.0, %v379_v41 }
 0x2d8   : >> { %v398_v42 = vmul.f32 %v397_v38, %v397_v38  ;;  %v431_v44 = vsel %vm1283_vm2, %v430_v40, 0.0 }
 0x2d9   : >> { %v432_v47 = vmul.f32 %v431_v44, %v431_v44 }
 0x2da   : >> { %v400_v46 = vadd.f32 %v398_v42, %v379_v41  ;;  %v399_v49 = vadd.f32 %v398_v42, %v383_v48 }
 0x2db   : >> { %v436_v52 = vsel %vm435_vm9, 0.0, %v432_v47 }
 0x2dc   : >> { %v417_v50 = vadd.f32 %v415_v45, %v400_v46  ;;  %v416_v51 = vadd.f32 %v415_v45, %v399_v49 }
 0x2de   : >> { %v438_v53 = vadd.f32 %v432_v47, %v417_v50  ;;  %v437_v54 = vadd.f32 %v436_v52, %v416_v51 }
 0x2e0   : >> { %439 = vadd.xlane.f32.xlu0 %v438_v53 }
 0x2e4   : >> { %447 = vadd.xlane.f32.xlu0 %v437_v54 }
 0x36d   : >> { %v440_v55 = vpop.xlane.xlu0 %439 }
 0x36e   : >> { %v441_v56 = vrot.slane %v440_v55, 4 }
 0x370   : >> { %v442_v57 = vadd.f32 %v441_v56, %v440_v55 }
 0x371   : >> { %v448_v58 = vpop.xlane.xlu0 %447 }
 0x372   : >> { %v443_v59 = vrot.slane %v442_v57, 2  ;;  %v449_v60 = vrot.slane %v448_v58, 4 }
 0x374   : >> { %v450_v61 = vadd.f32 %v449_v60, %v448_v58  ;;  %v444_v62 = vadd.f32 %v443_v59, %v442_v57 }
 0x376   : >> { %v451_v63 = vrot.slane %v450_v61, 2  ;;  %v445_v1 = vrot.slane %v444_v62, 1 }
 0x378   : >> { %v452_v0 = vadd.f32 %v451_v63, %v450_v61  ;;  %v446_v4 = vadd.f32 %v445_v1, %v444_v62 }
 0x37a   : >> { %v453_v2 = vrot.slane %v452_v0, 1 }
 0x37c   : >> { %v454_v3 = vadd.f32 %v453_v2, %v452_v0 }
 0x37e   : >> { %1448 = vpush %v454_v3 }
 0x37f   : >> { %1450 = vpush %v446_v4 }
 0x3af   : >> { %s1449_s23 = spop %1448 }
 0x3b0   : >> { %s1451_s0 = spop %1450 }
 0x3b1   : >> { %s457_s27 = smul.f32 1e-10, %s1451_s0 }
 0x3b3   : >> { %p458_p11 = scmp.le.f32.partialorder %s1449_s23, %s457_s27 }
 0x3b5   : >> { %p460_p12 = por %p459_p10, %p458_p11 }
 0x3b7   : > { %908 = sbr.rel (!%p460_p12) target bundleno = 283 (0x11b), region = 379 }
 0x3be PF: > { %s913_s19 = smov [#allocation13]  ;;  %v917_v5 = vmov %v1772_v5  ;;  %v920_v6 = vmov %v1774_v6  ;;  %s933_s26 = smov [#allocation16] }
 0x3bf   : > { %v937_v5 = vmov %v1772_v5  ;;  %v940_v6 = vmov %v1774_v6  ;;  %v921_v7 = vld [vmem:[%s913_s19] sm:$0xff]  ;;  %vm924_vm10 = vcmp.eq.s32.totalorder %v920_v6, %v917_v5  ;;  %s909_s25 = sand.u32 7, %s1729_s12   ;;  %s2099_s18 = scalar_lea.vmem [#allocation4], %s1770_s22 }
 0x3c0   : > { %vm944_vm11 = vcmp.eq.s32.totalorder %v940_v6, %v937_v5  ;;  %v925_v8 = vsel %vm924_vm10, %v921_v7, 0.0  ;;  %v941_v10 = vld [vmem:[%s933_s26] sm:$0xff]  ;;  %s910_s28 = scalar_lea.vmem %s2099_s18, %s909_s25 [#allocation4]  ;;  %s2100_s29 = scalar_lea.vmem [#allocation5], %s1770_s22 }
 0x3c1   : > { %v926_v9 = vrot.slane %v925_v8, 4  ;;  %v945_v11 = vsel %vm944_vm11, %v941_v10, 0.0  ;;  %s912_s15 = scalar_lea.vmem %s2100_s29, %s909_s25 [#allocation5]  ;;  %s914_s28 = smov %s910_s28 }
 0x3c2   : > { %v946_v13 = vrot.slane %v945_v11, 4  ;;  %s934_s15 = smov %s912_s15  ;;  %s984_s27 = sshrl.u32 (%p1744_p3), %s1729_s12, 3 }
 0x3c3   : > { %v927_v12 = vadd.f32 %v926_v9, %v925_v8  ;;  %s2101_s19 = scalar_lea.vmem (%p1744_p3), [#allocation4], %s1770_s22  ;;  %s1436_s26 = sshll.u32 (%p1744_p3), %s984_s27, 3 }
 0x3c4   : > { %v947_v15 = vadd.f32 %v946_v13, %v945_v11  ;;  %s986_s29 = scalar_lea.vmem (%p1744_p3), %s2088_s4, %s1436_s26 }
 0x3c5   : > { %v928_v14 = vrot.slane %v927_v12, 2 }
 0x3c6   : > { %v948_v17 = vrot.slane %v947_v15, 2 }
 0x3c7   : > { %v929_v16 = vadd.f32 %v928_v14, %v927_v12 }
 0x3c8   : > { %v949_v6 = vadd.f32 %v948_v17, %v947_v15  ;;  %983 = sbr.rel (!%p1744_p3) target bundleno = 982 (0x3d6), region = 174 }
 0x3c9   : > { %v930_v5 = vrot.slane %v929_v16, 1 }
 0x3ca   : > { %v950_v19 = vrot.slane %v949_v6, 1 }
 0x3cb   : > { %v931_v18 = vadd.f32 %v930_v5, %v929_v16 }
 0x3cc   : > { %v951_v20 = vadd.f32 %v950_v19, %v949_v6 }
 0x3cd   : > { %932 = vst [vmem:[%s914_s28] sm:$0x1] %v931_v18 }
 0x3ce   : > { %952 = vst [vmem:[%s934_s15] sm:$0x1] %v951_v20 }
 0x3d4   : > { %v1014_v21 = vld [vmem:[%s2101_s19] sm:$0xff] }
 0x3d5   : > { %1015 = vst [vmem:[%s986_s29] sm:$0xff] %v1014_v21 }
 0x3d6 PF: > { %1021 = sbr.rel (!%p1744_p3) target bundleno = 990 (0x3de), region = 212  ;;  %s1022_s28 = sshrl.u32 (%p1744_p3), %s1729_s12, 3 }
 0x3d7   : > { %s2102_s15 = scalar_lea.vmem (%p1744_p3), [#allocation5], %s1770_s22  ;;  %s1437_s0 = sshll.u32 (%p1744_p3), %s1022_s28, 3 }
 0x3d8   : > { %s1024_s19 = scalar_lea.vmem (%p1744_p3), %s2089_s5, %s1437_s0 }
 0x3dc   : > { %v1052_v22 = vld [vmem:[%s2102_s15] sm:$0xff] (%p1744_p3) }
 0x3dd   : > { %1053 = vst [vmem:[%s1024_s19] sm:$0xff] %v1052_v22 }
 0x3de PF: > { %s2003_s27 = sshll.u32 %s1729_s12, 7  ;;  %s1073_s26 = sshll.u32 %s1779_s30, 4  ;;  %s1074_s26 = int_to_ptr.vmem [resolvable:$true] %s1073_s26 }
 0x3df   : > { %s1071_s18 = scalar_lea.hbm %s2091_s7, %s2003_s27  ;;  %s1508_s22 = scalar_lea.vmem %s1074_s26, 128 }
 0x3e0   : > { %p1509_p13 = scmp.ne.s32.totalorder %s1074_s26, %s1508_s22  ;;  %s1659_s29 = smov [#allocation8]  }
 0x3e1   : > { %s1510_s28 = sshll.u32 %s1659_s29, 4  ;;  %s1511_s28 = int_to_ptr.vmem [resolvable:$false] %s1510_s28 }
 0x3e2   : > { %s1512_s17 = scalar_lea.vmem %s1511_s28, 256  ;;  %p1513_p0 = scmp.lt.s32.totalorder %s1074_s26, %s1511_s28 }
 0x3e3   : > { %p1514_p1 = scmp.lt.s32.totalorder %s1512_s17, %s1508_s22 }
 0x3e5   : > { %p1515_p2 = por %p1514_p1, %p1513_p0 }
 0x3e7   : > { %p1516_p3 = pnand %p1515_p2, %p1509_p13 }
 0x3e9   : > { %1519 = shalt.err (!%p1516_p3)
}
 0x3ea   : > { %s1520_s12 = scalar_lea.hbm %s1071_s18, 128  ;;  %s1522_s0 = scalar_lea.hbm %s2091_s7, 2048 }
 0x3eb   : > { %p1521_p4 = scmp.ne.s32.totalorder %s1071_s18, %s1520_s12  ;;  %p1523_p5 = scmp.lt.u32.totalorder %s1071_s18, %s2091_s7 }
 0x3ec   : > { %p1524_p6 = scmp.lt.u32.totalorder %s1522_s0, %s1520_s12  ;;  %p1526_p8 = scmp.lt.u32.totalorder %s1520_s12, %s1071_s18 }
 0x3ee   : > { %p1525_p7 = por %p1524_p6, %p1523_p5 }
 0x3f0   : > { %p1527_p9 = por %p1526_p8, %p1525_p7 }
 0x3f2   : > { %p1528_p10 = pnand %p1527_p9, %p1521_p4 }
 0x3f4   : > { %1531 = shalt.err (!%p1528_p10)
}
 0x3f5   : > { %s2103_s20 = scalar_lea.sflag [#allocation9], %s1766_s13  ;;  %s1061_s29 = scalar_lea.hbm %s2090_s6, %s2003_s27 }
 0x3f6   : > { %1076 = dma.vmem_to_hbm [thread:$0]  %s1074_s26, 128, %s1071_s18, %s2103_s20  }
 0x3f7   : > { %s1063_s28 = sshll.u32 %s1776_s16, 4  ;;  %s2027_s30 = scalar_lea.hbm %s2092_s8, %s2003_s27  ;;  %s1064_s28 = int_to_ptr.vmem [resolvable:$true] %s1063_s28 }
 0x3f8   : > { %s1532_s12 = scalar_lea.vmem %s1064_s28, 128  ;;  %s1660_s0 = smov [#allocation6]  }
 0x3f9   : > { %p1533_p11 = scmp.ne.s32.totalorder %s1064_s28, %s1532_s12  ;;  %s1534_s15 = sshll.u32 %s1660_s0, 4  ;;  %s1535_s15 = int_to_ptr.vmem [resolvable:$false] %s1534_s15 }
 0x3fa   : > { %s1536_s19 = scalar_lea.vmem %s1535_s15, 256  ;;  %p1537_p12 = scmp.lt.s32.totalorder %s1064_s28, %s1535_s15 }
 0x3fb   : > { %p1538_p13 = scmp.lt.s32.totalorder %s1536_s19, %s1532_s12 }
 0x3fd   : > { %p1539_p0 = por %p1538_p13, %p1537_p12 }
 0x3ff   : > { %p1540_p1 = pnand %p1539_p0, %p1533_p11 }
 0x401   : > { %1543 = shalt.err (!%p1540_p1)
}
 0x402   : > { %s1544_s26 = scalar_lea.hbm %s1061_s29, 128  ;;  %s1546_s20 = scalar_lea.hbm %s2090_s6, 2048 }
 0x403   : > { %p1545_p2 = scmp.ne.s32.totalorder %s1061_s29, %s1544_s26  ;;  %p1547_p3 = scmp.lt.u32.totalorder %s1061_s29, %s2090_s6 }
 0x404   : > { %p1548_p4 = scmp.lt.u32.totalorder %s1546_s20, %s1544_s26  ;;  %p1550_p6 = scmp.lt.u32.totalorder %s1544_s26, %s1061_s29 }
 0x406   : > { %p1549_p5 = por %p1548_p4, %p1547_p3 }
 0x408   : > { %p1551_p7 = por %p1550_p6, %p1549_p5 }
 0x40a   : > { %p1552_p8 = pnand %p1551_p7, %p1545_p2 }
 0x40c   : > { %1555 = shalt.err (!%p1552_p8)
}
 0x40d   : > { %s2104_s17 = scalar_lea.sflag [#allocation7], %s1766_s13  ;;  %s1083_s23 = sshll.u32 %s1782_s21, 4  ;;  %s1084_s23 = int_to_ptr.vmem [resolvable:$true] %s1083_s23 }
 0x40e   : > { %1066 = dma.vmem_to_hbm [thread:$0]  %s1064_s28, 128, %s1061_s29, %s2104_s17  }
 0x40f   : > { %s2042_s15 = scalar_lea.hbm %s2093_s9, %s2003_s27  ;;  %s1093_s19 = sshll.u32 %s1785_s24, 4  ;;  %s1094_s19 = int_to_ptr.vmem [resolvable:$true] %s1093_s19 }
 0x410   : > { %s1556_s16 = scalar_lea.vmem %s1084_s23, 128  ;;  %s1661_s26 = smov [#allocation10]  }
 0x411   : > { %p1557_p9 = scmp.ne.s32.totalorder %s1084_s23, %s1556_s16  ;;  %s1558_s18 = sshll.u32 %s1661_s26, 4  ;;  %s1559_s18 = int_to_ptr.vmem [resolvable:$false] %s1558_s18 }
 0x412   : > { %s1560_s20 = scalar_lea.vmem %s1559_s18, 256  ;;  %p1561_p10 = scmp.lt.s32.totalorder %s1084_s23, %s1559_s18 }
 0x413   : > { %p1562_p11 = scmp.lt.s32.totalorder %s1560_s20, %s1556_s16 }
 0x415   : > { %p1563_p12 = por %p1562_p11, %p1561_p10 }
 0x417   : > { %p1564_p13 = pnand %p1563_p12, %p1557_p9 }
 0x419   : > { %1567 = shalt.err (!%p1564_p13)
}
 0x41a   : > { %s1568_s21 = scalar_lea.hbm %s2027_s30, 128  ;;  %s1570_s24 = scalar_lea.hbm %s2092_s8, 2048 }
 0x41b   : > { %p1569_p0 = scmp.ne.s32.totalorder %s2027_s30, %s1568_s21  ;;  %p1571_p1 = scmp.lt.u32.totalorder %s2027_s30, %s2092_s8 }
 0x41c   : > { %p1572_p2 = scmp.lt.u32.totalorder %s1570_s24, %s1568_s21  ;;  %p1574_p4 = scmp.lt.u32.totalorder %s1568_s21, %s2027_s30 }
 0x41e   : > { %p1573_p3 = por %p1572_p2, %p1571_p1 }
 0x420   : > { %p1575_p5 = por %p1574_p4, %p1573_p3 }
 0x422   : > { %p1576_p6 = pnand %p1575_p5, %p1569_p0 }
 0x424   : > { %1579 = shalt.err (!%p1576_p6)
}
 0x425   : > { %s2105_s22 = scalar_lea.sflag [#allocation9], %s1766_s13  ;;  %s1580_s17 = scalar_lea.vmem %s1094_s19, 128 }
 0x426   : > { %1086 = dma.vmem_to_hbm [thread:$0]  %s1084_s23, 128, %s2027_s30, %s2105_s22  }
 0x427   : > { %p1581_p7 = scmp.ne.s32.totalorder %s1094_s19, %s1580_s17  ;;  %s1662_s12 = smov [#allocation11]  }
 0x428   : > { %s1582_s0 = sshll.u32 %s1662_s12, 4  ;;  %s1583_s0 = int_to_ptr.vmem [resolvable:$false] %s1582_s0 }
 0x429   : > { %s1584_s16 = scalar_lea.vmem %s1583_s0, 256  ;;  %p1585_p8 = scmp.lt.s32.totalorder %s1094_s19, %s1583_s0 }
 0x42a   : > { %p1586_p9 = scmp.lt.s32.totalorder %s1584_s16, %s1580_s17 }
 0x42c   : > { %p1587_p10 = por %p1586_p9, %p1585_p8 }
 0x42e   : > { %p1588_p11 = pnand %p1587_p10, %p1581_p7 }
 0x430   : > { %1591 = shalt.err (!%p1588_p11)
}
 0x431   : > { %s1592_s26 = scalar_lea.hbm %s2042_s15, 128  ;;  %s1594_s23 = scalar_lea.hbm %s2093_s9, 2048 }
 0x432   : > { %p1593_p12 = scmp.ne.s32.totalorder %s2042_s15, %s1592_s26  ;;  %p1595_p13 = scmp.lt.u32.totalorder %s2042_s15, %s2093_s9 }
 0x433   : > { %p1596_p0 = scmp.lt.u32.totalorder %s1594_s23, %s1592_s26  ;;  %p1598_p2 = scmp.lt.u32.totalorder %s1592_s26, %s2042_s15 }
 0x435   : > { %p1597_p1 = por %p1596_p0, %p1595_p13 }
 0x437   : > { %p1599_p3 = por %p1598_p2, %p1597_p1 }
 0x439   : > { %p1600_p4 = pnand %p1599_p3, %p1593_p12 }
 0x43b   : > { %1603 = shalt.err (!%p1600_p4)
}
 0x43c   : > { %s2106_s27 = scalar_lea.sflag [#allocation12], %s1766_s13 }
 0x43d   : > { %1096 = dma.vmem_to_hbm [thread:$0]  %s1094_s19, 128, %s2042_s15, %s2106_s27  }
 0x43e PF: > { %p1456_p5 = scmp.ge.s32.totalorder %s1646_s11, 2  ;;  %s2107_s29 = sadd.s32 4294967294, %s1646_s11  }
 0x43f   : > { %s1116_s24 = sand.u32 1, %s2107_s29  }
 0x440   : > { %s1117_s28 = scalar_lea.sflag [#allocation7], %s1116_s24 }
 0x441   : > { %1625 = dma.done.wait (%p1456_p5), %s1117_s28, 128  }
 0x442   : > { %1627 = vsyncadd (%p1456_p5), %s1117_s28, 4294967168  ;;  %s1123_s25 = scalar_lea.sflag [#allocation9], %s1116_s24 }
 0x443   : > { %1629 = dma.done.wait (%p1456_p5), %s1123_s25, 256  }
 0x444   : > { %1631 = vsyncadd (%p1456_p5), %s1123_s25, 4294967040  ;;  %s1135_s22 = scalar_lea.sflag [#allocation12], %s1116_s24 }
 0x445   : > { %1633 = dma.done.wait (%p1456_p5), %s1135_s22, 128  }
 0x446   : > { %1635 = vsyncadd (%p1456_p5), %s1135_s22, 4294967168  ;;  %s2108_s13 = sld [smem:[#allocation29_spill]]  ;;  %p22_p6 = scmp.ge.s32.totalorder %s1733_s14, 18  }
 0x447   : > { %s2109_s30 = smov %s1642_s10  ;;  %s2111_s11 = smov %s1733_s14 }
 0x448   :  { %24 = sbr.rel (!%p22_p6) target bundleno = 9 (0x9), region = 390 }
 0x44c   : > { %s2110_s10 = smov %s2108_s13 }
 0x44f   :  { %1140 = vsyncpa [#allocation7], 1 }
 0x450   :  { %1142 = vsyncpa [#allocation7 + $0x1], 1 }
 0x451   :  { %1143 = vsyncpa [#allocation9], 1 }
 0x452   :  { %1145 = vsyncpa [#allocation9 + $0x1], 1 }
 0x453   :  { %1146 = vsyncpa [#allocation12], 1 }
 0x454   :  { %1148 = vsyncpa [#allocation12 + $0x1], 1 }

// kernel: reverse
= control target key start
LH: loop header
LB: loop body
LE: loop exit
PB: predicated region body
PF: predicated region fallthrough
CT: control target
= control target key end

     0   :  { %v2_v0 = vlaneseq  ;;  %s117_s0 = inlined_call_operand.vmem [shape: f32[16,16], index: 0, kind: input, shape index: {}]   ;;  %s118_s1 = inlined_call_operand.vmem [shape: f32[16,16], index: 1, kind: output, shape index: {}]  }
   0x1   :  { %v34_v2 = vld [vmem:[%s117_s0] sm:$0xff]  ;;  %v36_v3 = vld [vmem:[%s117_s0 + $0x8] sm:$0xff] }
   0x2   :  { %v3_v1 = vsub.s32 15, %v2_v0 }
   0x4   :  { %4 = vset.pattern.permute.xlu0 %v3_v1 }
   0x5   :  { %42 = vperm.xlu0 %4, %v34_v2  }
   0x9   :  { %48 = vperm.xlu0 %4, %v36_v3  }
  0x84   :  { %v43_v4 = vpop.permute.xlu0 %42 }
  0x85   :  { %81 = vst [vmem:[%s118_s1] sm:$0xff] %v43_v4 }
  0x88   :  { %v49_v5 = vpop.permute.xlu0 %48 }
  0x89   :  { %83 = vst [vmem:[%s118_s1 + $0x8] sm:$0xff] %v49_v5 }

</bundles_post_ra>
